<compile_context>
chip_gen: v5e
topology: v5e:2x2
jax: 0.10.0
libtpu: 0.0.40
codegen_flags: <defaults>
</compile_context>

<pallas_src>
import functools

import jax
import jax.numpy as jnp
from jax import lax
from jax.experimental import pallas as pl
from jax.experimental.pallas import tpu as pltpu


def _fused_kernel(gate_ref, x_ref, w_ref, gamma_ref, beta_ref, o_ref, *, eps, hw):
    # hardsigmoid: relu6(g + 3) / 6 == clip(g/6 + 0.5, 0, 1)            (C_in, 1)
    hs = jnp.clip(gate_ref[...] * (1.0 / 6.0) + 0.5, 0.0, 1.0)

    # Fold the per-input-channel gate into the *small* activation operand
    # (row-wise scale; lane-broadcast of the (C_in, 1) column), keeping the
    # large (C_out, C_in) weight untouched for the MXU.
    xg = x_ref[...] * hs                                               # (C_in, HW)

    # 1x1 conv == channel-major matmul: (C_out, C_in) @ (C_in, HW) -> (C_out, HW)
    y = jnp.dot(w_ref[...], xg, preferred_element_type=jnp.float32)

    # Two-pass (centered) batch statistics per output channel, reducing over
    # the HW lane axis of the resident y tile — avoids E[y^2]-E[y]^2
    # cancellation and matches the reference exactly in structure.
    inv_hw = 1.0 / hw
    mean = jnp.sum(y, axis=1, keepdims=True) * inv_hw                  # (C_out, 1)
    yc = y - mean
    var = jnp.sum(yc * yc, axis=1, keepdims=True) * inv_hw             # biased var

    # Fused BN affine: one scale+shift pass over the (C_out, HW) tile.
    scale = gamma_ref[...] * lax.rsqrt(var + eps)                      # (C_out, 1)
    o_ref[...] = yc * scale + beta_ref[...]


def hardsigmoid_mul_conv_bn(x_gate, x_feat, weight, gamma, beta, *, eps=1e-3):
    """x_gate: (1,C_in,1,1); x_feat: (1,C_in,H,W); weight: (C_out,C_in,1,1)."""
    n, c_in, h, w = x_feat.shape
    assert n == 1, "kernel specialised for batch=1 (as in the reference module)"
    c_out = weight.shape[0]
    hw = h * w

    # Wrapper-side layout plumbing: all straight (free) reshapes, no transposes.
    gate_col = x_gate.reshape(c_in, 1).astype(jnp.float32)             # (C_in, 1)
    x_cm = x_feat.reshape(c_in, hw).astype(jnp.float32)                # (C_in, HW)
    w_cm = weight.reshape(c_out, c_in).astype(jnp.float32)             # (C_out, C_in)
    gamma_col = gamma.reshape(c_out, 1).astype(jnp.float32)
    beta_col = beta.reshape(c_out, 1).astype(jnp.float32)

    cost = pl.CostEstimate(
        flops=2 * hw * c_in * c_out + hw * c_in + 8 * hw * c_out,
        transcendentals=c_out,
        bytes_accessed=4 * (hw * c_in + c_in * c_out + hw * c_out + c_in + 2 * c_out),
    )

    out_cm = pl.pallas_call(
        functools.partial(_fused_kernel, eps=eps, hw=float(hw)),
        out_shape=jax.ShapeDtypeStruct((c_out, hw), jnp.float32),
        in_specs=[pl.BlockSpec(memory_space=pltpu.VMEM)] * 5,
        out_specs=pl.BlockSpec(memory_space=pltpu.VMEM),
        cost_estimate=cost,
    )(gate_col, x_cm, w_cm, gamma_col, beta_col)

    # (C_out, HW) -> (1, C_out, H, W): contiguous reshape, no transpose.
    return out_cm.reshape(1, c_out, h, w)


def _reference(x_gate, x_feat, weight, gamma, beta, eps=1e-3):
    hs = jnp.clip(x_gate / 6.0 + 0.5, 0.0, 1.0)
    x = hs * x_feat                                                    # (1,Cin,H,W)
    y = lax.conv_general_dilated(
        x, weight, window_strides=(1, 1), padding="VALID",
        dimension_numbers=("NCHW", "OIHW", "NCHW"))
    mean = jnp.mean(y, axis=(0, 2, 3), keepdims=True)
    var = jnp.mean((y - mean) ** 2, axis=(0, 2, 3), keepdims=True)
    xhat = (y - mean) / jnp.sqrt(var + eps)
    return gamma.reshape(1, -1, 1, 1) * xhat + beta.reshape(1, -1, 1, 1)


if __name__ == "__main__":
    # Real module shapes: SE gate (1,960,1,1), features (1,960,7,7),
    # 1x1 conv 960 -> 160, BatchNorm2d(160, eps=1e-3).
    C_IN, C_OUT, H, W = 960, 160, 7, 7

    key = jax.random.PRNGKey(0)
    k1, k2, k3, k4, k5 = jax.random.split(key, 5)
    x173 = jax.random.normal(k1, (1, C_IN, 1, 1), dtype=jnp.float32)   # gate
    x169 = jax.random.normal(k2, (1, C_IN, H, W), dtype=jnp.float32)   # features
    conv_w = jax.random.normal(k3, (C_OUT, C_IN, 1, 1), dtype=jnp.float32) * 0.03
    gamma = 1.0 + 0.1 * jax.random.normal(k4, (C_OUT,), dtype=jnp.float32)
    beta = 0.1 * jax.random.normal(k5, (C_OUT,), dtype=jnp.float32)

    out = hardsigmoid_mul_conv_bn(x173, x169, conv_w, gamma, beta)
    out = jax.block_until_ready(out)

    ref = _reference(x173, x169, conv_w, gamma, beta)
    assert out.shape == (1, C_OUT, H, W)
    assert jnp.allclose(out, ref, atol=5e-4, rtol=5e-4), "mismatch vs reference"

    print("KERNEL_OK")
</pallas_src>

<mosaic_0001>
module attributes {stable_mosaic.version = 11 : i64} {
  func.func @_fused_kernel(%arg0: memref<960x1xf32, #tpu.memory_space<vmem>>, %arg1: memref<960x49xf32, #tpu.memory_space<vmem>>, %arg2: memref<160x960xf32, #tpu.memory_space<vmem>>, %arg3: memref<160x1xf32, #tpu.memory_space<vmem>>, %arg4: memref<160x1xf32, #tpu.memory_space<vmem>>, %arg5: memref<160x49xf32, #tpu.memory_space<vmem>>) attributes {dimension_semantics = [], scalar_prefetch = 0 : i64, scratch_operands = 0 : i64, tpu.core_type = #tpu.core_type<tc>} {
    %c0 = arith.constant 0 : index
    %c0_0 = arith.constant 0 : index
    %0 = vector.load %arg0[%c0, %c0_0] : memref<960x1xf32, #tpu.memory_space<vmem>>, vector<960x1xf32>
    %cst = arith.constant 0.166666672 : f32
    %1 = vector.broadcast %cst : f32 to vector<960x1xf32>
    %2 = arith.mulf %0, %1 : vector<960x1xf32>
    %cst_1 = arith.constant 5.000000e-01 : f32
    %3 = vector.broadcast %cst_1 : f32 to vector<960x1xf32>
    %4 = arith.addf %2, %3 : vector<960x1xf32>
    %cst_2 = arith.constant 0.000000e+00 : f32
    %cst_3 = arith.constant 1.000000e+00 : f32
    %5 = vector.broadcast %cst_2 : f32 to vector<960x1xf32>
    %6 = arith.maximumf %5, %4 : vector<960x1xf32>
    %7 = vector.broadcast %cst_3 : f32 to vector<960x1xf32>
    %8 = arith.minimumf %7, %6 : vector<960x1xf32>
    %c0_4 = arith.constant 0 : index
    %c0_5 = arith.constant 0 : index
    %9 = vector.load %arg1[%c0_4, %c0_5] : memref<960x49xf32, #tpu.memory_space<vmem>>, vector<960x49xf32>
    %10 = vector.broadcast %8 : vector<960x1xf32> to vector<960x49xf32>
    %11 = arith.mulf %9, %10 : vector<960x49xf32>
    %c0_6 = arith.constant 0 : index
    %c0_7 = arith.constant 0 : index
    %12 = vector.load %arg2[%c0_6, %c0_7] : memref<160x960xf32, #tpu.memory_space<vmem>>, vector<160x960xf32>
    %cst_8 = arith.constant dense<0.000000e+00> : vector<160x49xf32>
    %13 = tpu.matmul %12, %11, %cst_8 {dimension_numbers = #tpu.dot_dimension_numbers<[1], [0], [0], [1], [0, 0, 1, 1], [], []>} : vector<160x960xf32>, vector<960x49xf32>, vector<160x49xf32> -> vector<160x49xf32>
    %cst_9 = arith.constant dense<0.000000e+00> : vector<160xf32>
    %14 = vector.multi_reduction <add>, %13, %cst_9 [1] : vector<160x49xf32> to vector<160xf32>
    %15 = vector.shape_cast %14 : vector<160xf32> to vector<160x1xf32>
    %cst_10 = arith.constant 0.0204081628 : f32
    %16 = vector.broadcast %cst_10 : f32 to vector<160x1xf32>
    %17 = arith.mulf %15, %16 : vector<160x1xf32>
    %18 = vector.broadcast %17 : vector<160x1xf32> to vector<160x49xf32>
    %19 = arith.subf %13, %18 : vector<160x49xf32>
    %20 = arith.mulf %19, %19 : vector<160x49xf32>
    %cst_11 = arith.constant dense<0.000000e+00> : vector<160xf32>
    %21 = vector.multi_reduction <add>, %20, %cst_11 [1] : vector<160x49xf32> to vector<160xf32>
    %22 = vector.shape_cast %21 : vector<160xf32> to vector<160x1xf32>
    %cst_12 = arith.constant 0.0204081628 : f32
    %23 = vector.broadcast %cst_12 : f32 to vector<160x1xf32>
    %24 = arith.mulf %22, %23 : vector<160x1xf32>
    %c0_13 = arith.constant 0 : index
    %c0_14 = arith.constant 0 : index
    %25 = vector.load %arg3[%c0_13, %c0_14] : memref<160x1xf32, #tpu.memory_space<vmem>>, vector<160x1xf32>
    %cst_15 = arith.constant 1.000000e-03 : f32
    %26 = vector.broadcast %cst_15 : f32 to vector<160x1xf32>
    %27 = arith.addf %24, %26 : vector<160x1xf32>
    %28 = math.rsqrt %27 : vector<160x1xf32>
    %29 = arith.mulf %25, %28 : vector<160x1xf32>
    %30 = vector.broadcast %29 : vector<160x1xf32> to vector<160x49xf32>
    %31 = arith.mulf %19, %30 : vector<160x49xf32>
    %c0_16 = arith.constant 0 : index
    %c0_17 = arith.constant 0 : index
    %32 = vector.load %arg4[%c0_16, %c0_17] : memref<160x1xf32, #tpu.memory_space<vmem>>, vector<160x1xf32>
    %33 = vector.broadcast %32 : vector<160x1xf32> to vector<160x49xf32>
    %34 = arith.addf %31, %33 : vector<160x49xf32>
    %c0_18 = arith.constant 0 : index
    %c0_19 = arith.constant 0 : index
    %35 = vector.load %arg5[%c0_18, %c0_19] : memref<160x49xf32, #tpu.memory_space<vmem>>, vector<160x49xf32>
    tpu.vector_store %arg5[%c0_18, %c0_19], %34 {strides = array<i32>} : memref<160x49xf32, #tpu.memory_space<vmem>>, vector<160x49xf32>,
    return
  }
}

</mosaic_0001>

<bundles_post_ra>
// kernel: tpu_custom_call.1
= control target key start
LH: loop header
LB: loop body
LE: loop exit
PB: predicated region body
PF: predicated region fallthrough
CT: control target
= control target key end

     0   :  { %v3106_v0 = vmov 0   ;;  %vm1620_vm0 = vcmask 523264   ;;  %vm2297_vm1 = vcmask 400384   ;;  %s5302_s0 = inlined_call_operand.vmem [shape: f32[960,1], index: 0, kind: input, shape index: {}]   ;;  %s5303_s1 = inlined_call_operand.vmem [shape: f32[960,49], index: 1, kind: input, shape index: {}]   ;;  %s5304_s2 = inlined_call_operand.vmem [shape: f32[160,960], index: 2, kind: input, shape index: {}]   ;;  %s5305_s4 = inlined_call_operand.vmem [shape: f32[160,1], index: 4, kind: input, shape index: {}]   ;;  %s5306_s3 = inlined_call_operand.vmem [shape: f32[160,1], index: 3, kind: input, shape index: {}]   ;;  %s5307_s5 = inlined_call_operand.vmem [shape: f32[160,49], index: 5, kind: output, shape index: {}]  }
   0x1   :  { %3065 = vset.pattern.permute.xlu2 %v3106_v0  ;;  %3064 = vset.pattern.permute.xlu1 %v3106_v0  ;;  %v24_v1 = vld [vmem:[%s5302_s0 + $0x20] sm:$0xff]  ;;  %v22_v2 = vld [vmem:[%s5302_s0 + $0x10] sm:$0xff]  ;;  %v25_v7 = vld [vmem:[%s5302_s0 + $0x28] sm:$0xff] }
   0x2   :  { %v20_v3 = vld [vmem:[%s5302_s0] sm:$0xff]  ;;  %3063 = vset.pattern.permute.xlu0 %v3106_v0  ;;  %v144_v4 = vmul.f32 0.16666667, %v24_v1  ;;  %v142_v5 = vmul.f32 0.16666667, %v22_v2  ;;  %v23_v8 = vld [vmem:[%s5302_s0 + $0x18] sm:$0xff] }
   0x3   :  { %v140_v6 = vmul.f32 0.16666667, %v20_v3  ;;  %v21_v9 = vld [vmem:[%s5302_s0 + $0x8] sm:$0xff]  ;;  %v145_v13 = vmul.f32 0.16666667, %v25_v7  ;;  %v28_v22 = vld [vmem:[%s5302_s0 + $0x40] sm:$0xff] }
   0x4   :  { %v264_v10 = vadd.f32 0.5, %v144_v4  ;;  %v262_v11 = vadd.f32 0.5, %v142_v5  ;;  %v143_v14 = vmul.f32 0.16666667, %v23_v8  ;;  %v141_v15 = vmul.f32 0.16666667, %v21_v9 }
   0x5   :  { %v260_v12 = vadd.f32 0.5, %v140_v6  ;;  %v265_v19 = vadd.f32 0.5, %v145_v13  ;;  %v27_v23 = vld [vmem:[%s5302_s0 + $0x38] sm:$0xff]  ;;  %v26_v27 = vld [vmem:[%s5302_s0 + $0x30] sm:$0xff]  ;;  %v148_v30 = vmul.f32 0.16666667, %v28_v22 }
   0x6   :  { %v384_v16 = vmax.f32 %v264_v10, 0.0  ;;  %v382_v17 = vmax.f32 %v262_v11, 0.0  ;;  %v263_v20 = vadd.f32 0.5, %v143_v14  ;;  %v261_v21 = vadd.f32 0.5, %v141_v15  ;;  %v31_v40 = vld [vmem:[%s5302_s0 + $0x58] sm:$0xff]  ;;  %v30_v41 = vld [vmem:[%s5302_s0 + $0x50] sm:$0xff] }
   0x7   :  { %v380_v18 = vmax.f32 %v260_v12, 0.0  ;;  %v385_v28 = vmax.f32 %v265_v19, 0.0  ;;  %v147_v31 = vmul.f32 0.16666667, %v27_v23  ;;  %v146_v33 = vmul.f32 0.16666667, %v26_v27 }
   0x8   :  { %v504_v24 = vmin.f32 %v384_v16, 1.0  ;;  %v502_v25 = vmin.f32 %v382_v17, 1.0  ;;  %v383_v29 = vmax.f32 %v263_v20, 0.0  ;;  %v381_v32 = vmax.f32 %v261_v21, 0.0  ;;  %v29_v42 = vld [vmem:[%s5302_s0 + $0x48] sm:$0xff]  ;;  %v34_v55 = vld [vmem:[%s5302_s0 + $0x70] sm:$0xff] }
   0x9   :  { %v500_v26 = vmin.f32 %v380_v18, 1.0  ;;  %v505_v34 = vmin.f32 %v385_v28, 1.0  ;;  %v268_v36 = vadd.f32 0.5, %v148_v30  ;;  %v267_v37 = vadd.f32 0.5, %v147_v31  ;;  %v33_v56 = vld [vmem:[%s5302_s0 + $0x68] sm:$0xff]  ;;  %v32_v57 = vld [vmem:[%s5302_s0 + $0x60] sm:$0xff] }
   0xa   :  { %762 = vperm.xlu2 %3065, %v504_v24   ;;  %752 = vperm.xlu1 %3064, %v502_v25   ;;  %v503_v35 = vmin.f32 %v383_v29, 1.0  ;;  %v501_v38 = vmin.f32 %v381_v32, 1.0  ;;  %v266_v39 = vadd.f32 0.5, %v146_v33  ;;  %v151_v45 = vmul.f32 0.16666667, %v31_v40  ;;  %v37_v6 = vld [vmem:[%s5302_s0 + $0x88] sm:$0xff] }
   0xb   :  { %742 = vperm.xlu0 %3063, %v500_v26   ;;  %v388_v43 = vmax.f32 %v268_v36, 0.0  ;;  %v387_v44 = vmax.f32 %v267_v37, 0.0  ;;  %v150_v46 = vmul.f32 0.16666667, %v30_v41  ;;  %v149_v48 = vmul.f32 0.16666667, %v29_v42 }
   0xc   :  { %v386_v47 = vmax.f32 %v266_v39, 0.0  ;;  %v271_v51 = vadd.f32 0.5, %v151_v45  ;;  %v154_v60 = vmul.f32 0.16666667, %v34_v55  ;;  %v153_v61 = vmul.f32 0.16666667, %v33_v56 }
   0xd   :  { %v508_v49 = vmin.f32 %v388_v43, 1.0  ;;  %v507_v50 = vmin.f32 %v387_v44, 1.0  ;;  %v270_v52 = vadd.f32 0.5, %v150_v46  ;;  %v269_v54 = vadd.f32 0.5, %v149_v48  ;;  %v36_v7 = vld [vmem:[%s5302_s0 + $0x80] sm:$0xff]  ;;  %v35_v8 = vld [vmem:[%s5302_s0 + $0x78] sm:$0xff] }
   0xe   :  { %v506_v53 = vmin.f32 %v386_v47, 1.0  ;;  %v391_v58 = vmax.f32 %v271_v51, 0.0  ;;  %v152_v63 = vmul.f32 0.16666667, %v32_v57  ;;  %v274_v2 = vadd.f32 0.5, %v154_v60  ;;  %v40_v21 = vld [vmem:[%s5302_s0 + $0xa0] sm:$0xff] }
   0xf   :  { %v390_v59 = vmax.f32 %v270_v52, 0.0  ;;  %v389_v62 = vmax.f32 %v269_v54, 0.0  ;;  %v273_v3 = vadd.f32 0.5, %v153_v61  ;;  %v157_v11 = vmul.f32 0.16666667, %v37_v6  ;;  %v39_v22 = vld [vmem:[%s5302_s0 + $0x98] sm:$0xff] }
  0x10   :  { %v511_v0 = vmin.f32 %v391_v58, 1.0  ;;  %v272_v5 = vadd.f32 0.5, %v152_v63  ;;  %v394_v9 = vmax.f32 %v274_v2, 0.0  ;;  %v156_v12 = vmul.f32 0.16666667, %v36_v7  ;;  %v38_v23 = vld [vmem:[%s5302_s0 + $0x90] sm:$0xff] }
  0x11   :  { %v510_v1 = vmin.f32 %v390_v59, 1.0  ;;  %v509_v4 = vmin.f32 %v389_v62, 1.0  ;;  %v393_v10 = vmax.f32 %v273_v3, 0.0  ;;  %v155_v14 = vmul.f32 0.16666667, %v35_v8  ;;  %v43_v36 = vld [vmem:[%s5302_s0 + $0xb8] sm:$0xff] }
  0x12   :  { %767 = vperm.xlu2 %3065, %v505_v34   ;;  %757 = vperm.xlu1 %3064, %v503_v35   ;;  %v392_v13 = vmax.f32 %v272_v5, 0.0  ;;  %v514_v15 = vmin.f32 %v394_v9, 1.0  ;;  %v277_v17 = vadd.f32 0.5, %v157_v11  ;;  %v276_v18 = vadd.f32 0.5, %v156_v12  ;;  %v42_v37 = vld [vmem:[%s5302_s0 + $0xb0] sm:$0xff]  ;;  %v45_v52 = vld [vmem:[%s5302_s0 + $0xc8] sm:$0xff] }
  0x13   :  { %747 = vperm.xlu0 %3063, %v501_v38   ;;  %v513_v16 = vmin.f32 %v393_v10, 1.0  ;;  %v275_v20 = vadd.f32 0.5, %v155_v14  ;;  %v160_v26 = vmul.f32 0.16666667, %v40_v21  ;;  %v159_v27 = vmul.f32 0.16666667, %v39_v22 }
  0x14   :  { %v512_v19 = vmin.f32 %v392_v13, 1.0  ;;  %v397_v24 = vmax.f32 %v277_v17, 0.0  ;;  %v396_v25 = vmax.f32 %v276_v18, 0.0  ;;  %v158_v29 = vmul.f32 0.16666667, %v38_v23  ;;  %v41_v38 = vld [vmem:[%s5302_s0 + $0xa8] sm:$0xff] }
  0x15   :  { %v395_v28 = vmax.f32 %v275_v20, 0.0  ;;  %v280_v32 = vadd.f32 0.5, %v160_v26  ;;  %v279_v33 = vadd.f32 0.5, %v159_v27  ;;  %v163_v41 = vmul.f32 0.16666667, %v43_v36  ;;  %v46_v51 = vld [vmem:[%s5302_s0 + $0xd0] sm:$0xff] }
  0x16   :  { %v517_v30 = vmin.f32 %v397_v24, 1.0  ;;  %v516_v31 = vmin.f32 %v396_v25, 1.0  ;;  %v278_v35 = vadd.f32 0.5, %v158_v29  ;;  %v162_v42 = vmul.f32 0.16666667, %v42_v37  ;;  %v49_v2 = vld [vmem:[%s5302_s0 + $0xe8] sm:$0xff] }
  0x17   :  { %v515_v34 = vmin.f32 %v395_v28, 1.0  ;;  %v400_v39 = vmax.f32 %v280_v32, 0.0  ;;  %v399_v40 = vmax.f32 %v279_v33, 0.0  ;;  %v161_v44 = vmul.f32 0.16666667, %v41_v38  ;;  %v48_v3 = vld [vmem:[%s5302_s0 + $0xe0] sm:$0xff] }
  0x18   :  { %v398_v43 = vmax.f32 %v278_v35, 0.0  ;;  %v283_v47 = vadd.f32 0.5, %v163_v41  ;;  %v282_v48 = vadd.f32 0.5, %v162_v42  ;;  %v166_v56 = vmul.f32 0.16666667, %v46_v51  ;;  %v52_v17 = vld [vmem:[%s5302_s0 + $0x100] sm:$0xff] }
  0x19   :  { %v520_v45 = vmin.f32 %v400_v39, 1.0  ;;  %v519_v46 = vmin.f32 %v399_v40, 1.0  ;;  %v165_v57 = vmul.f32 0.16666667, %v45_v52  ;;  %v169_v7 = vmul.f32 0.16666667, %v49_v2 }
  0x1a   :  { %782 = vperm.xlu2 %3065, %v508_v49   ;;  %777 = vperm.xlu1 %3064, %v507_v50   ;;  %v518_v49 = vmin.f32 %v398_v43, 1.0  ;;  %v281_v50 = vadd.f32 0.5, %v161_v44  ;;  %v403_v54 = vmax.f32 %v283_v47, 0.0  ;;  %v402_v55 = vmax.f32 %v282_v48, 0.0  ;;  %v51_v18 = vld [vmem:[%s5302_s0 + $0xf8] sm:$0xff]  ;;  %v54_v33 = vld [vmem:[%s5302_s0 + $0x110] sm:$0xff] }
  0x1b   :  { %772 = vperm.xlu0 %3063, %v506_v53   ;;  %v44_v53 = vld [vmem:[%s5302_s0 + $0xc0] sm:$0xff]  ;;  %v286_v62 = vadd.f32 0.5, %v166_v56  ;;  %v285_v63 = vadd.f32 0.5, %v165_v57  ;;  %v168_v8 = vmul.f32 0.16666667, %v48_v3  ;;  %v289_v13 = vadd.f32 0.5, %v169_v7 }
  0x1c   :  { %v401_v58 = vmax.f32 %v281_v50, 0.0  ;;  %v164_v59 = vmul.f32 0.16666667, %v44_v53  ;;  %v523_v60 = vmin.f32 %v403_v54, 1.0  ;;  %v522_v61 = vmin.f32 %v402_v55, 1.0  ;;  %v55_v32 = vld [vmem:[%s5302_s0 + $0x118] sm:$0xff] }
  0x1d   :  { %v406_v5 = vmax.f32 %v286_v62, 0.0  ;;  %v405_v6 = vmax.f32 %v285_v63, 0.0  ;;  %v288_v14 = vadd.f32 0.5, %v168_v8  ;;  %v409_v20 = vmax.f32 %v289_v13, 0.0  ;;  %v58_v47 = vld [vmem:[%s5302_s0 + $0x130] sm:$0xff]  ;;  %v57_v48 = vld [vmem:[%s5302_s0 + $0x128] sm:$0xff] }
  0x1e   :  { %v172_v22 = vmul.f32 0.16666667, %v52_v17  ;;  %v171_v23 = vmul.f32 0.16666667, %v51_v18  ;;  %v175_v37 = vmul.f32 0.16666667, %v55_v32 }
  0x1f   :  { %v526_v11 = vmin.f32 %v406_v5, 1.0  ;;  %v525_v12 = vmin.f32 %v405_v6, 1.0  ;;  %v408_v21 = vmax.f32 %v288_v14, 0.0  ;;  %v529_v26 = vmin.f32 %v409_v20, 1.0  ;;  %v61_v62 = vld [vmem:[%s5302_s0 + $0x148] sm:$0xff]  ;;  %v60_v63 = vld [vmem:[%s5302_s0 + $0x140] sm:$0xff] }
  0x20   :  { %v292_v28 = vadd.f32 0.5, %v172_v22  ;;  %v291_v29 = vadd.f32 0.5, %v171_v23  ;;  %v174_v38 = vmul.f32 0.16666667, %v54_v33  ;;  %v295_v43 = vadd.f32 0.5, %v175_v37  ;;  %v64_v14 = vld [vmem:[%s5302_s0 + $0x160] sm:$0xff] }
  0x21   :  { %v528_v27 = vmin.f32 %v408_v21, 1.0  ;;  %v178_v52 = vmul.f32 0.16666667, %v58_v47  ;;  %v177_v53 = vmul.f32 0.16666667, %v57_v48  ;;  %v65_v32 = vld [vmem:[%s5302_s0 + $0x168] sm:$0xff] }
  0x22   :  { %797 = vperm.xlu2 %3065, %v511_v0   ;;  %792 = vperm.xlu1 %3064, %v510_v1   ;;  %v521_v0 = vmin.f32 %v401_v58, 1.0  ;;  %v284_v1 = vadd.f32 0.5, %v164_v59  ;;  %v412_v35 = vmax.f32 %v292_v28, 0.0  ;;  %v411_v36 = vmax.f32 %v291_v29, 0.0  ;;  %v69_v47 = vld [vmem:[%s5302_s0 + $0x188] sm:$0xff]  ;;  %v68_v48 = vld [vmem:[%s5302_s0 + $0x180] sm:$0xff] }
  0x23   :  { %787 = vperm.xlu0 %3063, %v509_v4   ;;  %v47_v4 = vld [vmem:[%s5302_s0 + $0xd8] sm:$0xff]  ;;  %v294_v44 = vadd.f32 0.5, %v174_v38  ;;  %v415_v50 = vmax.f32 %v295_v43, 0.0  ;;  %v298_v58 = vadd.f32 0.5, %v178_v52  ;;  %v297_v59 = vadd.f32 0.5, %v177_v53 }
  0x24   :  { %v404_v9 = vmax.f32 %v284_v1, 0.0  ;;  %v167_v10 = vmul.f32 0.16666667, %v47_v4  ;;  %v532_v41 = vmin.f32 %v412_v35, 1.0  ;;  %v531_v42 = vmin.f32 %v411_v36, 1.0 }
  0x25   :  { %v414_v51 = vmax.f32 %v294_v44, 0.0  ;;  %v535_v56 = vmin.f32 %v415_v50, 1.0  ;;  %v418_v1 = vmax.f32 %v298_v58, 0.0  ;;  %v417_v2 = vmax.f32 %v297_v59, 0.0 }
  0x26   :  { %v181_v3 = vmul.f32 0.16666667, %v61_v62  ;;  %v180_v4 = vmul.f32 0.16666667, %v60_v63  ;;  %v185_v38 = vmul.f32 0.16666667, %v65_v32 }
  0x27   :  { %v534_v57 = vmin.f32 %v414_v51, 1.0  ;;  %v538_v8 = vmin.f32 %v418_v1, 1.0  ;;  %v189_v52 = vmul.f32 0.16666667, %v69_v47  ;;  %v72_v1 = vld [vmem:[%s5302_s0 + $0x1a0] sm:$0xff] }
  0x2a   :  { %812 = vperm.xlu2 %3065, %v514_v15   ;;  %807 = vperm.xlu1 %3064, %v513_v16   ;;  %v524_v15 = vmin.f32 %v404_v9, 1.0  ;;  %v287_v16 = vadd.f32 0.5, %v167_v10  ;;  %v537_v9 = vmin.f32 %v417_v2, 1.0  ;;  %v301_v10 = vadd.f32 0.5, %v181_v3  ;;  %v71_v2 = vld [vmem:[%s5302_s0 + $0x198] sm:$0xff] }
  0x2b   :  { %802 = vperm.xlu0 %3063, %v512_v19   ;;  %v50_v19 = vld [vmem:[%s5302_s0 + $0xf0] sm:$0xff] }
  0x2c   :  { %v407_v24 = vmax.f32 %v287_v16, 0.0  ;;  %v170_v25 = vmul.f32 0.16666667, %v50_v19  ;;  %v62_v16 = vld [vmem:[%s5302_s0 + $0x150] sm:$0xff]  ;;  %v421_v17 = vmax.f32 %v301_v10, 0.0 }
  0x2d   :  { %v184_v19 = vmul.f32 0.16666667, %v64_v14  ;;  %v182_v22 = vmul.f32 0.16666667, %v62_v16 }
  0x2f   :  { %v302_v29 = vadd.f32 0.5, %v182_v22 }
  0x31   :  { %v422_v37 = vmax.f32 %v302_v29, 0.0 }
  0x32   :  { %827 = vperm.xlu2 %3065, %v517_v30   ;;  %822 = vperm.xlu1 %3064, %v516_v31   ;;  %v527_v30 = vmin.f32 %v407_v24, 1.0  ;;  %v290_v31 = vadd.f32 0.5, %v170_v25  ;;  %v541_v24 = vmin.f32 %v421_v17, 1.0 }
  0x33   :  { %817 = vperm.xlu0 %3063, %v515_v34   ;;  %v53_v34 = vld [vmem:[%s5302_s0 + $0x108] sm:$0xff]  ;;  %v542_v44 = vmin.f32 %v422_v37, 1.0 }
  0x34   :  { %v410_v39 = vmax.f32 %v290_v31, 0.0  ;;  %v173_v40 = vmul.f32 0.16666667, %v53_v34  ;;  %v66_v31 = vld [vmem:[%s5302_s0 + $0x170] sm:$0xff] }
  0x35   :  { %v186_v36 = vmul.f32 0.16666667, %v66_v31 }
  0x37   :  { %v306_v43 = vadd.f32 0.5, %v186_v36 }
  0x39   :  { %v426_v50 = vmax.f32 %v306_v43, 0.0 }
  0x3a   :  { %842 = vperm.xlu2 %3065, %v520_v45   ;;  %837 = vperm.xlu1 %3064, %v519_v46   ;;  %v530_v45 = vmin.f32 %v410_v39, 1.0  ;;  %v293_v46 = vadd.f32 0.5, %v173_v40 }
  0x3b   :  { %832 = vperm.xlu0 %3063, %v518_v49   ;;  %v56_v49 = vld [vmem:[%s5302_s0 + $0x120] sm:$0xff]  ;;  %v546_v59 = vmin.f32 %v426_v50, 1.0 }
  0x3c   :  { %v413_v54 = vmax.f32 %v293_v46, 0.0  ;;  %v176_v55 = vmul.f32 0.16666667, %v56_v49  ;;  %v70_v46 = vld [vmem:[%s5302_s0 + $0x190] sm:$0xff] }
  0x3d   :  { %v190_v51 = vmul.f32 0.16666667, %v70_v46 }
  0x42   :  { %857 = vperm.xlu2 %3065, %v523_v60   ;;  %852 = vperm.xlu1 %3064, %v522_v61   ;;  %v533_v60 = vmin.f32 %v413_v54, 1.0  ;;  %v296_v61 = vadd.f32 0.5, %v176_v55  ;;  %v188_v54 = vmul.f32 0.16666667, %v68_v48 }
  0x43   :  { %847 = vperm.xlu0 %3063, %v521_v0   ;;  %v59_v0 = vld [vmem:[%s5302_s0 + $0x138] sm:$0xff] }
  0x44   :  { %v416_v5 = vmax.f32 %v296_v61, 0.0  ;;  %v179_v6 = vmul.f32 0.16666667, %v59_v0  ;;  %v309_v61 = vadd.f32 0.5, %v189_v52  ;;  %v308_v63 = vadd.f32 0.5, %v188_v54  ;;  %v73_v0 = vld [vmem:[%s5302_s0 + $0x1a8] sm:$0xff] }
  0x46   :  { %v299_v13 = vadd.f32 0.5, %v179_v6  ;;  %v192_v6 = vmul.f32 0.16666667, %v72_v1 }
  0x48   :  { %v419_v21 = vmax.f32 %v299_v13, 0.0  ;;  %v312_v16 = vadd.f32 0.5, %v192_v6 }
  0x4a   :  { %872 = vperm.xlu2 %3065, %v526_v11   ;;  %867 = vperm.xlu1 %3064, %v525_v12   ;;  %v300_v11 = vadd.f32 0.5, %v180_v4  ;;  %v536_v12 = vmin.f32 %v416_v5, 1.0  ;;  %v539_v28 = vmin.f32 %v419_v21, 1.0  ;;  %v429_v4 = vmax.f32 %v309_v61, 0.0  ;;  %v74_v21 = vld [vmem:[%s5302_s0 + $0x1b0] sm:$0xff]  ;;  %v81_v61 = vld [vmem:[%s5302_s0 + $0x1e8] sm:$0xff] }
  0x4b   :  { %862 = vperm.xlu0 %3063, %v524_v15   ;;  %v63_v15 = vld [vmem:[%s5302_s0 + $0x158] sm:$0xff]  ;;  %v193_v5 = vmul.f32 0.16666667, %v73_v0 }
  0x4c   :  { %v420_v18 = vmax.f32 %v300_v11, 0.0  ;;  %v183_v20 = vmul.f32 0.16666667, %v63_v15  ;;  %v549_v14 = vmin.f32 %v429_v4, 1.0 }
  0x4d   :  { %v313_v15 = vadd.f32 0.5, %v193_v5 }
  0x4e   :  { %v540_v25 = vmin.f32 %v420_v18, 1.0 }
  0x4f   :  { %v433_v22 = vmax.f32 %v313_v15, 0.0 }
  0x51   :  { %v553_v32 = vmin.f32 %v433_v22, 1.0 }
  0x52   :  { %887 = vperm.xlu2 %3065, %v529_v26   ;;  %882 = vperm.xlu1 %3064, %v528_v27   ;;  %v304_v26 = vadd.f32 0.5, %v184_v19  ;;  %v303_v27 = vadd.f32 0.5, %v183_v20  ;;  %v76_v19 = vld [vmem:[%s5302_s0 + $0x1c0] sm:$0xff]  ;;  %v75_v20 = vld [vmem:[%s5302_s0 + $0x1b8] sm:$0xff] }
  0x53   :  { %877 = vperm.xlu0 %3063, %v527_v30   ;;  %v67_v30 = vld [vmem:[%s5302_s0 + $0x178] sm:$0xff] }
  0x54   :  { %v424_v33 = vmax.f32 %v304_v26, 0.0  ;;  %v423_v34 = vmax.f32 %v303_v27, 0.0  ;;  %v187_v35 = vmul.f32 0.16666667, %v67_v30  ;;  %v195_v26 = vmul.f32 0.16666667, %v75_v20 }
  0x55   :  { %v83_v20 = vld [vmem:[%s5302_s0 + $0x1f8] sm:$0xff] }
  0x56   :  { %v544_v40 = vmin.f32 %v424_v33, 1.0 }
  0x5a   :  { %902 = vperm.xlu2 %3065, %v532_v41   ;;  %897 = vperm.xlu1 %3064, %v531_v42   ;;  %v543_v41 = vmin.f32 %v423_v34, 1.0  ;;  %v307_v42 = vadd.f32 0.5, %v187_v35  ;;  %v315_v35 = vadd.f32 0.5, %v195_v26 }
  0x5b   :  { %892 = vperm.xlu0 %3063, %v530_v45   ;;  %v305_v45 = vadd.f32 0.5, %v185_v38  ;;  %v79_v38 = vld [vmem:[%s5302_s0 + $0x1d8] sm:$0xff] }
  0x5c   :  { %v427_v49 = vmax.f32 %v307_v42, 0.0  ;;  %v435_v43 = vmax.f32 %v315_v35, 0.0  ;;  %v634_v35 = vld [vmem:[%s5303_s1 + $0x70] sm:$0xff] }
  0x5d   :  { %v425_v53 = vmax.f32 %v305_v45, 0.0 }
  0x5e   :  { %v547_v58 = vmin.f32 %v427_v49, 1.0  ;;  %v555_v52 = vmin.f32 %v435_v43, 1.0 }
  0x5f   :  { %v545_v62 = vmin.f32 %v425_v53, 1.0 }
  0x62   :  { %917 = vperm.xlu2 %3065, %v535_v56   ;;  %912 = vperm.xlu1 %3064, %v534_v57  }
  0x63   :  { %907 = vperm.xlu0 %3063, %v533_v60   ;;  %v310_v60 = vadd.f32 0.5, %v190_v51 }
  0x64   :  { %v3263_v7 = vpop.permute.xlu2 %762 }
  0x65   :  { %v430_v3 = vmax.f32 %v310_v60, 0.0  ;;  %v82_v60 = vld [vmem:[%s5302_s0 + $0x1f0] sm:$0xff] }
  0x66   :  { %v202_v1 = vmul.f32 0.16666667, %v82_v60 }
  0x67   :  { %v550_v13 = vmin.f32 %v430_v3, 1.0  ;;  %v201_v3 = vmul.f32 0.16666667, %v81_v61 }
  0x6a   :  { %932 = vperm.xlu2 %3065, %v538_v8   ;;  %927 = vperm.xlu1 %3064, %v537_v9   ;;  %v428_v8 = vmax.f32 %v308_v63, 0.0  ;;  %v191_v9 = vmul.f32 0.16666667, %v71_v2 }
  0x6b   :  { %922 = vperm.xlu0 %3063, %v536_v12  }
  0x6c   :  { %v3274_v23 = vpop.permute.xlu2 %767  ;;  %v548_v17 = vmin.f32 %v428_v8, 1.0  ;;  %v311_v18 = vadd.f32 0.5, %v191_v9 }
  0x6e   :  { %v431_v27 = vmax.f32 %v311_v18, 0.0  ;;  %v85_v18 = vld [vmem:[%s5302_s0 + $0x208] sm:$0xff] }
  0x70   :  { %v551_v36 = vmin.f32 %v431_v27, 1.0 }
  0x72   :  { %947 = vperm.xlu2 %3065, %v541_v24   ;;  %942 = vperm.xlu1 %3064, %v540_v25   ;;  %v432_v24 = vmax.f32 %v312_v16, 0.0  ;;  %v196_v25 = vmul.f32 0.16666667, %v76_v19  ;;  %v321_v16 = vadd.f32 0.5, %v201_v3  ;;  %v84_v19 = vld [vmem:[%s5302_s0 + $0x200] sm:$0xff]  ;;  %v630_v3 = vld [vmem:[%s5303_s1 + $0x50] sm:$0xff] }
  0x73   :  { %937 = vperm.xlu0 %3063, %v539_v28   ;;  %v194_v28 = vmul.f32 0.16666667, %v74_v21  ;;  %v635_v21 = vld [vmem:[%s5303_s1 + $0x78] sm:$0xff]  ;;  %v204_v27 = vmul.f32 0.16666667, %v84_v19  ;;  %v89_v19 = vld [vmem:[%s5302_s0 + $0x228] sm:$0xff] }
  0x74   :  { %v3285_v39 = vpop.permute.xlu2 %782  ;;  %v552_v33 = vmin.f32 %v432_v24, 1.0  ;;  %v316_v34 = vadd.f32 0.5, %v196_v25  ;;  %v205_v24 = vmul.f32 0.16666667, %v85_v18  ;;  %v441_v25 = vmax.f32 %v321_v16, 0.0 }
  0x75   :  { %v314_v37 = vadd.f32 0.5, %v194_v28  ;;  %v203_v28 = vmul.f32 0.16666667, %v83_v20  ;;  %v324_v43 = vadd.f32 0.5, %v204_v27  ;;  %v628_v20 = vld [vmem:[%s5303_s1 + $0x40] sm:$0xff] }
  0x76   :  { %v436_v42 = vmax.f32 %v316_v34, 0.0 }
  0x77   :  { %v434_v46 = vmax.f32 %v314_v37, 0.0 }
  0x78   :  { %v556_v51 = vmin.f32 %v436_v42, 1.0  ;;  %v633_v42 = vld [vmem:[%s5303_s1 + $0x68] sm:$0xff] }
  0x7a   :  { %962 = vperm.xlu2 %3065, %v544_v40   ;;  %957 = vperm.xlu1 %3064, %v543_v41   ;;  %v78_v40 = vld [vmem:[%s5302_s0 + $0x1d0] sm:$0xff]  ;;  %v77_v41 = vld [vmem:[%s5302_s0 + $0x1c8] sm:$0xff] }
  0x7b   :  { %952 = vperm.xlu0 %3063, %v542_v44   ;;  %v199_v44 = vmul.f32 0.16666667, %v79_v38  ;;  %v198_v45 = vmul.f32 0.16666667, %v78_v40  ;;  %v197_v47 = vmul.f32 0.16666667, %v77_v41 }
  0x7c   :  { %v3296_v55 = vpop.permute.xlu2 %797  ;;  %v3298_v56 = vpop.permute.xlu1 %752  ;;  %v325_v38 = vadd.f32 0.5, %v205_v24  ;;  %v561_v40 = vmin.f32 %v441_v25, 1.0 }
  0x7d   :  { %v3300_v57 = vpop.permute.xlu0 %742  ;;  %v319_v53 = vadd.f32 0.5, %v199_v44  ;;  %v318_v54 = vadd.f32 0.5, %v198_v45  ;;  %v323_v44 = vadd.f32 0.5, %v203_v28  ;;  %v88_v45 = vld [vmem:[%s5302_s0 + $0x220] sm:$0xff]  ;;  %v209_v28 = vmul.f32 0.16666667, %v89_v19 }
  0x7e   :  { %v620_v19 = vld [vmem:[%s5303_s1] sm:$0xff] }
  0x7f   :  { %v439_v63 = vmax.f32 %v319_v53, 0.0  ;;  %v438_v0 = vmax.f32 %v318_v54, 0.0  ;;  %v631_v54 = vld [vmem:[%s5303_s1 + $0x58] sm:$0xff]  ;;  %v443_v60 = vmax.f32 %v323_v44, 0.0  ;;  %v625_v44 = vld [vmem:[%s5303_s1 + $0x28] sm:$0xff] }
  0x81   :  { %v559_v9 = vmin.f32 %v439_v63, 1.0 }
  0x82   :  { %977 = vperm.xlu2 %3065, %v547_v58   ;;  %972 = vperm.xlu1 %3064, %v546_v59   ;;  %v554_v58 = vmin.f32 %v434_v46, 1.0  ;;  %v317_v59 = vadd.f32 0.5, %v197_v47  ;;  %v87_v47 = vld [vmem:[%s5302_s0 + $0x218] sm:$0xff] }
  0x83   :  { %967 = vperm.xlu0 %3063, %v545_v62   ;;  %v80_v62 = vld [vmem:[%s5302_s0 + $0x1e0] sm:$0xff]  ;;  %v207_v61 = vmul.f32 0.16666667, %v87_v47 }
  0x84   :  { %v3311_v10 = vpop.permute.xlu2 %812  ;;  %v3313_v11 = vpop.permute.xlu1 %757  ;;  %v437_v2 = vmax.f32 %v317_v59, 0.0  ;;  %v200_v4 = vmul.f32 0.16666667, %v80_v62  ;;  %v444_v59 = vmax.f32 %v324_v43, 0.0 }
  0x85   :  { %v3315_v12 = vpop.permute.xlu0 %747  ;;  %v1354_v46 = vmul.f32 %v3311_v10, %v634_v35  ;;  %v445_v10 = vmax.f32 %v325_v38, 0.0  ;;  %v327_v16 = vadd.f32 0.5, %v207_v61 }
  0x86   :  { %v557_v15 = vmin.f32 %v437_v2, 1.0 }
  0x87   :  { %v447_v25 = vmax.f32 %v327_v16, 0.0 }
  0x8a   :  { %992 = vperm.xlu2 %3065, %v550_v13   ;;  %987 = vperm.xlu1 %3064, %v549_v14   ;;  %v558_v13 = vmin.f32 %v438_v0, 1.0  ;;  %v322_v14 = vadd.f32 0.5, %v202_v1 }
  0x8b   :  { %982 = vperm.xlu0 %3063, %v548_v17   ;;  %v320_v17 = vadd.f32 0.5, %v200_v4  ;;  %v1351_v4 = vmul.f32 %v3296_v55, %v631_v54  ;;  %v90_v55 = vld [vmem:[%s5302_s0 + $0x230] sm:$0xff] }
  0x8c   :  { %v3326_v29 = vpop.permute.xlu2 %827  ;;  %v3328_v30 = vpop.permute.xlu1 %777  ;;  %v442_v22 = vmax.f32 %v322_v14, 0.0  ;;  %v563_v14 = vmin.f32 %v443_v60, 1.0  ;;  %v210_v27 = vmul.f32 0.16666667, %v90_v55  ;;  %v95_v55 = vld [vmem:[%s5302_s0 + $0x258] sm:$0xff] }
  0x8d   :  { %v3330_v31 = vpop.permute.xlu0 %772  ;;  %v440_v26 = vmax.f32 %v320_v17, 0.0 }
  0x8e   :  { %v562_v37 = vmin.f32 %v442_v22, 1.0 }
  0x8f   :  { %v560_v41 = vmin.f32 %v440_v26, 1.0 }
  0x92   :  { %1007 = vperm.xlu2 %3065, %v553_v32   ;;  %1002 = vperm.xlu1 %3064, %v552_v33  }
  0x93   :  { %997 = vperm.xlu0 %3063, %v551_v36  }
  0x94   :  { %v3341_v48 = vpop.permute.xlu2 %842  ;;  %v3343_v49 = vpop.permute.xlu1 %792 }
  0x95   :  { %v3345_v50 = vpop.permute.xlu0 %787  ;;  %v1350_v18 = vmul.f32 %v3343_v49, %v630_v3  ;;  %v627_v49 = vld [vmem:[%s5303_s1 + $0x38] sm:$0xff] }
  0x96   :  { %v1347_v38 = vmul.f32 %v3328_v30, %v627_v49  ;;  %v93_v30 = vld [vmem:[%s5302_s0 + $0x248] sm:$0xff] }
  0x97   :  { %v213_v60 = vmul.f32 0.16666667, %v93_v30 }
  0x9a   :  { %1022 = vperm.xlu2 %3065, %v556_v51   ;;  %1017 = vperm.xlu1 %3064, %v555_v52   ;;  %v86_v51 = vld [vmem:[%s5302_s0 + $0x210] sm:$0xff]  ;;  %v632_v52 = vld [vmem:[%s5303_s1 + $0x60] sm:$0xff] }
  0x9b   :  { %1012 = vperm.xlu0 %3063, %v554_v58   ;;  %v208_v58 = vmul.f32 0.16666667, %v88_v45  ;;  %v206_v62 = vmul.f32 0.16666667, %v86_v51  ;;  %v330_v45 = vadd.f32 0.5, %v210_v27  ;;  %v92_v51 = vld [vmem:[%s5302_s0 + $0x240] sm:$0xff] }
  0x9c   :  { %v3356_v5 = vpop.permute.xlu2 %857  ;;  %v808_v6 = vpop.permute.xlu1 %807  ;;  %v212_v61 = vmul.f32 0.16666667, %v92_v51 }
  0x9d   :  { %v803_v8 = vpop.permute.xlu0 %802  ;;  %v1353_v53 = vmul.f32 %v808_v6, %v633_v42  ;;  %v565_v6 = vmin.f32 %v445_v10, 1.0  ;;  %v326_v17 = vadd.f32 0.5, %v206_v62  ;;  %v567_v42 = vmin.f32 %v447_v25, 1.0 }
  0x9e   :  { %v1352_v1 = vmul.f32 %v803_v8, %v632_v52  ;;  %v91_v8 = vld [vmem:[%s5302_s0 + $0x238] sm:$0xff]  ;;  %v624_v52 = vld [vmem:[%s5303_s1 + $0x20] sm:$0xff] }
  0x9f   :  { %v211_v24 = vmul.f32 0.16666667, %v91_v8  ;;  %v446_v26 = vmax.f32 %v326_v17, 0.0  ;;  %v1344_v3 = vmul.f32 %v3263_v7, %v624_v52  ;;  %v333_v17 = vadd.f32 0.5, %v213_v60  ;;  %v97_v7 = vld [vmem:[%s5302_s0 + $0x268] sm:$0xff] }
  0xa0   :  { %v332_v8 = vadd.f32 0.5, %v212_v61  ;;  %v217_v49 = vmul.f32 0.16666667, %v97_v7  ;;  %v648_v7 = vld [vmem:[%s5303_s1 + $0xe0] sm:$0xff] }
  0xa1   :  { %v566_v43 = vmin.f32 %v446_v26, 1.0 }
  0xa2   :  { %1037 = vperm.xlu2 %3065, %v559_v9   ;;  %1032 = vperm.xlu1 %3064, %v558_v13   ;;  %v328_v9 = vadd.f32 0.5, %v208_v58  ;;  %v564_v13 = vmin.f32 %v444_v59, 1.0  ;;  %v450_v58 = vmax.f32 %v330_v45, 0.0  ;;  %v452_v25 = vmax.f32 %v332_v8, 0.0  ;;  %v98_v45 = vld [vmem:[%s5302_s0 + $0x270] sm:$0xff]  ;;  %v101_v8 = vld [vmem:[%s5302_s0 + $0x288] sm:$0xff] }
  0xa3   :  { %1027 = vperm.xlu0 %3063, %v557_v15   ;;  %v629_v15 = vld [vmem:[%s5303_s1 + $0x48] sm:$0xff] }
  0xa4   :  { %v3370_v32 = vpop.permute.xlu2 %872  ;;  %v3372_v33 = vpop.permute.xlu1 %822  ;;  %v448_v22 = vmax.f32 %v328_v9, 0.0 }
  0xa5   :  { %v818_v34 = vpop.permute.xlu0 %817 }
  0xa6   :  { %v1355_v36 = vmul.f32 %v818_v34, %v635_v21  ;;  %v1349_v21 = vmul.f32 %v3345_v50, %v629_v15  ;;  %v570_v15 = vmin.f32 %v450_v58, 1.0  ;;  %v1468_v58 = vld [vmem:[%s5304_s2 + $0x40] sm:$0xff] }
  0xa8   :  { %1681 = vmatpush.msra.mxu0 %v1355_v36  ;;  %v1348_v36 = vmul.f32 %v3285_v39, %v628_v20  ;;  %v94_v39 = vld [vmem:[%s5302_s0 + $0x250] sm:$0xff] }
  0xa9   :  { %v214_v10 = vmul.f32 0.16666667, %v94_v39 }
  0xaa   :  { %1682 = vmatpush.msra.mxu0 %v1354_v46  ;;  %1052 = vperm.xlu2 %3065, %v562_v37   ;;  %v626_v37 = vld [vmem:[%s5303_s1 + $0x30] sm:$0xff]  ;;  %v329_v46 = vadd.f32 0.5, %v209_v28  ;;  %v1340_v28 = vmul.f32 %v3300_v57, %v620_v19  ;;  %v99_v57 = vld [vmem:[%s5302_s0 + $0x278] sm:$0xff] }
  0xab   :  { %1047 = vperm.xlu1 %3064, %v561_v40   ;;  %1042 = vperm.xlu0 %3063, %v560_v41   ;;  %v568_v40 = vmin.f32 %v448_v22, 1.0  ;;  %v331_v41 = vadd.f32 0.5, %v211_v24  ;;  %v1346_v47 = vmul.f32 %v3330_v31, %v626_v37  ;;  %v623_v31 = vld [vmem:[%s5303_s1 + $0x18] sm:$0xff]  ;;  %v453_v24 = vmax.f32 %v333_v17, 0.0  ;;  %v102_v17 = vld [vmem:[%s5302_s0 + $0x290] sm:$0xff] }
  0xac   :  { %1683 = vmatpush.msra.mxu0 %v1353_v53  ;;  %v3396_v63 = vpop.permute.xlu2 %887  ;;  %v3398_v0 = vpop.permute.xlu1 %837  ;;  %v1345_v53 = vmul.f32 %v3274_v23, %v625_v44  ;;  %v449_v59 = vmax.f32 %v329_v46, 0.0  ;;  %v100_v44 = vld [vmem:[%s5302_s0 + $0x280] sm:$0xff]  ;;  %v651_v46 = vld [vmem:[%s5303_s1 + $0xf8] sm:$0xff]  ;;  %v219_v52 = vmul.f32 0.16666667, %v99_v57  ;;  %v106_v57 = vld [vmem:[%s5302_s0 + $0x2b0] sm:$0xff] }
  0xad   :  { %v3400_v2 = vpop.permute.xlu0 %832  ;;  %v451_v54 = vmax.f32 %v331_v41, 0.0  ;;  %v573_v41 = vmin.f32 %v453_v24, 1.0  ;;  %v220_v30 = vmul.f32 0.16666667, %v100_v44 }
  0xae   :  { %1684 = vmatpush.msra.mxu0 %v1352_v1  ;;  %v569_v16 = vmin.f32 %v449_v59, 1.0 }
  0xaf   :  { %v571_v9 = vmin.f32 %v451_v54, 1.0 }
  0xb0   :  { %1685 = vmatpush.msra.mxu0 %v1351_v4  ;;  %v622_v4 = vld [vmem:[%s5303_s1 + $0x10] sm:$0xff] }
  0xb2   :  { %1686 = vmatpush.msra.mxu0 %v1350_v18  ;;  %1067 = vperm.xlu2 %3065, %v565_v6   ;;  %v1343_v6 = vmul.f32 %v3313_v11, %v623_v31  ;;  %v96_v18 = vld [vmem:[%s5302_s0 + $0x260] sm:$0xff]  ;;  %v1342_v11 = vmul.f32 %v3298_v56, %v622_v4  ;;  %v215_v56 = vmul.f32 0.16666667, %v95_v55  ;;  %v340_v4 = vadd.f32 0.5, %v220_v30  ;;  %v667_v30 = vld [vmem:[%s5303_s1 + $0x178] sm:$0xff] }
  0xb3   :  { %1062 = vperm.xlu1 %3064, %v564_v13   ;;  %1057 = vperm.xlu0 %3063, %v563_v14   ;;  %v621_v13 = vld [vmem:[%s5303_s1 + $0x8] sm:$0xff]  ;;  %v334_v14 = vadd.f32 0.5, %v214_v10  ;;  %v216_v22 = vmul.f32 0.16666667, %v96_v18  ;;  %v650_v10 = vld [vmem:[%s5303_s1 + $0xf0] sm:$0xff] }
  0xb4   :  { %1687 = vmatpush.msra.mxu0 %v1349_v21  ;;  %v3426_v34 = vpop.permute.xlu2 %902  ;;  %v3428_v35 = vpop.permute.xlu1 %852  ;;  %v1341_v20 = vmul.f32 %v3315_v12, %v621_v13  ;;  %v649_v13 = vld [vmem:[%s5303_s1 + $0xe8] sm:$0xff]  ;;  %v460_v55 = vmax.f32 %v340_v4, 0.0 }
  0xb5   :  { %v3431_v50 = vpop.permute.xlu0 %847  ;;  %v454_v21 = vmax.f32 %v334_v14, 0.0  ;;  %v339_v14 = vadd.f32 0.5, %v219_v52  ;;  %v1369_v18 = vmul.f32 %v3396_v63, %v649_v13  ;;  %v1476_v63 = vld [vmem:[%s5304_s2 + $0x80] sm:$0xff]  ;;  %v226_v52 = vmul.f32 0.16666667, %v106_v57 }
  0xb6   :  { %1688 = vmatpush.msra.mxu0 %v1348_v36  ;;  %v1460_v36 = vld [vmem:[%s5304_s2] sm:$0xff] }
  0xb7   :  { %v574_v12 = vmin.f32 %v454_v21, 1.0 }
  0xb8   :  { %1689 = vmatpush.msra.mxu0 %v1347_v38  ;;  %v337_v38 = vadd.f32 0.5, %v217_v49  ;;  %v222_v49 = vmul.f32 0.16666667, %v102_v17 }
  0xba   :  { %1690 = vmatpush.msra.mxu0 %v1346_v47  ;;  %1082 = vperm.xlu2 %3065, %v568_v40   ;;  %v336_v40 = vadd.f32 0.5, %v216_v22  ;;  %v457_v39 = vmax.f32 %v337_v38, 0.0  ;;  %v221_v22 = vmul.f32 0.16666667, %v101_v8  ;;  %v580_v38 = vmin.f32 %v460_v55, 1.0  ;;  %v640_v55 = vld [vmem:[%s5303_s1 + $0xa0] sm:$0xff] }
  0xbb   :  { %1077 = vperm.xlu1 %3064, %v567_v42   ;;  %1072 = vperm.xlu0 %3063, %v566_v43   ;;  %v572_v42 = vmin.f32 %v452_v25, 1.0  ;;  %v335_v43 = vadd.f32 0.5, %v215_v56 }
  0xbc   :  { %1691 = vmatpush.msra.mxu0 %v1345_v53  ;;  %v3457_v62 = vpop.permute.xlu2 %917  ;;  %v3459_v1 = vpop.permute.xlu1 %867  ;;  %v456_v47 = vmax.f32 %v336_v40, 0.0  ;;  %v218_v53 = vmul.f32 0.16666667, %v98_v45  ;;  %v577_v61 = vmin.f32 %v457_v39, 1.0  ;;  %v341_v44 = vadd.f32 0.5, %v221_v22  ;;  %v644_v39 = vld [vmem:[%s5303_s1 + $0xc0] sm:$0xff] }
  0xbd   :  { %v3462_v23 = vpop.permute.xlu0 %862  ;;  %v455_v51 = vmax.f32 %v335_v43, 0.0  ;;  %v342_v43 = vadd.f32 0.5, %v222_v49 }
  0xbe   :  { %1692 = vmatpush.msra.mxu0 %v1344_v3  ;;  %v576_v3 = vmin.f32 %v456_v47, 1.0 }
  0xc0   :  { %1693 = vmatpush.msra.mxu0 %v1343_v6 }
  0xc2   :  { %1694 = vmatpush.msra.mxu0 %v1342_v11  ;;  %1097 = vperm.xlu2 %3065, %v571_v9   ;;  %v575_v9 = vmin.f32 %v455_v51, 1.0  ;;  %v647_v11 = vld [vmem:[%s5303_s1 + $0xd8] sm:$0xff] }
  0xc3   :  { %1092 = vperm.xlu1 %3064, %v570_v15   ;;  %1087 = vperm.xlu0 %3063, %v569_v16   ;;  %v338_v15 = vadd.f32 0.5, %v218_v53  ;;  %v103_v16 = vld [vmem:[%s5302_s0 + $0x298] sm:$0xff]  ;;  %v462_v53 = vmax.f32 %v342_v43, 0.0  ;;  %v637_v43 = vld [vmem:[%s5303_s1 + $0x88] sm:$0xff] }
  0xc4   :  { %1695 = vmatpush.msra.mxu0 %v1341_v20  ;;  %v3485_v26 = vpop.permute.xlu2 %932  ;;  %v883_v27 = vpop.permute.xlu1 %882  ;;  %v223_v19 = vmul.f32 0.16666667, %v103_v16  ;;  %v459_v20 = vmax.f32 %v339_v14, 0.0  ;;  %v346_v14 = vadd.f32 0.5, %v226_v52 }
  0xc5   :  { %v878_v37 = vpop.permute.xlu0 %877  ;;  %v458_v21 = vmax.f32 %v338_v15, 0.0  ;;  %v1368_v56 = vmul.f32 %v883_v27, %v648_v7  ;;  %v645_v27 = vld [vmem:[%s5303_s1 + $0xc8] sm:$0xff]  ;;  %v582_v15 = vmin.f32 %v462_v53, 1.0 }
  0xc6   :  { %1696 = vmatpush.msra.mxu0 %v1340_v28  ;;  %v343_v40 = vadd.f32 0.5, %v223_v19  ;;  %v1365_v47 = vmul.f32 %v3459_v1, %v645_v27  ;;  %v1364_v1 = vmul.f32 %v3462_v23, %v644_v39  ;;  %v641_v23 = vld [vmem:[%s5303_s1 + $0xa8] sm:$0xff]  ;;  %v111_v39 = vld [vmem:[%s5302_s0 + $0x2d8] sm:$0xff] }
  0xc7   :  { %1697 = vmatmul.f32.vlgmr.msra.gmra.mxu0 %v1460_v36  ;;  %v646_v36 = vld [vmem:[%s5303_s1 + $0xd0] sm:$0xff]  ;;  %v109_v7 = vld [vmem:[%s5302_s0 + $0x2c8] sm:$0xff]  ;;  %v1361_v19 = vmul.f32 %v3431_v50, %v641_v23  ;;  %v1492_v50 = vld [vmem:[%s5304_s2 + $0x100] sm:$0xff]  ;;  %v231_v53 = vmul.f32 0.16666667, %v111_v39 }
  0xc8   :  { %v1366_v45 = vmul.f32 %v3370_v32, %v646_v36  ;;  %v643_v32 = vld [vmem:[%s5303_s1 + $0xb8] sm:$0xff]  ;;  %v463_v51 = vmax.f32 %v343_v40, 0.0  ;;  %v114_v23 = vld [vmem:[%s5302_s0 + $0x2f0] sm:$0xff] }
  0xca   :  { %1112 = vperm.xlu2 %3065, %v574_v12   ;;  %v1367_v12 = vmul.f32 %v878_v37, %v647_v11  ;;  %v105_v37 = vld [vmem:[%s5302_s0 + $0x2a8] sm:$0xff]  ;;  %v583_v13 = vmin.f32 %v463_v51, 1.0  ;;  %v107_v11 = vld [vmem:[%s5302_s0 + $0x2b8] sm:$0xff] }
  0xcb   :  { %1107 = vperm.xlu1 %3064, %v573_v41   ;;  %1102 = vperm.xlu0 %3063, %v572_v42   ;;  %v579_v41 = vmin.f32 %v459_v20, 1.0  ;;  %v578_v42 = vmin.f32 %v458_v21, 1.0  ;;  %v466_v20 = vmax.f32 %v346_v14, 0.0  ;;  %v229_v21 = vmul.f32 0.16666667, %v109_v7 }
  0xcc   :  { %v3503_v31 = vpop.permute.xlu2 %947  ;;  %v898_v54 = vpop.permute.xlu1 %897 }
  0xcd   :  { %v893_v59 = vpop.permute.xlu0 %892  ;;  %v1371_v60 = vmul.f32 %v898_v54, %v651_v46  ;;  %v104_v46 = vld [vmem:[%s5302_s0 + $0x2a0] sm:$0xff]  ;;  %v461_v54 = vmax.f32 %v341_v44, 0.0  ;;  %v586_v27 = vmin.f32 %v466_v20, 1.0  ;;  %v349_v44 = vadd.f32 0.5, %v229_v21  ;;  %v665_v21 = vld [vmem:[%s5303_s1 + $0x168] sm:$0xff] }
  0xce   :  { %v1370_v6 = vmul.f32 %v893_v59, %v650_v10  ;;  %v225_v10 = vmul.f32 0.16666667, %v105_v37 }
  0xcf   :  { %1758 = vmatpush.msra.mxu1 %v1371_v60  ;;  %1700 = vmatmul.f32.gmra.mxu0 %v1468_v58  ;;  %v224_v58 = vmul.f32 0.16666667, %v104_v46  ;;  %v581_v16 = vmin.f32 %v461_v54, 1.0  ;;  %v112_v46 = vld [vmem:[%s5302_s0 + $0x2e0] sm:$0xff]  ;;  %v469_v51 = vmax.f32 %v349_v44, 0.0 }
  0xd0   :  { %v345_v17 = vadd.f32 0.5, %v225_v10  ;;  %v232_v52 = vmul.f32 0.16666667, %v112_v46  ;;  %v663_v46 = vld [vmem:[%s5303_s1 + $0x158] sm:$0xff] }
  0xd1   :  { %1759 = vmatpush.msra.mxu1 %v1370_v6  ;;  %v642_v6 = vld [vmem:[%s5303_s1 + $0xb0] sm:$0xff]  ;;  %v344_v8 = vadd.f32 0.5, %v224_v58 }
  0xd2   :  { %1127 = vperm.xlu2 %3065, %v577_v61   ;;  %v1484_v61 = vld [vmem:[%s5304_s2 + $0xc0] sm:$0xff]  ;;  %v465_v49 = vmax.f32 %v345_v17, 0.0  ;;  %v113_v17 = vld [vmem:[%s5302_s0 + $0x2e8] sm:$0xff] }
  0xd3   :  { %1122 = vperm.xlu1 %3064, %v576_v3   ;;  %1117 = vperm.xlu0 %3063, %v575_v9   ;;  %v1363_v9 = vmul.f32 %v3356_v5, %v643_v32  ;;  %v108_v5 = vld [vmem:[%s5302_s0 + $0x2c0] sm:$0xff]  ;;  %v464_v22 = vmax.f32 %v344_v8, 0.0  ;;  %v666_v8 = vld [vmem:[%s5303_s1 + $0x170] sm:$0xff] }
  0xd4   :  { %1760 = vmatpush.msra.mxu1 %v1369_v18  ;;  %v3530_v24 = vpop.permute.xlu2 %962  ;;  %v3532_v25 = vpop.permute.xlu1 %912  ;;  %v1362_v18 = vmul.f32 %v3428_v35, %v642_v6  ;;  %v639_v35 = vld [vmem:[%s5303_s1 + $0x98] sm:$0xff]  ;;  %v636_v32 = vld [vmem:[%s5303_s1 + $0x80] sm:$0xff]  ;;  %v589_v6 = vmin.f32 %v469_v51, 1.0 }
  0xd5   :  { %v3537_v28 = vpop.permute.xlu0 %907  ;;  %v584_v57 = vmin.f32 %v464_v22, 1.0 }
  0xd6   :  { %1761 = vmatpush.msra.mxu1 %v1368_v56  ;;  %v228_v56 = vmul.f32 0.16666667, %v108_v5 }
  0xd7   :  { %1703 = vmatmul.f32.gmra.mxu0 %v1476_v63  ;;  %v227_v63 = vmul.f32 0.16666667, %v107_v11 }
  0xd8   :  { %1762 = vmatpush.msra.mxu1 %v1367_v12 }
  0xd9   :  { %v347_v37 = vadd.f32 0.5, %v227_v63  ;;  %v1508_v63 = vld [vmem:[%s5304_s2 + $0x180] sm:$0xff] }
  0xda   :  { %1763 = vmatpush.msra.mxu1 %v1366_v45  ;;  %1142 = vperm.xlu2 %3065, %v580_v38   ;;  %v1360_v38 = vmul.f32 %v3341_v48, %v640_v55  ;;  %v585_v48 = vmin.f32 %v465_v49, 1.0  ;;  %v348_v45 = vadd.f32 0.5, %v228_v56  ;;  %v234_v55 = vmul.f32 0.16666667, %v114_v23  ;;  %v1469_v49 = vld [vmem:[%s5304_s2 + $0x48] sm:$0xff]  ;;  %v128_v23 = vld [vmem:[%s5302_s0 + $0x360] sm:$0xff] }
  0xdb   :  { %1137 = vperm.xlu1 %3064, %v579_v41   ;;  %1132 = vperm.xlu0 %3063, %v578_v42   ;;  %v638_v41 = vld [vmem:[%s5303_s1 + $0x90] sm:$0xff]  ;;  %v1359_v42 = vmul.f32 %v3398_v0, %v639_v35  ;;  %v467_v10 = vmax.f32 %v347_v37, 0.0  ;;  %v116_v37 = vld [vmem:[%s5302_s0 + $0x300] sm:$0xff] }
  0xdc   :  { %1764 = vmatpush.msra.mxu1 %v1365_v47  ;;  %v978_v59 = vpop.permute.xlu2 %977  ;;  %v3565_v60 = vpop.permute.xlu1 %927  ;;  %v1358_v0 = vmul.f32 %v3400_v2, %v638_v41  ;;  %v110_v47 = vld [vmem:[%s5302_s0 + $0x2d0] sm:$0xff]  ;;  %v468_v54 = vmax.f32 %v348_v45, 0.0  ;;  %v354_v44 = vadd.f32 0.5, %v234_v55  ;;  %v117_v45 = vld [vmem:[%s5302_s0 + $0x308] sm:$0xff] }
  0xdd   :  { %v3571_v3 = vpop.permute.xlu0 %922  ;;  %v1387_v4 = vmul.f32 %v978_v59, %v667_v30  ;;  %v1357_v30 = vmul.f32 %v3326_v29, %v637_v43  ;;  %v230_v2 = vmul.f32 0.16666667, %v110_v47  ;;  %v1500_v29 = vld [vmem:[%s5304_s2 + $0x140] sm:$0xff] }
  0xde   :  { %1765 = vmatpush.msra.mxu1 %v1364_v1  ;;  %v1356_v1 = vmul.f32 %v3372_v33, %v636_v32  ;;  %v588_v14 = vmin.f32 %v468_v54, 1.0  ;;  %v115_v33 = vld [vmem:[%s5302_s0 + $0x2f8] sm:$0xff]  ;;  %v664_v43 = vld [vmem:[%s5303_s1 + $0x160] sm:$0xff] }
  0xdf   :  { %1835 = vmatpush.msra.mxu2 %v1387_v4  ;;  %1706 = vmatmul.f32.gmra.mxu0 %v1484_v61  ;;  %v1461_v61 = vld [vmem:[%s5304_s2 + $0x8] sm:$0xff]  ;;  %v235_v5 = vmul.f32 0.16666667, %v115_v33  ;;  %v1384_v39 = vmul.f32 %v3530_v24, %v664_v43 }
  0xe0   :  { %1766 = vmatpush.msra.mxu1 %v1363_v9  ;;  %v352_v9 = vadd.f32 0.5, %v232_v52  ;;  %v237_v52 = vmul.f32 0.16666667, %v117_v45  ;;  %v1477_v24 = vld [vmem:[%s5304_s2 + $0x88] sm:$0xff] }
  0xe1   :  { %v355_v41 = vadd.f32 0.5, %v235_v5  ;;  %v125_v45 = vld [vmem:[%s5302_s0 + $0x348] sm:$0xff] }
  0xe2   :  { %1767 = vmatpush.msra.mxu1 %v1362_v18  ;;  %1157 = vperm.xlu2 %3065, %v583_v13   ;;  %v351_v13 = vadd.f32 0.5, %v231_v53  ;;  %v472_v7 = vmax.f32 %v352_v9, 0.0  ;;  %v236_v53 = vmul.f32 0.16666667, %v116_v37 }
  0xe3   :  { %1152 = vperm.xlu1 %3064, %v582_v15   ;;  %1147 = vperm.xlu0 %3063, %v581_v16   ;;  %v587_v15 = vmin.f32 %v467_v10, 1.0  ;;  %v350_v16 = vadd.f32 0.5, %v230_v2  ;;  %v475_v47 = vmax.f32 %v355_v41, 0.0 }
  0xe4   :  { %1768 = vmatpush.msra.mxu1 %v1361_v19  ;;  %v3597_v36 = vpop.permute.xlu2 %992  ;;  %v3599_v12 = vpop.permute.xlu1 %942  ;;  %v471_v18 = vmax.f32 %v351_v13, 0.0  ;;  %v233_v19 = vmul.f32 0.16666667, %v113_v17  ;;  %v356_v33 = vadd.f32 0.5, %v236_v53 }
  0xe5   :  { %v3605_v40 = vpop.permute.xlu0 %937  ;;  %v470_v11 = vmax.f32 %v350_v16, 0.0  ;;  %v595_v9 = vmin.f32 %v475_v47, 1.0  ;;  %v357_v16 = vadd.f32 0.5, %v237_v52 }
  0xe6   :  { %1769 = vmatpush.msra.mxu1 %v1360_v38  ;;  %v592_v38 = vmin.f32 %v472_v7, 1.0  ;;  %v659_v7 = vld [vmem:[%s5303_s1 + $0x138] sm:$0xff] }
  0xe7   :  { %1709 = vmatmul.f32.gmra.mxu0 %v1492_v50  ;;  %v591_v50 = vmin.f32 %v471_v18, 1.0  ;;  %v477_v55 = vmax.f32 %v357_v16, 0.0  ;;  %v652_v16 = vld [vmem:[%s5303_s1 + $0x100] sm:$0xff] }
  0xe8   :  { %1770 = vmatpush.msra.mxu1 %v1359_v42 }
  0xea   :  { %1771 = vmatpush.msra.mxu1 %v1358_v0  ;;  %1172 = vperm.xlu2 %3065, %v586_v27   ;;  %v590_v27 = vmin.f32 %v470_v11, 1.0  ;;  %v662_v0 = vld [vmem:[%s5303_s1 + $0x150] sm:$0xff]  ;;  %v248_v11 = vmul.f32 0.16666667, %v128_v23 }
  0xeb   :  { %1167 = vperm.xlu1 %3064, %v585_v48   ;;  %1162 = vperm.xlu0 %3063, %v584_v57   ;;  %v353_v48 = vadd.f32 0.5, %v233_v19  ;;  %v131_v57 = vld [vmem:[%s5302_s0 + $0x378] sm:$0xff]  ;;  %v476_v19 = vmax.f32 %v356_v33, 0.0 }
  0xec   :  { %1772 = vmatpush.msra.mxu1 %v1357_v30  ;;  %v3628_v58 = vpop.permute.xlu2 %1007  ;;  %v3630_v59 = vpop.permute.xlu1 %957  ;;  %v251_v32 = vmul.f32 0.16666667, %v131_v57  ;;  %v474_v30 = vmax.f32 %v354_v44, 0.0  ;;  %v656_v44 = vld [vmem:[%s5303_s1 + $0x120] sm:$0xff] }
  0xed   :  { %v3639_v4 = vpop.permute.xlu0 %952  ;;  %v473_v51 = vmax.f32 %v353_v48, 0.0  ;;  %v1383_v2 = vmul.f32 %v3630_v59, %v663_v46  ;;  %v596_v43 = vmin.f32 %v476_v19, 1.0  ;;  %v127_v46 = vld [vmem:[%s5302_s0 + $0x358] sm:$0xff] }
  0xee   :  { %1773 = vmatpush.msra.mxu1 %v1356_v1  ;;  %v371_v13 = vadd.f32 0.5, %v251_v32  ;;  %v594_v59 = vmin.f32 %v474_v30, 1.0  ;;  %v245_v32 = vmul.f32 0.16666667, %v125_v45  ;;  %v247_v53 = vmul.f32 0.16666667, %v127_v46 }
  0xef   :  { %1774 = vmatmul.f32.vlgmr.msra.gmra.mxu1 %v1461_v61  ;;  %1712 = vmatmul.f32.gmra.mxu0 %v1500_v29  ;;  %v661_v61 = vld [vmem:[%s5303_s1 + $0x148] sm:$0xff]  ;;  %v1516_v29 = vld [vmem:[%s5304_s2 + $0x1c0] sm:$0xff] }
  0xf0   :  { %v1381_v17 = vmul.f32 %v3503_v31, %v661_v61  ;;  %v658_v31 = vld [vmem:[%s5303_s1 + $0x130] sm:$0xff]  ;;  %v491_v5 = vmax.f32 %v371_v13, 0.0  ;;  %v367_v23 = vadd.f32 0.5, %v247_v53 }
  0xf1   :  { %v1378_v41 = vmul.f32 %v3485_v26, %v658_v31  ;;  %v126_v26 = vld [vmem:[%s5302_s0 + $0x350] sm:$0xff] }
  0xf2   :  { %1187 = vperm.xlu2 %3065, %v589_v6   ;;  %v1382_v6 = vmul.f32 %v3639_v4, %v662_v0  ;;  %v129_v4 = vld [vmem:[%s5302_s0 + $0x368] sm:$0xff]  ;;  %v1376_v0 = vmul.f32 %v3571_v3, %v656_v44  ;;  %v246_v52 = vmul.f32 0.16666667, %v126_v26 }
  0xf3   :  { %1182 = vperm.xlu1 %3064, %v588_v14   ;;  %1177 = vperm.xlu0 %3063, %v587_v15   ;;  %v593_v14 = vmin.f32 %v473_v51, 1.0  ;;  %v660_v15 = vld [vmem:[%s5303_s1 + $0x140] sm:$0xff]  ;;  %v1493_v3 = vld [vmem:[%s5304_s2 + $0x108] sm:$0xff] }
  0xf4   :  { %v3653_v35 = vpop.permute.xlu2 %1022  ;;  %v973_v20 = vpop.permute.xlu1 %972  ;;  %v1380_v18 = vmul.f32 %v3599_v12, %v660_v15  ;;  %v1485_v12 = vld [vmem:[%s5304_s2 + $0xc8] sm:$0xff]  ;;  %v366_v33 = vadd.f32 0.5, %v246_v52 }
  0xf5   :  { %v968_v22 = vpop.permute.xlu0 %967  ;;  %v1386_v56 = vmul.f32 %v973_v20, %v666_v8  ;;  %v130_v8 = vld [vmem:[%s5302_s0 + $0x370] sm:$0xff]  ;;  %v249_v20 = vmul.f32 0.16666667, %v129_v4  ;;  %v121_v44 = vld [vmem:[%s5302_s0 + $0x328] sm:$0xff] }
  0xf6   :  { %v1385_v42 = vmul.f32 %v968_v22, %v665_v21  ;;  %v250_v21 = vmul.f32 0.16666667, %v130_v8  ;;  %v124_v8 = vld [vmem:[%s5302_s0 + $0x340] sm:$0xff] }
  0xf7   :  { %1836 = vmatpush.msra.mxu2 %v1386_v56  ;;  %1777 = vmatmul.f32.gmra.mxu1 %v1469_v49  ;;  %v1379_v56 = vmul.f32 %v3605_v40, %v659_v7  ;;  %v597_v40 = vmin.f32 %v477_v55, 1.0  ;;  %v369_v48 = vadd.f32 0.5, %v249_v20  ;;  %v1372_v7 = vmul.f32 %v3426_v34, %v652_v16  ;;  %v1501_v34 = vld [vmem:[%s5304_s2 + $0x148] sm:$0xff] }
  0xf8   :  { %1715 = vmatmul.f32.gmra.mxu0 %v1508_v63  ;;  %v370_v57 = vadd.f32 0.5, %v250_v21  ;;  %v244_v19 = vmul.f32 0.16666667, %v124_v8 }
  0xf9   :  { %1837 = vmatpush.msra.mxu2 %v1385_v42  ;;  %v611_v42 = vmin.f32 %v491_v5, 1.0  ;;  %v489_v30 = vmax.f32 %v369_v48, 0.0  ;;  %v139_v48 = vld [vmem:[%s5302_s0 + $0x3b8] sm:$0xff] }
  0xfa   :  { %1202 = vperm.xlu2 %3065, %v592_v38   ;;  %v657_v38 = vld [vmem:[%s5303_s1 + $0x128] sm:$0xff]  ;;  %v490_v51 = vmax.f32 %v370_v57, 0.0  ;;  %v1470_v57 = vld [vmem:[%s5304_s2 + $0x50] sm:$0xff] }
  0xfb   :  { %1197 = vperm.xlu1 %3064, %v591_v50   ;;  %1192 = vperm.xlu0 %3063, %v590_v27   ;;  %v1524_v50 = vld [vmem:[%s5304_s2 + $0x200] sm:$0xff]  ;;  %v368_v27 = vadd.f32 0.5, %v248_v11  ;;  %v1377_v37 = vmul.f32 %v3565_v60, %v657_v38  ;;  %v654_v60 = vld [vmem:[%s5303_s1 + $0x110] sm:$0xff]  ;;  %v487_v11 = vmax.f32 %v367_v23, 0.0 }
  0xfc   :  { %1838 = vmatpush.msra.mxu2 %v1384_v39  ;;  %v3683_v54 = vpop.permute.xlu2 %1037  ;;  %v3685_v10 = vpop.permute.xlu1 %987  ;;  %v655_v39 = vld [vmem:[%s5303_s1 + $0x118] sm:$0xff]  ;;  %v1374_v13 = vmul.f32 %v3532_v25, %v654_v60  ;;  %v610_v15 = vmin.f32 %v490_v51, 1.0  ;;  %v1548_v51 = vld [vmem:[%s5304_s2 + $0x2c0] sm:$0xff] }
  0xfd   :  { %v3691_v1 = vpop.permute.xlu0 %982  ;;  %v488_v47 = vmax.f32 %v368_v27, 0.0  ;;  %v1375_v61 = vmul.f32 %v3457_v62, %v655_v39  ;;  %v609_v62 = vmin.f32 %v489_v30, 1.0  ;;  %v123_v25 = vld [vmem:[%s5302_s0 + $0x338] sm:$0xff]  ;;  %v241_v39 = vmul.f32 0.16666667, %v121_v44  ;;  %v680_v44 = vld [vmem:[%s5303_s1 + $0x1e0] sm:$0xff] }
  0xfe   :  { %1839 = vmatpush.msra.mxu2 %v1383_v2  ;;  %v243_v55 = vmul.f32 0.16666667, %v123_v25 }
  0xff   :  { %1780 = vmatmul.f32.gmra.mxu1 %v1477_v24 }
 0x100   :  { %1840 = vmatpush.msra.mxu2 %v1382_v6  ;;  %1718 = vmatmul.f32.gmra.mxu0 %v1516_v29  ;;  %v653_v6 = vld [vmem:[%s5303_s1 + $0x108] sm:$0xff]  ;;  %v363_v27 = vadd.f32 0.5, %v243_v55 }
 0x101   :  { %v1373_v4 = vmul.f32 %v3537_v28, %v653_v6  ;;  %v486_v28 = vmax.f32 %v366_v33, 0.0  ;;  %v361_v6 = vadd.f32 0.5, %v241_v39 }
 0x102   :  { %1841 = vmatpush.msra.mxu2 %v1381_v17  ;;  %1217 = vperm.xlu2 %3065, %v595_v9   ;;  %v1532_v9 = vld [vmem:[%s5304_s2 + $0x240] sm:$0xff]  ;;  %v122_v17 = vld [vmem:[%s5302_s0 + $0x330] sm:$0xff]  ;;  %v483_v26 = vmax.f32 %v363_v27, 0.0 }
 0x103   :  { %1212 = vperm.xlu1 %3064, %v594_v59   ;;  %1207 = vperm.xlu0 %3063, %v593_v14   ;;  %v608_v59 = vmin.f32 %v488_v47, 1.0  ;;  %v365_v14 = vadd.f32 0.5, %v245_v32  ;;  %v242_v5 = vmul.f32 0.16666667, %v122_v17  ;;  %v1509_v47 = vld [vmem:[%s5304_s2 + $0x188] sm:$0xff]  ;;  %v481_v23 = vmax.f32 %v361_v6, 0.0 }
 0x104   :  { %1842 = vmatpush.msra.mxu2 %v1380_v18  ;;  %v3720_v49 = vpop.permute.xlu2 %1052  ;;  %v3722_v22 = vpop.permute.xlu1 %1002  ;;  %v1462_v18 = vld [vmem:[%s5304_s2 + $0x10] sm:$0xff] }
 0x105   :  { %v3728_v63 = vpop.permute.xlu0 %997  ;;  %v485_v31 = vmax.f32 %v365_v14, 0.0  ;;  %v120_v14 = vld [vmem:[%s5302_s0 + $0x320] sm:$0xff] }
 0x106   :  { %1843 = vmatpush.msra.mxu2 %v1379_v56  ;;  %v240_v25 = vmul.f32 0.16666667, %v120_v14 }
 0x107   :  { %1783 = vmatmul.f32.gmra.mxu1 %v1485_v12  ;;  %v1540_v12 = vld [vmem:[%s5304_s2 + $0x280] sm:$0xff]  ;;  %v605_v38 = vmin.f32 %v485_v31, 1.0 }
 0x108   :  { %1844 = vmatpush.msra.mxu2 %v1378_v41  ;;  %1721 = vmatmul.f32.gmra.mxu0 %v1524_v50  ;;  %v362_v50 = vadd.f32 0.5, %v242_v5  ;;  %v606_v41 = vmin.f32 %v486_v28, 1.0  ;;  %v1556_v28 = vld [vmem:[%s5304_s2 + $0x300] sm:$0xff] }
 0x10a   :  { %1845 = vmatpush.msra.mxu2 %v1377_v37  ;;  %1297 = vperm.xlu2 %3065, %v611_v42   ;;  %v607_v42 = vmin.f32 %v487_v11, 1.0  ;;  %v482_v45 = vmax.f32 %v362_v50, 0.0 }
 0x10b   :  { %1227 = vperm.xlu1 %3064, %v597_v40   ;;  %1222 = vperm.xlu0 %3063, %v596_v43   ;;  %v364_v40 = vadd.f32 0.5, %v244_v19  ;;  %v138_v43 = vld [vmem:[%s5302_s0 + $0x3b0] sm:$0xff] }
 0x10c   :  { %1846 = vmatpush.msra.mxu2 %v1376_v0  ;;  %v3757_v2 = vpop.permute.xlu2 %1067  ;;  %v3759_v24 = vpop.permute.xlu1 %1017  ;;  %v258_v37 = vmul.f32 0.16666667, %v138_v43  ;;  %v259_v0 = vmul.f32 0.16666667, %v139_v48  ;;  %v602_v52 = vmin.f32 %v482_v45, 1.0  ;;  %v136_v43 = vld [vmem:[%s5302_s0 + $0x3a0] sm:$0xff] }
 0x10d   :  { %v3765_v29 = vpop.permute.xlu0 %1012  ;;  %v484_v46 = vmax.f32 %v364_v40, 0.0  ;;  %v118_v40 = vld [vmem:[%s5302_s0 + $0x310] sm:$0xff]  ;;  %v679_v48 = vld [vmem:[%s5303_s1 + $0x1d8] sm:$0xff] }
 0x10e   :  { %1847 = vmatpush.msra.mxu2 %v1375_v61  ;;  %v378_v53 = vadd.f32 0.5, %v258_v37  ;;  %v603_v61 = vmin.f32 %v483_v26, 1.0  ;;  %v238_v39 = vmul.f32 0.16666667, %v118_v40 }
 0x10f   :  { %1786 = vmatmul.f32.gmra.mxu1 %v1493_v3  ;;  %v604_v3 = vmin.f32 %v484_v46, 1.0 }
 0x110   :  { %1848 = vmatpush.msra.mxu2 %v1374_v13  ;;  %1724 = vmatmul.f32.gmra.mxu0 %v1532_v9  ;;  %v379_v9 = vadd.f32 0.5, %v259_v0  ;;  %v119_v13 = vld [vmem:[%s5302_s0 + $0x318] sm:$0xff]  ;;  %v498_v16 = vmax.f32 %v378_v53, 0.0  ;;  %v256_v0 = vmul.f32 0.16666667, %v136_v43 }
 0x111   :  { %v239_v33 = vmul.f32 0.16666667, %v119_v13  ;;  %v677_v13 = vld [vmem:[%s5303_s1 + $0x1c8] sm:$0xff] }
 0x112   :  { %1849 = vmatpush.msra.mxu2 %v1373_v4  ;;  %1282 = vperm.xlu2 %3065, %v608_v59   ;;  %v137_v59 = vld [vmem:[%s5302_s0 + $0x3a8] sm:$0xff]  ;;  %v499_v17 = vmax.f32 %v379_v9, 0.0  ;;  %v618_v55 = vmin.f32 %v498_v16, 1.0  ;;  %v132_v16 = vld [vmem:[%s5302_s0 + $0x380] sm:$0xff] }
 0x113   :  { %1287 = vperm.xlu1 %3064, %v609_v62   ;;  %1292 = vperm.xlu0 %3063, %v610_v15   ;;  %v1478_v62 = vld [vmem:[%s5304_s2 + $0x90] sm:$0xff]  ;;  %v683_v15 = vld [vmem:[%s5303_s1 + $0x1f8] sm:$0xff]  ;;  %v257_v4 = vmul.f32 0.16666667, %v137_v59  ;;  %v359_v19 = vadd.f32 0.5, %v239_v33 }
 0x114   :  { %1850 = vmatpush.msra.mxu2 %v1372_v7  ;;  %v3791_v20 = vpop.permute.xlu2 %1082  ;;  %v3793_v21 = vpop.permute.xlu1 %1032  ;;  %v1517_v7 = vld [vmem:[%s5304_s2 + $0x1c8] sm:$0xff] }
 0x115   :  { %1851 = vmatmul.f32.vlgmr.msra.gmra.mxu2 %v1462_v18  ;;  %v3798_v56 = vpop.permute.xlu0 %1027  ;;  %v682_v18 = vld [vmem:[%s5303_s1 + $0x1f0] sm:$0xff]  ;;  %v377_v50 = vadd.f32 0.5, %v257_v4  ;;  %v479_v45 = vmax.f32 %v359_v19, 0.0  ;;  %v675_v4 = vld [vmem:[%s5303_s1 + $0x1b8] sm:$0xff] }
 0x116   :  { %v1402_v27 = vmul.f32 %v3720_v49, %v682_v18  ;;  %v1486_v49 = vld [vmem:[%s5304_s2 + $0xd0] sm:$0xff]  ;;  %v252_v18 = vmul.f32 0.16666667, %v132_v16 }
 0x117   :  { %1789 = vmatmul.f32.gmra.mxu1 %v1501_v34  ;;  %v681_v34 = vld [vmem:[%s5303_s1 + $0x1e8] sm:$0xff]  ;;  %v497_v26 = vmax.f32 %v377_v50, 0.0  ;;  %v599_v6 = vmin.f32 %v479_v45, 1.0 }
 0x118   :  { %1727 = vmatmul.f32.gmra.mxu0 %v1540_v12  ;;  %v601_v12 = vmin.f32 %v481_v23, 1.0  ;;  %v134_v23 = vld [vmem:[%s5302_s0 + $0x390] sm:$0xff] }
 0x119   :  { %v617_v59 = vmin.f32 %v497_v26, 1.0 }
 0x11a   :  { %1267 = vperm.xlu2 %3065, %v605_v38   ;;  %v619_v38 = vmin.f32 %v499_v17, 1.0  ;;  %v676_v17 = vld [vmem:[%s5303_s1 + $0x1c0] sm:$0xff] }
 0x11b   :  { %1272 = vperm.xlu1 %3064, %v606_v41   ;;  %1277 = vperm.xlu0 %3063, %v607_v42   ;;  %v360_v41 = vadd.f32 0.5, %v240_v25  ;;  %v135_v42 = vld [vmem:[%s5302_s0 + $0x398] sm:$0xff]  ;;  %v1494_v25 = vld [vmem:[%s5304_s2 + $0x110] sm:$0xff]  ;;  %v1396_v19 = vmul.f32 %v3653_v35, %v676_v17  ;;  %v1572_v35 = vld [vmem:[%s5304_s2 + $0x380] sm:$0xff] }
 0x11c   :  { %v3815_v60 = vpop.permute.xlu2 %1097  ;;  %v255_v37 = vmul.f32 0.16666667, %v135_v42  ;;  %v1588_v17 = vld [vmem:[%s5304_s2 + $0x400] sm:$0xff] }
 0x11d   :  { %v1048_v32 = vpop.permute.xlu1 %1047  ;;  %1854 = vmatmul.f32.gmra.mxu2 %v1470_v57  ;;  %v1043_v30 = vpop.permute.xlu0 %1042  ;;  %v480_v46 = vmax.f32 %v360_v41, 0.0  ;;  %v1395_v41 = vmul.f32 %v3759_v24, %v675_v4  ;;  %v672_v24 = vld [vmem:[%s5303_s1 + $0x1a0] sm:$0xff]  ;;  %v2880_v4 = vld [vmem:[%s5305_s4 + $0x10] sm:$0xff] }
 0x11e   :  { %v1401_v57 = vmul.f32 %v1048_v32, %v681_v34  ;;  %v1525_v32 = vld [vmem:[%s5304_s2 + $0x208] sm:$0xff]  ;;  %v375_v9 = vadd.f32 0.5, %v255_v37  ;;  %v1502_v37 = vld [vmem:[%s5304_s2 + $0x150] sm:$0xff] }
 0x11f   :  { %1792 = vmatmul.f32.gmra.mxu1 %v1509_v47  ;;  %v1400_v47 = vmul.f32 %v1043_v30, %v680_v44  ;;  %v1564_v30 = vld [vmem:[%s5304_s2 + $0x340] sm:$0xff]  ;;  %v600_v14 = vmin.f32 %v480_v46, 1.0  ;;  %v673_v44 = vld [vmem:[%s5303_s1 + $0x1a8] sm:$0xff] }
 0x120   :  { %1730 = vmatmul.f32.gmra.mxu0 %v1548_v51  ;;  %v1393_v45 = vmul.f32 %v3628_v58, %v673_v44  ;;  %v1541_v58 = vld [vmem:[%s5304_s2 + $0x288] sm:$0xff]  ;;  %v696_v44 = vld [vmem:[%s5303_s1 + $0x260] sm:$0xff] }
 0x122   :  { %1252 = vperm.xlu2 %3065, %v602_v52   ;;  %v678_v52 = vld [vmem:[%s5303_s1 + $0x1d0] sm:$0xff] }
 0x123   :  { %1257 = vperm.xlu1 %3064, %v603_v61   ;;  %1262 = vperm.xlu0 %3063, %v604_v3   ;;  %v1399_v3 = vmul.f32 %v3683_v54, %v679_v48  ;;  %v1398_v33 = vmul.f32 %v3793_v21, %v678_v52  ;;  %v133_v54 = vld [vmem:[%s5302_s0 + $0x388] sm:$0xff]  ;;  %v1397_v21 = vmul.f32 %v3798_v56, %v677_v13 }
 0x124   :  { %v3838_v8 = vpop.permute.xlu2 %1112  ;;  %v1533_v56 = vld [vmem:[%s5304_s2 + $0x248] sm:$0xff] }
 0x125   :  { %v3846_v31 = vpop.permute.xlu1 %1062  ;;  %1857 = vmatmul.f32.gmra.mxu2 %v1478_v62  ;;  %v1058_v5 = vpop.permute.xlu0 %1057  ;;  %v358_v62 = vadd.f32 0.5, %v238_v39 }
 0x126   :  { %v1403_v11 = vmul.f32 %v1058_v5, %v683_v15  ;;  %v376_v15 = vadd.f32 0.5, %v256_v0  ;;  %v1392_v0 = vmul.f32 %v3722_v22, %v672_v24  ;;  %v1580_v22 = vld [vmem:[%s5304_s2 + $0x3c0] sm:$0xff]  ;;  %v695_v24 = vld [vmem:[%s5303_s1 + $0x258] sm:$0xff] }
 0x127   :  { %1795 = vmatmul.f32.gmra.mxu1 %v1517_v7  ;;  %v495_v7 = vmax.f32 %v375_v9, 0.0  ;;  %v478_v5 = vmax.f32 %v358_v62, 0.0  ;;  %v668_v62 = vld [vmem:[%s5303_s1 + $0x180] sm:$0xff] }
 0x128   :  { %1912 = vmatpush.msra.mxu3 %v1403_v11  ;;  %1733 = vmatmul.f32.gmra.mxu0 %v1556_v28  ;;  %v496_v28 = vmax.f32 %v376_v15, 0.0  ;;  %v253_v11 = vmul.f32 0.16666667, %v133_v54  ;;  %v1510_v15 = vld [vmem:[%s5304_s2 + $0x190] sm:$0xff]  ;;  %v1549_v54 = vld [vmem:[%s5304_s2 + $0x2c8] sm:$0xff] }
 0x129   :  { %v615_v42 = vmin.f32 %v495_v7, 1.0  ;;  %v598_v40 = vmin.f32 %v478_v5, 1.0  ;;  %v1518_v7 = vld [vmem:[%s5304_s2 + $0x1d0] sm:$0xff] }
 0x12a   :  { %1913 = vmatpush.msra.mxu3 %v1402_v27  ;;  %1332 = vperm.xlu2 %3065, %v618_v55   ;;  %v254_v55 = vmul.f32 0.16666667, %v134_v23  ;;  %v372_v27 = vadd.f32 0.5, %v252_v18  ;;  %v616_v43 = vmin.f32 %v496_v28, 1.0  ;;  %v373_v48 = vadd.f32 0.5, %v253_v11  ;;  %v699_v18 = vld [vmem:[%s5303_s1 + $0x278] sm:$0xff] }
 0x12b   :  { %1247 = vperm.xlu1 %3064, %v601_v12   ;;  %1337 = vperm.xlu0 %3063, %v619_v38   ;;  %v674_v12 = vld [vmem:[%s5303_s1 + $0x1b0] sm:$0xff]  ;;  %v1471_v28 = vld [vmem:[%s5304_s2 + $0x58] sm:$0xff]  ;;  %v1557_v11 = vld [vmem:[%s5304_s2 + $0x308] sm:$0xff] }
 0x12c   :  { %1914 = vmatpush.msra.mxu3 %v1401_v57  ;;  %v3873_v51 = vpop.permute.xlu2 %1127  ;;  %v374_v57 = vadd.f32 0.5, %v254_v55  ;;  %v492_v26 = vmax.f32 %v372_v27, 0.0  ;;  %v493_v46 = vmax.f32 %v373_v48, 0.0 }
 0x12d   :  { %v3881_v53 = vpop.permute.xlu1 %1077  ;;  %1860 = vmatmul.f32.gmra.mxu2 %v1486_v49  ;;  %v3883_v61 = vpop.permute.xlu0 %1072  ;;  %v1394_v49 = vmul.f32 %v3765_v29, %v674_v12  ;;  %v671_v29 = vld [vmem:[%s5303_s1 + $0x198] sm:$0xff] }
 0x12e   :  { %1915 = vmatpush.msra.mxu3 %v1400_v47  ;;  %v494_v39 = vmax.f32 %v374_v57, 0.0  ;;  %v613_v9 = vmin.f32 %v493_v46, 1.0  ;;  %v1526_v57 = vld [vmem:[%s5304_s2 + $0x210] sm:$0xff] }
 0x12f   :  { %1798 = vmatmul.f32.gmra.mxu1 %v1525_v32 }
 0x130   :  { %1916 = vmatpush.msra.mxu3 %v1399_v3  ;;  %1736 = vmatmul.f32.gmra.mxu0 %v1564_v30  ;;  %v670_v30 = vld [vmem:[%s5303_s1 + $0x190] sm:$0xff]  ;;  %v1391_v3 = vmul.f32 %v3728_v63, %v671_v29  ;;  %v614_v13 = vmin.f32 %v494_v39, 1.0 }
 0x131   :  { %v694_v29 = vld [vmem:[%s5303_s1 + $0x250] sm:$0xff] }
 0x132   :  { %1917 = vmatpush.msra.mxu3 %v1398_v33  ;;  %1237 = vperm.xlu2 %3065, %v599_v6   ;;  %v612_v6 = vmin.f32 %v492_v26, 1.0  ;;  %v1463_v33 = vld [vmem:[%s5304_s2 + $0x18] sm:$0xff]  ;;  %v1565_v26 = vld [vmem:[%s5304_s2 + $0x348] sm:$0xff] }
 0x133   :  { %1327 = vperm.xlu1 %3064, %v617_v59   ;;  %1242 = vperm.xlu0 %3063, %v600_v14   ;;  %v669_v59 = vld [vmem:[%s5303_s1 + $0x188] sm:$0xff]  ;;  %v1390_v14 = vmul.f32 %v3597_v36, %v670_v30  ;;  %v1388_v36 = vmul.f32 %v3691_v1, %v668_v62  ;;  %v691_v62 = vld [vmem:[%s5303_s1 + $0x238] sm:$0xff] }
 0x134   :  { %1918 = vmatpush.msra.mxu3 %v1397_v21  ;;  %v3913_v34 = vpop.permute.xlu2 %1142  ;;  %v1389_v63 = vmul.f32 %v3685_v10, %v669_v59  ;;  %v2879_v1 = vld [vmem:[%s5305_s4 + $0x8] sm:$0xff]  ;;  %v2878_v21 = vld [vmem:[%s5305_s4] sm:$0xff] }
 0x135   :  { %v3921_v38 = vpop.permute.xlu1 %1092  ;;  %1863 = vmatmul.f32.gmra.mxu2 %v1494_v25  ;;  %v3923_v50 = vpop.permute.xlu0 %1087  ;;  %v693_v30 = vld [vmem:[%s5303_s1 + $0x248] sm:$0xff] }
 0x136   :  { %1919 = vmatpush.msra.mxu3 %v1396_v19  ;;  %v698_v19 = vld [vmem:[%s5303_s1 + $0x270] sm:$0xff] }
 0x137   :  { %1801 = vmatmul.f32.gmra.mxu1 %v1533_v56 }
 0x138   :  { %1920 = vmatpush.msra.mxu3 %v1395_v41  ;;  %1739 = vmatmul.f32.gmra.mxu0 %v1572_v35  ;;  %v1596_v35 = vld [vmem:[%s5304_s2 + $0x440] sm:$0xff]  ;;  %v697_v41 = vld [vmem:[%s5303_s1 + $0x268] sm:$0xff] }
 0x139   :  { %v1417_v48 = vmul.f32 %v3873_v51, %v697_v41  ;;  %v1479_v51 = vld [vmem:[%s5304_s2 + $0x98] sm:$0xff] }
 0x13a   :  { %1921 = vmatpush.msra.mxu3 %v1394_v49  ;;  %1317 = vperm.xlu2 %3065, %v615_v42   ;;  %v2882_v42 = vld [vmem:[%s5305_s4 + $0x20] sm:$0xff] }
 0x13b   :  { %1232 = vperm.xlu1 %3064, %v598_v40   ;;  %1322 = vperm.xlu0 %3063, %v616_v43   ;;  %v2883_v40 = vld [vmem:[%s5305_s4 + $0x28] sm:$0xff]  ;;  %v2881_v43 = vld [vmem:[%s5305_s4 + $0x18] sm:$0xff] }
 0x13c   :  { %1922 = vmatpush.msra.mxu3 %v1393_v45  ;;  %v3944_v47 = vpop.permute.xlu2 %1157 }
 0x13d   :  { %v3949_v32 = vpop.permute.xlu1 %1107  ;;  %1866 = vmatmul.f32.gmra.mxu2 %v1502_v37  ;;  %v3951_v52 = vpop.permute.xlu0 %1102 }
 0x13e   :  { %1923 = vmatpush.msra.mxu3 %v1392_v0  ;;  %v1413_v59 = vmul.f32 %v3949_v32, %v693_v30 }
 0x13f   :  { %1804 = vmatmul.f32.gmra.mxu1 %v1541_v58  ;;  %v1604_v58 = vld [vmem:[%s5304_s2 + $0x480] sm:$0xff] }
 0x140   :  { %1924 = vmatpush.msra.mxu3 %v1391_v3  ;;  %1742 = vmatmul.f32.gmra.mxu0 %v1580_v22  ;;  %v2885_v22 = vld [vmem:[%s5305_s4 + $0x38] sm:$0xff]  ;;  %v1414_v3 = vmul.f32 %v3838_v8, %v694_v29 }
 0x141   :  { %v715_v8 = vld [vmem:[%s5303_s1 + $0x2f8] sm:$0xff] }
 0x142   :  { %1925 = vmatpush.msra.mxu3 %v1390_v14  ;;  %1302 = vperm.xlu2 %3065, %v612_v6   ;;  %v2886_v6 = vld [vmem:[%s5305_s4 + $0x40] sm:$0xff]  ;;  %v1534_v14 = vld [vmem:[%s5304_s2 + $0x250] sm:$0xff]  ;;  %v1503_v29 = vld [vmem:[%s5304_s2 + $0x158] sm:$0xff] }
 0x143   :  { %1307 = vperm.xlu1 %3064, %v613_v9   ;;  %1312 = vperm.xlu0 %3063, %v614_v13   ;;  %v2884_v9 = vld [vmem:[%s5305_s4 + $0x30] sm:$0xff]  ;;  %v692_v13 = vld [vmem:[%s5303_s1 + $0x240] sm:$0xff] }
 0x144   :  { %1926 = vmatpush.msra.mxu3 %v1389_v63  ;;  %v3971_v16 = vpop.permute.xlu2 %1172  ;;  %v3992_v25 = vpop.f32.mrf.mxu0  ;;  %v1412_v63 = vmul.f32 %v3951_v52, %v692_v13  ;;  %v1573_v52 = vld [vmem:[%s5304_s2 + $0x388] sm:$0xff]  ;;  %v714_v13 = vld [vmem:[%s5303_s1 + $0x2f0] sm:$0xff] }
 0x145   :  { %v1123_v10 = vpop.permute.xlu1 %1122  ;;  %1869 = vmatmul.f32.gmra.mxu2 %v1510_v15  ;;  %v1118_v23 = vpop.permute.xlu0 %1117  ;;  %v1487_v15 = vld [vmem:[%s5304_s2 + $0xd8] sm:$0xff] }
 0x146   :  { %1927 = vmatpush.msra.mxu3 %v1388_v36  ;;  %v1416_v45 = vmul.f32 %v1123_v10, %v696_v44  ;;  %v1415_v0 = vmul.f32 %v1118_v23, %v695_v24  ;;  %v685_v44 = vld [vmem:[%s5303_s1 + $0x208] sm:$0xff]  ;;  %v2890_v24 = vld [vmem:[%s5305_s4 + $0x60] sm:$0xff] }
 0x147   :  { %1928 = vmatmul.f32.vlgmr.msra.gmra.mxu3 %v1463_v33  ;;  %1807 = vmatmul.f32.gmra.mxu1 %v1549_v54  ;;  %v690_v33 = vld [vmem:[%s5303_s1 + $0x230] sm:$0xff] }
 0x148   :  { %1745 = vmatmul.f32.gmra.mxu0 %v1588_v17  ;;  %v1411_v17 = vmul.f32 %v3815_v60, %v691_v62  ;;  %v2889_v60 = vld [vmem:[%s5305_s4 + $0x58] sm:$0xff] }
 0x14a   :  { %2905 = vperm.xlu2 %3065, %v2879_v1   ;;  %v1612_v1 = vld [vmem:[%s5304_s2 + $0x4c0] sm:$0xff] }
 0x14b   :  { %2910 = vperm.xlu1 %3064, %v2880_v4   ;;  %2900 = vperm.xlu0 %3063, %v2878_v21   ;;  %v689_v4 = vld [vmem:[%s5303_s1 + $0x228] sm:$0xff]  ;;  %v2888_v21 = vld [vmem:[%s5305_s4 + $0x50] sm:$0xff] }
 0x14c   :  { %v4000_v5 = vpop.permute.xlu2 %1187  ;;  %v4033_v49 = vpop.f32.mrf.mxu0 }
 0x14d   :  { %v1138_v55 = vpop.permute.xlu1 %1137  ;;  %1872 = vmatmul.f32.gmra.mxu2 %v1518_v7  ;;  %v1133_v56 = vpop.permute.xlu0 %1132  ;;  %v1410_v7 = vmul.f32 %v3921_v38, %v690_v33  ;;  %v731_v38 = vld [vmem:[%s5303_s1 + $0x378] sm:$0xff]  ;;  %v1597_v33 = vld [vmem:[%s5304_s2 + $0x448] sm:$0xff] }
 0x14e   :  { %v1419_v12 = vmul.f32 %v1138_v55, %v699_v18  ;;  %v1418_v27 = vmul.f32 %v1133_v56, %v698_v19  ;;  %v2887_v18 = vld [vmem:[%s5305_s4 + $0x48] sm:$0xff]  ;;  %v1542_v55 = vld [vmem:[%s5304_s2 + $0x290] sm:$0xff]  ;;  %v687_v19 = vld [vmem:[%s5303_s1 + $0x218] sm:$0xff] }
 0x14f   :  { %1931 = vmatmul.f32.gmra.mxu3 %v1471_v28  ;;  %1810 = vmatmul.f32.gmra.mxu1 %v1557_v11  ;;  %v688_v28 = vld [vmem:[%s5303_s1 + $0x220] sm:$0xff]  ;;  %v1409_v11 = vmul.f32 %v3923_v50, %v689_v4 }
 0x150   :  { %1989 = vmatpush.msrb.mxu0 %v1419_v12  ;;  %v1408_v56 = vmul.f32 %v3791_v20, %v688_v28  ;;  %v1495_v12 = vld [vmem:[%s5304_s2 + $0x118] sm:$0xff]  ;;  %v1581_v20 = vld [vmem:[%s5304_s2 + $0x3c8] sm:$0xff] }
 0x151   :  { %1748 = vmatmul.f32.gmra.mxu0 %v1596_v35  ;;  %v686_v35 = vld [vmem:[%s5303_s1 + $0x210] sm:$0xff]  ;;  %v1519_v28 = vld [vmem:[%s5304_s2 + $0x1d8] sm:$0xff] }
 0x152   :  { %1990 = vmatpush.msrb.mxu0 %v1418_v27  ;;  %2920 = vperm.xlu2 %3065, %v2882_v42  }
 0x153   :  { %2925 = vperm.xlu1 %3064, %v2883_v40   ;;  %2915 = vperm.xlu0 %3063, %v2881_v43   ;;  %v1407_v40 = vmul.f32 %v3881_v53, %v687_v19  ;;  %v2892_v53 = vld [vmem:[%s5305_s4 + $0x70] sm:$0xff] }
 0x154   :  { %1991 = vmatpush.msrb.mxu0 %v1417_v48  ;;  %v4038_v37 = vpop.permute.xlu2 %1202  ;;  %v4086_v36 = vpop.f32.mrf.mxu0  ;;  %v2891_v48 = vld [vmem:[%s5305_s4 + $0x68] sm:$0xff] }
 0x155   :  { %v4049_v46 = vpop.permute.xlu1 %1152  ;;  %1875 = vmatmul.f32.gmra.mxu2 %v1526_v57  ;;  %v4051_v39 = vpop.permute.xlu0 %1147  ;;  %v1406_v57 = vmul.f32 %v3883_v61, %v686_v35  ;;  %v1550_v61 = vld [vmem:[%s5304_s2 + $0x2d0] sm:$0xff] }
 0x156   :  { %1992 = vmatpush.msrb.mxu0 %v1416_v45  ;;  %v684_v45 = vld [vmem:[%s5303_s1 + $0x200] sm:$0xff] }
 0x157   :  { %1934 = vmatmul.f32.gmra.mxu3 %v1479_v51  ;;  %1813 = vmatmul.f32.gmra.mxu1 %v1565_v26  ;;  %v1405_v51 = vmul.f32 %v3757_v2, %v685_v44  ;;  %v1404_v26 = vmul.f32 %v3846_v31, %v684_v45  ;;  %v1464_v2 = vld [vmem:[%s5304_s2 + $0x20] sm:$0xff]  ;;  %v1574_v44 = vld [vmem:[%s5304_s2 + $0x390] sm:$0xff] }
 0x158   :  { %1993 = vmatpush.msrb.mxu0 %v1415_v0  ;;  %v2894_v31 = vld [vmem:[%s5305_s4 + $0x80] sm:$0xff] }
 0x159   :  { %1751 = vmatmul.f32.gmra.mxu0 %v1604_v58  ;;  %v1488_v45 = vld [vmem:[%s5304_s2 + $0xe0] sm:$0xff] }
 0x15a   :  { %1994 = vmatpush.msrb.mxu0 %v1414_v3  ;;  %2935 = vperm.xlu2 %3065, %v2885_v22   ;;  %v1589_v22 = vld [vmem:[%s5304_s2 + $0x408] sm:$0xff]  ;;  %v2893_v3 = vld [vmem:[%s5305_s4 + $0x78] sm:$0xff] }
 0x15b   :  { %2940 = vperm.xlu1 %3064, %v2886_v6   ;;  %2930 = vperm.xlu0 %3063, %v2884_v9   ;;  %v1558_v9 = vld [vmem:[%s5304_s2 + $0x310] sm:$0xff] }
 0x15c   :  { %1995 = vmatpush.msrb.mxu0 %v1413_v59  ;;  %v1218_v32 = vpop.permute.xlu2 %1217  ;;  %v4143_v43 = vpop.f32.mrf.mxu0  ;;  %v1511_v59 = vld [vmem:[%s5304_s2 + $0x198] sm:$0xff] }
 0x15d   :  { %v1435_v54 = vmul.f32 %v1218_v32, %v715_v8  ;;  %v4091_v10 = vpop.permute.xlu1 %1167  ;;  %1878 = vmatmul.f32.gmra.mxu2 %v1534_v14  ;;  %v4093_v23 = vpop.permute.xlu0 %1162  ;;  %v1472_v14 = vld [vmem:[%s5304_s2 + $0x60] sm:$0xff] }
 0x15e   :  { %1996 = vmatpush.msrb.mxu0 %v1412_v63  ;;  %v713_v63 = vld [vmem:[%s5303_s1 + $0x2e8] sm:$0xff] }
 0x15f   :  { %1937 = vmatmul.f32.gmra.mxu3 %v1487_v15  ;;  %2066 = vmatpush.msrb.mxu1 %v1435_v54  ;;  %v712_v54 = vld [vmem:[%s5303_s1 + $0x2e0] sm:$0xff] }
 0x160   :  { %1997 = vmatpush.msrb.mxu0 %v1411_v17  ;;  %1816 = vmatmul.f32.gmra.mxu1 %v1573_v52  ;;  %v1432_v4 = vmul.f32 %v4038_v37, %v712_v54  ;;  %v1480_v37 = vld [vmem:[%s5304_s2 + $0xa0] sm:$0xff] }
 0x161   :  { %1754 = vmatmul.f32.gmra.mxu0 %v1612_v1  ;;  %v711_v1 = vld [vmem:[%s5303_s1 + $0x2d8] sm:$0xff] }
 0x162   :  { %1998 = vmatpush.msrb.mxu0 %v1410_v7  ;;  %2950 = vperm.xlu2 %3065, %v2888_v21   ;;  %v1566_v21 = vld [vmem:[%s5304_s2 + $0x350] sm:$0xff] }
 0x163   :  { %2955 = vperm.xlu1 %3064, %v2889_v60   ;;  %2945 = vperm.xlu0 %3063, %v2887_v18   ;;  %v710_v60 = vld [vmem:[%s5303_s1 + $0x2d0] sm:$0xff] }
 0x164   :  { %1999 = vmatpush.msrb.mxu0 %v1409_v11  ;;  %v1298_v50 = vpop.permute.xlu2 %1297  ;;  %v4183_v6 = vpop.f32.mrf.mxu0 }
 0x165   :  { %v1451_v41 = vmul.f32 %v1298_v50, %v731_v38  ;;  %v4135_v42 = vpop.permute.xlu1 %1182  ;;  %1881 = vmatmul.f32.gmra.mxu2 %v1542_v55  ;;  %v4137_v27 = vpop.permute.xlu0 %1177  ;;  %v709_v38 = vld [vmem:[%s5303_s1 + $0x2c8] sm:$0xff] }
 0x166   :  { %2000 = vmatpush.msrb.mxu0 %v1408_v56  ;;  %v1605_v50 = vld [vmem:[%s5304_s2 + $0x488] sm:$0xff]  ;;  %v1429_v35 = vmul.f32 %v4000_v5, %v709_v38  ;;  %v730_v5 = vld [vmem:[%s5303_s1 + $0x370] sm:$0xff] }
 0x167   :  { %1940 = vmatmul.f32.gmra.mxu3 %v1495_v12  ;;  %2143 = vmatpush.msrb.mxu2 %v1451_v41  ;;  %v708_v12 = vld [vmem:[%s5303_s1 + $0x2c0] sm:$0xff]  ;;  %v707_v41 = vld [vmem:[%s5303_s1 + $0x2b8] sm:$0xff]  ;;  %v1590_v38 = vld [vmem:[%s5304_s2 + $0x410] sm:$0xff] }
 0x168   :  { %2001 = vmatpush.msrb.mxu0 %v1407_v40  ;;  %1819 = vmatmul.f32.gmra.mxu1 %v1581_v20  ;;  %v1428_v20 = vmul.f32 %v4135_v42, %v708_v12  ;;  %v1527_v42 = vld [vmem:[%s5304_s2 + $0x218] sm:$0xff]  ;;  %v1504_v12 = vld [vmem:[%s5304_s2 + $0x160] sm:$0xff] }
 0x16a   :  { %2002 = vmatpush.msrb.mxu0 %v1406_v57  ;;  %2965 = vperm.xlu2 %3065, %v2891_v48   ;;  %v706_v48 = vld [vmem:[%s5303_s1 + $0x2b0] sm:$0xff]  ;;  %v1427_v57 = vmul.f32 %v4137_v27, %v707_v41  ;;  %v729_v27 = vld [vmem:[%s5303_s1 + $0x368] sm:$0xff] }
 0x16b   :  { %2970 = vperm.xlu1 %3064, %v2892_v53   ;;  %2960 = vperm.xlu0 %3063, %v2890_v24  }
 0x16c   :  { %2003 = vmatpush.msrb.mxu0 %v1405_v51  ;;  %v4169_v0 = vpop.f32.mrf.mxu1  ;;  %v1283_v52 = vpop.permute.xlu2 %1282  ;;  %v705_v51 = vld [vmem:[%s5303_s1 + $0x2a8] sm:$0xff] }
 0x16d   :  { %v1198_v58 = vpop.permute.xlu1 %1197  ;;  %1884 = vmatmul.f32.gmra.mxu2 %v1550_v61  ;;  %v1193_v30 = vpop.permute.xlu0 %1192 }
 0x16e   :  { %2004 = vmatpush.msrb.mxu0 %v1404_v26  ;;  %v4215_v7 = vpop.f32.mrf.mxu0  ;;  %v1431_v18 = vmul.f32 %v1198_v58, %v711_v1  ;;  %v1430_v56 = vmul.f32 %v1193_v30, %v710_v60  ;;  %v1613_v58 = vld [vmem:[%s5304_s2 + $0x4c8] sm:$0xff]  ;;  %v704_v30 = vld [vmem:[%s5303_s1 + $0x2a0] sm:$0xff] }
 0x16f   :  { %1943 = vmatmul.f32.gmra.mxu3 %v1503_v29  ;;  %2005 = vmatmul.f32.vlgmr.msrb.gmra.mxu0 %v1464_v2  ;;  %v1426_v29 = vmul.f32 %v3971_v16, %v706_v48  ;;  %v703_v16 = vld [vmem:[%s5303_s1 + $0x298] sm:$0xff]  ;;  %v725_v60 = vld [vmem:[%s5303_s1 + $0x348] sm:$0xff] }
 0x170   :  { %1822 = vmatmul.f32.gmra.mxu1 %v1589_v22  ;;  %v728_v22 = vld [vmem:[%s5303_s1 + $0x360] sm:$0xff] }
 0x172   :  { %2980 = vperm.xlu2 %3065, %v2894_v31   ;;  %v1425_v31 = vmul.f32 %v4091_v10, %v705_v51  ;;  %v702_v10 = vld [vmem:[%s5303_s1 + $0x290] sm:$0xff] }
 0x173   :  { %2975 = vperm.xlu0 %3063, %v2893_v3   ;;  %v1598_v51 = vld [vmem:[%s5304_s2 + $0x450] sm:$0xff] }
 0x174   :  { %v4194_v8 = vpop.f32.mrf.mxu1  ;;  %v1268_v40 = vpop.permute.xlu2 %1267 }
 0x175   :  { %v1213_v62 = vpop.permute.xlu1 %1212  ;;  %1887 = vmatmul.f32.gmra.mxu2 %v1558_v9  ;;  %v1208_v32 = vpop.permute.xlu0 %1207  ;;  %v1424_v9 = vmul.f32 %v4093_v23, %v704_v30  ;;  %v1535_v23 = vld [vmem:[%s5304_s2 + $0x258] sm:$0xff]  ;;  %v738_v30 = vld [vmem:[%s5303_s1 + $0x3b0] sm:$0xff] }
 0x176   :  { %v1434_v15 = vmul.f32 %v1213_v62, %v714_v13  ;;  %v1433_v17 = vmul.f32 %v1208_v32, %v713_v63  ;;  %v4261_v24 = vpop.f32.mrf.mxu0  ;;  %v1448_v13 = vmul.f32 %v1283_v52, %v728_v22  ;;  %v1423_v62 = vmul.f32 %v3944_v47, %v703_v16  ;;  %v726_v47 = vld [vmem:[%s5303_s1 + $0x350] sm:$0xff] }
 0x177   :  { %1946 = vmatmul.f32.gmra.mxu3 %v1511_v59  ;;  %2008 = vmatmul.f32.gmra.mxu0 %v1472_v14  ;;  %v1582_v59 = vld [vmem:[%s5304_s2 + $0x3d0] sm:$0xff]  ;;  %v727_v14 = vld [vmem:[%s5303_s1 + $0x358] sm:$0xff] }
 0x178   :  { %2067 = vmatpush.msrb.mxu1 %v1434_v15  ;;  %v1496_v15 = vld [vmem:[%s5304_s2 + $0x120] sm:$0xff] }
 0x179   :  { %1825 = vmatmul.f32.gmra.mxu1 %v1597_v33  ;;  %v701_v33 = vld [vmem:[%s5303_s1 + $0x288] sm:$0xff] }
 0x17a   :  { %2068 = vmatpush.msrb.mxu1 %v1433_v17  ;;  %v1422_v17 = vmul.f32 %v4049_v46, %v702_v10  ;;  %v1606_v10 = vld [vmem:[%s5304_s2 + $0x490] sm:$0xff] }
 0x17c   :  { %2069 = vmatpush.msrb.mxu1 %v1432_v4  ;;  %v4223_v11 = vpop.f32.mrf.mxu1  ;;  %v1253_v63 = vpop.permute.xlu2 %1252 }
 0x17d   :  { %v4231_v55 = vpop.permute.xlu1 %1227  ;;  %1890 = vmatmul.f32.gmra.mxu2 %v1566_v21  ;;  %v4233_v19 = vpop.permute.xlu0 %1222  ;;  %v700_v21 = vld [vmem:[%s5303_s1 + $0x280] sm:$0xff] }
 0x17e   :  { %2070 = vmatpush.msrb.mxu1 %v1431_v18  ;;  %v4312_v4 = vpop.f32.mrf.mxu0  ;;  %v1421_v18 = vmul.f32 %v4051_v39, %v701_v33  ;;  %v1420_v46 = vmul.f32 %v3913_v34, %v700_v21  ;;  %v724_v39 = vld [vmem:[%s5303_s1 + $0x340] sm:$0xff]  ;;  %v1543_v34 = vld [vmem:[%s5304_s2 + $0x298] sm:$0xff] }
 0x17f   :  { %1949 = vmatmul.f32.gmra.mxu3 %v1519_v28  ;;  %2011 = vmatmul.f32.gmra.mxu0 %v1480_v37  ;;  %v1445_v37 = vmul.f32 %v1268_v40, %v725_v60 }
 0x180   :  { %2071 = vmatpush.msrb.mxu1 %v1430_v56  ;;  %v1465_v56 = vld [vmem:[%s5304_s2 + $0x28] sm:$0xff] }
 0x181   :  { %1828 = vmatmul.f32.gmra.mxu1 %v1605_v50 }
 0x182   :  { %2072 = vmatpush.msrb.mxu1 %v1429_v35  ;;  %v723_v35 = vld [vmem:[%s5303_s1 + $0x338] sm:$0xff] }
 0x184   :  { %2073 = vmatpush.msrb.mxu1 %v1428_v20  ;;  %v4259_v53 = vpop.f32.mrf.mxu1  ;;  %v1333_v48 = vpop.permute.xlu2 %1332 }
 0x185   :  { %v1288_v61 = vpop.permute.xlu1 %1287  ;;  %1893 = vmatmul.f32.gmra.mxu2 %v1574_v44  ;;  %v1293_v26 = vpop.permute.xlu0 %1292  ;;  %v722_v44 = vld [vmem:[%s5303_s1 + $0x330] sm:$0xff] }
 0x186   :  { %v1450_v2 = vmul.f32 %v1293_v26, %v730_v5  ;;  %2074 = vmatpush.msrb.mxu1 %v1427_v57  ;;  %v1449_v3 = vmul.f32 %v1288_v61, %v729_v27  ;;  %v1473_v27 = vld [vmem:[%s5304_s2 + $0x68] sm:$0xff]  ;;  %v739_v26 = vld [vmem:[%s5303_s1 + $0x3b8] sm:$0xff] }
 0x187   :  { %1952 = vmatmul.f32.gmra.mxu3 %v1527_v42  ;;  %2014 = vmatmul.f32.gmra.mxu0 %v1488_v45  ;;  %v4347_v42 = vpop.f32.mrf.mxu0  ;;  %v1442_v45 = vmul.f32 %v1253_v63, %v722_v44  ;;  %v721_v61 = vld [vmem:[%s5303_s1 + $0x328] sm:$0xff] }
 0x188   :  { %2075 = vmatpush.msrb.mxu1 %v1426_v29  ;;  %2144 = vmatpush.msrb.mxu2 %v1450_v2  ;;  %v1551_v29 = vld [vmem:[%s5304_s2 + $0x2d8] sm:$0xff]  ;;  %v737_v63 = vld [vmem:[%s5303_s1 + $0x3a8] sm:$0xff] }
 0x189   :  { %1831 = vmatmul.f32.gmra.mxu1 %v1613_v58  ;;  %v1512_v58 = vld [vmem:[%s5304_s2 + $0x1a0] sm:$0xff] }
 0x18a   :  { %2076 = vmatpush.msrb.mxu1 %v1425_v31  ;;  %2145 = vmatpush.msrb.mxu2 %v1449_v3 }
 0x18c   :  { %2077 = vmatpush.msrb.mxu1 %v1424_v9  ;;  %2146 = vmatpush.msrb.mxu2 %v1448_v13  ;;  %v4300_v32 = vpop.f32.mrf.mxu1  ;;  %v1458_v9 = vmul.f32 %v1333_v48, %v738_v30  ;;  %v1575_v30 = vld [vmem:[%s5304_s2 + $0x398] sm:$0xff] }
 0x18d   :  { %v1273_v54 = vpop.permute.xlu1 %1272  ;;  %1896 = vmatmul.f32.gmra.mxu2 %v1582_v59  ;;  %v1278_v52 = vpop.permute.xlu0 %1277 }
 0x18e   :  { %v1447_v1 = vmul.f32 %v1278_v52, %v727_v14  ;;  %2078 = vmatpush.msrb.mxu1 %v1423_v62  ;;  %v1446_v28 = vmul.f32 %v1273_v54, %v726_v47  ;;  %v1238_v59 = vpop.permute.xlu2 %1237  ;;  %v1481_v14 = vld [vmem:[%s5304_s2 + $0xa8] sm:$0xff]  ;;  %v1520_v47 = vld [vmem:[%s5304_s2 + $0x1e0] sm:$0xff]  ;;  %v719_v54 = vld [vmem:[%s5303_s1 + $0x318] sm:$0xff] }
 0x18f   :  { %1955 = vmatmul.f32.gmra.mxu3 %v1535_v23  ;;  %2017 = vmatmul.f32.gmra.mxu0 %v1496_v15  ;;  %v4380_v62 = vpop.f32.mrf.mxu0  ;;  %v720_v23 = vld [vmem:[%s5303_s1 + $0x320] sm:$0xff]  ;;  %v1559_v15 = vld [vmem:[%s5304_s2 + $0x318] sm:$0xff]  ;;  %v1439_v60 = vmul.f32 %v1238_v59, %v719_v54  ;;  %v1505_v54 = vld [vmem:[%s5304_s2 + $0x168] sm:$0xff] }
 0x190   :  { %2079 = vmatpush.msrb.mxu1 %v1422_v17  ;;  %2147 = vmatpush.msrb.mxu2 %v1447_v1 }
 0x192   :  { %2080 = vmatpush.msrb.mxu1 %v1421_v18  ;;  %2148 = vmatpush.msrb.mxu2 %v1446_v28  ;;  %v1614_v28 = vld [vmem:[%s5304_s2 + $0x4d0] sm:$0xff] }
 0x194   :  { %2081 = vmatpush.msrb.mxu1 %v1420_v46  ;;  %2149 = vmatpush.msrb.mxu2 %v1445_v37  ;;  %v4334_v50 = vpop.f32.mrf.mxu1  ;;  %v1489_v46 = vld [vmem:[%s5304_s2 + $0xe8] sm:$0xff] }
 0x195   :  { %v1258_v41 = vpop.permute.xlu1 %1257  ;;  %1899 = vmatmul.f32.gmra.mxu2 %v1590_v38  ;;  %v1263_v20 = vpop.permute.xlu0 %1262  ;;  %2082 = vmatmul.f32.vlgmr.msrb.gmra.mxu1 %v1465_v56  ;;  %v718_v38 = vld [vmem:[%s5303_s1 + $0x310] sm:$0xff]  ;;  %v736_v56 = vld [vmem:[%s5303_s1 + $0x3a0] sm:$0xff] }
 0x196   :  { %v1444_v40 = vmul.f32 %v1263_v20, %v724_v39  ;;  %v1443_v5 = vmul.f32 %v1258_v41, %v723_v35  ;;  %v1318_v37 = vpop.permute.xlu2 %1317  ;;  %v1567_v39 = vld [vmem:[%s5304_s2 + $0x358] sm:$0xff]  ;;  %v1528_v35 = vld [vmem:[%s5304_s2 + $0x220] sm:$0xff]  ;;  %v717_v41 = vld [vmem:[%s5303_s1 + $0x308] sm:$0xff] }
 0x197   :  { %1958 = vmatmul.f32.gmra.mxu3 %v1543_v34  ;;  %2020 = vmatmul.f32.gmra.mxu0 %v1504_v12  ;;  %v4418_v12 = vpop.f32.mrf.mxu0  ;;  %v735_v20 = vld [vmem:[%s5303_s1 + $0x398] sm:$0xff] }
 0x198   :  { %v4345_v57 = vpop.f32.mrf.mxu2  ;;  %2150 = vmatpush.msrb.mxu2 %v1444_v40 }
 0x19a   :  { %2151 = vmatpush.msrb.mxu2 %v1443_v5 }
 0x19c   :  { %2152 = vmatpush.msrb.mxu2 %v1442_v45  ;;  %v4364_v2 = vpop.f32.mrf.mxu1  ;;  %v716_v45 = vld [vmem:[%s5303_s1 + $0x300] sm:$0xff] }
 0x19d   :  { %v1248_v22 = vpop.permute.xlu1 %1247  ;;  %1902 = vmatmul.f32.gmra.mxu2 %v1598_v51  ;;  %v1338_v31 = vpop.permute.xlu0 %1337  ;;  %2085 = vmatmul.f32.gmra.mxu1 %v1473_v27  ;;  %v1437_v51 = vmul.f32 %v4231_v55, %v717_v41  ;;  %v1455_v27 = vmul.f32 %v1318_v37, %v735_v20  ;;  %v734_v55 = vld [vmem:[%s5303_s1 + $0x390] sm:$0xff]  ;;  %v1591_v37 = vld [vmem:[%s5304_s2 + $0x418] sm:$0xff] }
 0x19e   :  { %v1441_v3 = vmul.f32 %v1248_v22, %v721_v61  ;;  %v1459_v16 = vmul.f32 %v1338_v31, %v739_v26  ;;  %v1436_v26 = vmul.f32 %v4233_v19, %v716_v45  ;;  %v1536_v22 = vld [vmem:[%s5304_s2 + $0x260] sm:$0xff]  ;;  %v733_v31 = vld [vmem:[%s5303_s1 + $0x388] sm:$0xff]  ;;  %v1779_v45 = vadd.f32 %v4194_v8, %v4033_v49  ;;  %v1607_v49 = vld [vmem:[%s5304_s2 + $0x498] sm:$0xff] }
 0x19f   :  { %1961 = vmatmul.f32.gmra.mxu3 %v1551_v29  ;;  %2023 = vmatmul.f32.gmra.mxu0 %v1512_v58  ;;  %v1466_v29 = vld [vmem:[%s5304_s2 + $0x30] sm:$0xff]  ;;  %v1497_v58 = vld [vmem:[%s5304_s2 + $0x128] sm:$0xff]  ;;  %v4456_v59 = vpop.f32.mrf.mxu0 }
 0x1a0   :  { %v4372_v13 = vpop.f32.mrf.mxu2  ;;  %2153 = vmatpush.msrb.mxu2 %v1441_v3  ;;  %2228 = vmatpush.msrb.mxu3 %v1459_v16 }
 0x1a2   :  { %2229 = vmatpush.msrb.mxu3 %v1458_v9 }
 0x1a4   :  { %v4391_v33 = vpop.f32.mrf.mxu1 }
 0x1a5   :  { %v1328_v52 = vpop.permute.xlu1 %1327  ;;  %1905 = vmatmul.f32.gmra.mxu2 %v1606_v10  ;;  %v1243_v17 = vpop.permute.xlu0 %1242  ;;  %2088 = vmatmul.f32.gmra.mxu1 %v1481_v14  ;;  %v732_v10 = vld [vmem:[%s5303_s1 + $0x380] sm:$0xff] }
 0x1a6   :  { %v1457_v1 = vmul.f32 %v1328_v52, %v737_v63  ;;  %v1440_v21 = vmul.f32 %v1243_v17, %v720_v23  ;;  %v1303_v14 = vpop.permute.xlu2 %1302  ;;  %v1583_v52 = vld [vmem:[%s5304_s2 + $0x3d8] sm:$0xff] }
 0x1a7   :  { %1964 = vmatmul.f32.gmra.mxu3 %v1559_v15  ;;  %2026 = vmatmul.f32.gmra.mxu0 %v1520_v47  ;;  %v1452_v15 = vmul.f32 %v1303_v14, %v732_v10  ;;  %v1474_v47 = vld [vmem:[%s5304_s2 + $0x70] sm:$0xff]  ;;  %v1537_v10 = vld [vmem:[%s5304_s2 + $0x268] sm:$0xff] }
 0x1a8   :  { %v4399_v18 = vpop.f32.mrf.mxu2  ;;  %2154 = vmatpush.msrb.mxu2 %v1440_v21  ;;  %2230 = vmatpush.msrb.mxu3 %v1457_v1  ;;  %v1544_v1 = vld [vmem:[%s5304_s2 + $0x2a0] sm:$0xff] }
 0x1aa   :  { %2155 = vmatpush.msrb.mxu2 %v1439_v60  ;;  %v4479_v60 = vpop.f32.mrf.mxu0 }
 0x1ac   :  { %v4416_v34 = vpop.f32.mrf.mxu1 }
 0x1ad   :  { %v1233_v40 = vpop.permute.xlu1 %1232  ;;  %1908 = vmatmul.f32.gmra.mxu2 %v1614_v28  ;;  %v1323_v44 = vpop.permute.xlu0 %1322  ;;  %2091 = vmatmul.f32.gmra.mxu1 %v1489_v46  ;;  %v1482_v28 = vld [vmem:[%s5304_s2 + $0xb0] sm:$0xff]  ;;  %v1513_v46 = vld [vmem:[%s5304_s2 + $0x1a8] sm:$0xff] }
 0x1ae   :  { %v1438_v48 = vmul.f32 %v1233_v40, %v718_v38  ;;  %v1456_v5 = vmul.f32 %v1323_v44, %v736_v56  ;;  %v1552_v56 = vld [vmem:[%s5304_s2 + $0x2e0] sm:$0xff]  ;;  %v1490_v40 = vld [vmem:[%s5304_s2 + $0xf0] sm:$0xff]  ;;  %v1521_v44 = vld [vmem:[%s5304_s2 + $0x1e8] sm:$0xff] }
 0x1af   :  { %1967 = vmatmul.f32.gmra.mxu3 %v1567_v39  ;;  %2029 = vmatmul.f32.gmra.mxu0 %v1528_v35  ;;  %v1776_v39 = vadd.f32 %v4169_v0, %v3992_v25  ;;  %v1599_v0 = vld [vmem:[%s5304_s2 + $0x458] sm:$0xff] }
 0x1b0   :  { %v4433_v61 = vpop.f32.mrf.mxu2  ;;  %2156 = vmatpush.msrb.mxu2 %v1438_v48  ;;  %2231 = vmatpush.msrb.mxu3 %v1456_v5 }
 0x1b1   :  { %v1853_v41 = vadd.f32 %v4345_v57, %v1776_v39  ;;  %v1560_v57 = vld [vmem:[%s5304_s2 + $0x320] sm:$0xff] }
 0x1b2   :  { %2157 = vmatpush.msrb.mxu2 %v1437_v51  ;;  %2232 = vmatpush.msrb.mxu3 %v1455_v27  ;;  %v4506_v48 = vpop.f32.mrf.mxu0  ;;  %v1856_v27 = vadd.f32 %v4372_v13, %v1779_v45  ;;  %v1568_v13 = vld [vmem:[%s5304_s2 + $0x360] sm:$0xff] }
 0x1b4   :  { %2158 = vmatpush.msrb.mxu2 %v1436_v26  ;;  %v4448_v19 = vpop.f32.mrf.mxu1 }
 0x1b5   :  { %v1308_v3 = vpop.permute.xlu1 %1307  ;;  %2159 = vmatmul.f32.vlgmr.msrb.gmra.mxu2 %v1466_v29  ;;  %v1313_v16 = vpop.permute.xlu0 %1312  ;;  %2094 = vmatmul.f32.gmra.mxu1 %v1497_v58  ;;  %v1498_v29 = vld [vmem:[%s5304_s2 + $0x130] sm:$0xff]  ;;  %v1529_v58 = vld [vmem:[%s5304_s2 + $0x228] sm:$0xff] }
 0x1b6   :  { %v1454_v9 = vmul.f32 %v1313_v16, %v734_v55  ;;  %v1453_v63 = vmul.f32 %v1308_v3, %v733_v31 }
 0x1b7   :  { %1970 = vmatmul.f32.gmra.mxu3 %v1575_v30  ;;  %2032 = vmatmul.f32.gmra.mxu0 %v1536_v22  ;;  %v1782_v22 = vadd.f32 %v4223_v11, %v4086_v36  ;;  %v1615_v36 = vld [vmem:[%s5304_s2 + $0x4d8] sm:$0xff]  ;;  %v1576_v11 = vld [vmem:[%s5304_s2 + $0x3a0] sm:$0xff] }
 0x1b8   :  { %v4461_v23 = vpop.f32.mrf.mxu2  ;;  %2233 = vmatpush.msrb.mxu3 %v1454_v9  ;;  %v1506_v9 = vld [vmem:[%s5304_s2 + $0x170] sm:$0xff] }
 0x1b9   :  { %v1859_v3 = vadd.f32 %v4399_v18, %v1782_v22  ;;  %v1785_v18 = vadd.f32 %v4259_v53, %v4143_v43  ;;  %v1545_v43 = vld [vmem:[%s5304_s2 + $0x2a8] sm:$0xff]  ;;  %v1794_v22 = vadd.f32 %v4364_v2, %v4261_v24 }
 0x1ba   :  { %2234 = vmatpush.msrb.mxu3 %v1453_v63  ;;  %v4536_v30 = vpop.f32.mrf.mxu0  ;;  %v1569_v24 = vld [vmem:[%s5304_s2 + $0x368] sm:$0xff] }
 0x1bc   :  { %2235 = vmatpush.msrb.mxu3 %v1452_v15  ;;  %v4472_v17 = vpop.f32.mrf.mxu1 }
 0x1bd   :  { %2162 = vmatmul.f32.gmra.mxu2 %v1474_v47  ;;  %2097 = vmatmul.f32.gmra.mxu1 %v1505_v54  ;;  %v1862_v54 = vadd.f32 %v4433_v61, %v1785_v18  ;;  %v1584_v61 = vld [vmem:[%s5304_s2 + $0x3e0] sm:$0xff]  ;;  %v1491_v18 = vld [vmem:[%s5304_s2 + $0xf8] sm:$0xff] }
 0x1bf   :  { %1973 = vmatmul.f32.gmra.mxu3 %v1583_v52  ;;  %2035 = vmatmul.f32.gmra.mxu0 %v1544_v1  ;;  %v1514_v1 = vld [vmem:[%s5304_s2 + $0x1b0] sm:$0xff] }
 0x1c0   :  { %v4477_v21 = vpop.f32.mrf.mxu2 }
 0x1c2   :  { %v4564_v15 = vpop.f32.mrf.mxu0 }
 0x1c4   :  { %v4490_v38 = vpop.f32.mrf.mxu1 }
 0x1c5   :  { %2165 = vmatmul.f32.gmra.mxu2 %v1482_v28  ;;  %2100 = vmatmul.f32.gmra.mxu1 %v1513_v46  ;;  %v1467_v28 = vld [vmem:[%s5304_s2 + $0x38] sm:$0xff]  ;;  %v1788_v46 = vadd.f32 %v4300_v32, %v4183_v6  ;;  %v1553_v6 = vld [vmem:[%s5304_s2 + $0x2e8] sm:$0xff] }
 0x1c7   :  { %1976 = vmatmul.f32.gmra.mxu3 %v1591_v37  ;;  %2038 = vmatmul.f32.gmra.mxu0 %v1552_v56 }
 0x1c8   :  { %v4497_v35 = vpop.f32.mrf.mxu2 }
 0x1ca   :  { %v1929_v20 = vpop.f32.mrf.mxu3  ;;  %v1746_v39 = vpop.f32.mrf.mxu0 }
 0x1cb   :  { %v4508_v25 = vadd.f32 %v1929_v20, %v1853_v41  ;;  %v1865_v41 = vadd.f32 %v4461_v23, %v1788_v46  ;;  %v1791_v23 = vadd.f32 %v4334_v50, %v4215_v7  ;;  %v1561_v7 = vld [vmem:[%s5304_s2 + $0x328] sm:$0xff] }
 0x1cc   :  { %v4513_v5 = vpop.f32.mrf.mxu1 }
 0x1cd   :  { %2168 = vmatmul.f32.gmra.mxu2 %v1490_v40  ;;  %2103 = vmatmul.f32.gmra.mxu1 %v1521_v44  ;;  %v1522_v40 = vld [vmem:[%s5304_s2 + $0x1f0] sm:$0xff]  ;;  %v1475_v44 = vld [vmem:[%s5304_s2 + $0x78] sm:$0xff] }
 0x1cf   :  { %1979 = vmatmul.f32.gmra.mxu3 %v1599_v0  ;;  %2041 = vmatmul.f32.gmra.mxu0 %v1560_v57  ;;  %v1592_v0 = vld [vmem:[%s5304_s2 + $0x420] sm:$0xff] }
 0x1d0   :  { %v4520_v51 = vpop.f32.mrf.mxu2 }
 0x1d2   :  { %v1932_v26 = vpop.f32.mrf.mxu3  ;;  %v1749_v50 = vpop.f32.mrf.mxu0 }
 0x1d3   :  { %v4529_v55 = vadd.f32 %v1932_v26, %v1856_v27  ;;  %v1868_v26 = vadd.f32 %v4477_v21, %v1791_v23  ;;  %v1600_v21 = vld [vmem:[%s5304_s2 + $0x460] sm:$0xff] }
 0x1d4   :  { %v4534_v8 = vpop.f32.mrf.mxu1 }
 0x1d5   :  { %2171 = vmatmul.f32.gmra.mxu2 %v1498_v29  ;;  %2106 = vmatmul.f32.gmra.mxu1 %v1529_v58  ;;  %v1530_v58 = vld [vmem:[%s5304_s2 + $0x230] sm:$0xff] }
 0x1d7   :  { %1982 = vmatmul.f32.gmra.mxu3 %v1607_v49  ;;  %2044 = vmatmul.f32.gmra.mxu0 %v1568_v13  ;;  %v1483_v13 = vld [vmem:[%s5304_s2 + $0xb8] sm:$0xff] }
 0x1d8   :  { %v4543_v31 = vpop.f32.mrf.mxu2 }
 0x1da   :  { %v1935_v16 = vpop.f32.mrf.mxu3 }
 0x1db   :  { %v4552_v14 = vadd.f32 %v1935_v16, %v1859_v3 }
 0x1dd   :  { %2174 = vmatmul.f32.gmra.mxu2 %v1506_v9  ;;  %2109 = vmatmul.f32.gmra.mxu1 %v1537_v10  ;;  %v4562_v63 = vpop.f32.mrf.mxu1  ;;  %v1871_v10 = vadd.f32 %v4497_v35, %v1794_v22  ;;  %v1608_v35 = vld [vmem:[%s5304_s2 + $0x4a0] sm:$0xff] }
 0x1df   :  { %1985 = vmatmul.f32.gmra.mxu3 %v1615_v36  ;;  %2047 = vmatmul.f32.gmra.mxu0 %v1576_v11  ;;  %v1538_v11 = vld [vmem:[%s5304_s2 + $0x270] sm:$0xff] }
 0x1e0   :  { %v4566_v47 = vpop.f32.mrf.mxu2 }
 0x1e2   :  { %v1938_v52 = vpop.f32.mrf.mxu3 }
 0x1e3   :  { %v4575_v53 = vadd.f32 %v1938_v52, %v1862_v54  ;;  %v1752_v54 = vpop.f32.mrf.mxu0  ;;  %v1797_v52 = vadd.f32 %v4391_v33, %v4312_v4  ;;  %v1577_v4 = vld [vmem:[%s5304_s2 + $0x3a8] sm:$0xff] }
 0x1e5   :  { %2177 = vmatmul.f32.gmra.mxu2 %v1514_v1  ;;  %2112 = vmatmul.f32.gmra.mxu1 %v1545_v43  ;;  %v4585_v37 = vpop.f32.mrf.mxu1 }
 0x1e7   :  { %3042 = vmatmul.msk.f32.vlgmr.msrb.gmra.mxu3 %vm1620_vm0, %v1467_v28  ;;  %2050 = vmatmul.f32.gmra.mxu0 %v1584_v61  ;;  %v1874_v61 = vadd.f32 %v4520_v51, %v1797_v52  ;;  %v1800_v51 = vadd.f32 %v4416_v34, %v4347_v42  ;;  %v1585_v42 = vld [vmem:[%s5304_s2 + $0x3e8] sm:$0xff]  ;;  %v1578_v52 = vld [vmem:[%s5304_s2 + $0x3b0] sm:$0xff] }
 0x1e8   :  { %v4588_v56 = vpop.f32.mrf.mxu2 }
 0x1e9   :  { %v1877_v23 = vadd.f32 %v4543_v31, %v1800_v51 }
 0x1ea   :  { %v1941_v20 = vpop.f32.mrf.mxu3 }
 0x1eb   :  { %v4597_v32 = vadd.f32 %v1941_v20, %v1865_v41  ;;  %v1499_v41 = vld [vmem:[%s5304_s2 + $0x138] sm:$0xff]  ;;  %v1616_v20 = vld [vmem:[%s5304_s2 + $0x4e0] sm:$0xff] }
 0x1ed   :  { %2180 = vmatmul.f32.gmra.mxu2 %v1522_v40  ;;  %2115 = vmatmul.f32.gmra.mxu1 %v1553_v6  ;;  %v1823_v57 = vpop.f32.mrf.mxu1  ;;  %v1755_v40 = vpop.f32.mrf.mxu0 }
 0x1ee   :  { %v4608_v45 = vadd.f32 %v1823_v57, %v1746_v39  ;;  %v1546_v39 = vld [vmem:[%s5304_s2 + $0x2b0] sm:$0xff] }
 0x1ef   :  { %3043 = vmatmul.msk.f32.gmra.mxu3 %vm1620_vm0, %v1475_v44  ;;  %2053 = vmatmul.f32.gmra.mxu0 %v1592_v0 }
 0x1f0   :  { %v4610_v27 = vpop.f32.mrf.mxu2 }
 0x1f2   :  { %v1944_v29 = vpop.f32.mrf.mxu3 }
 0x1f3   :  { %v4619_v49 = vadd.f32 %v1944_v29, %v1868_v26  ;;  %v1554_v26 = vld [vmem:[%s5304_s2 + $0x2f0] sm:$0xff]  ;;  %v1507_v29 = vld [vmem:[%s5304_s2 + $0x178] sm:$0xff] }
 0x1f5   :  { %2183 = vmatmul.f32.gmra.mxu2 %v1530_v58  ;;  %2118 = vmatmul.f32.gmra.mxu1 %v1561_v7  ;;  %v1803_v58 = vadd.f32 %v4448_v19, %v4380_v62  ;;  %v1515_v62 = vld [vmem:[%s5304_s2 + $0x1b8] sm:$0xff]  ;;  %v1806_v19 = vadd.f32 %v4472_v17, %v4418_v12 }
 0x1f6   :  { %v1826_v3 = vpop.f32.mrf.mxu1  ;;  %v1523_v17 = vld [vmem:[%s5304_s2 + $0x1f8] sm:$0xff] }
 0x1f7   :  { %3044 = vmatmul.msk.f32.gmra.mxu3 %vm1620_vm0, %v1483_v13  ;;  %v4630_v16 = vadd.f32 %v1826_v3, %v1749_v50  ;;  %2056 = vmatmul.f32.gmra.mxu0 %v1600_v21  ;;  %v1880_v7 = vadd.f32 %v4566_v47, %v1803_v58  ;;  %v1562_v13 = vld [vmem:[%s5304_s2 + $0x330] sm:$0xff]  ;;  %v1593_v21 = vld [vmem:[%s5304_s2 + $0x428] sm:$0xff]  ;;  %v1883_v3 = vadd.f32 %v4588_v56, %v1806_v19 }
 0x1f8   :  { %v4632_v9 = vpop.f32.mrf.mxu2  ;;  %v1809_v56 = vadd.f32 %v4490_v38, %v4456_v59  ;;  %v1531_v59 = vld [vmem:[%s5304_s2 + $0x238] sm:$0xff]  ;;  %v1812_v38 = vadd.f32 %v4513_v5, %v4479_v60  ;;  %v1815_v5 = vadd.f32 %v4534_v8, %v4506_v48  ;;  %v1818_v48 = vadd.f32 %v4562_v63, %v4536_v30 }
 0x1f9   :  { %v1539_v60 = vld [vmem:[%s5304_s2 + $0x278] sm:$0xff]  ;;  %v1821_v30 = vadd.f32 %v4585_v37, %v4564_v15 }
 0x1fa   :  { %v1947_v36 = vpop.f32.mrf.mxu3 }
 0x1fb   :  { %v4641_v2 = vadd.f32 %v1947_v36, %v1871_v10 }
 0x1fd   :  { %2186 = vmatmul.f32.gmra.mxu2 %v1538_v11  ;;  %2121 = vmatmul.f32.gmra.mxu1 %v1569_v24  ;;  %v1570_v11 = vld [vmem:[%s5304_s2 + $0x370] sm:$0xff]  ;;  %v1601_v24 = vld [vmem:[%s5304_s2 + $0x468] sm:$0xff] }
 0x1fe   :  { %v1829_v1 = vpop.f32.mrf.mxu1 }
 0x1ff   :  { %3045 = vmatmul.msk.f32.gmra.mxu3 %vm1620_vm0, %v1491_v18  ;;  %v4652_v43 = vadd.f32 %v1829_v1, %v1752_v54  ;;  %2059 = vmatmul.f32.gmra.mxu0 %v1608_v35  ;;  %v1886_v18 = vadd.f32 %v4610_v27, %v1809_v56  ;;  %v1609_v1 = vld [vmem:[%s5304_s2 + $0x4a8] sm:$0xff] }
 0x200   :  { %v4654_v28 = vpop.f32.mrf.mxu2 }
 0x202   :  { %v1950_v46 = vpop.f32.mrf.mxu3 }
 0x203   :  { %v4663_v33 = vadd.f32 %v1950_v46, %v1874_v61 }
 0x205   :  { %2189 = vmatmul.f32.gmra.mxu2 %v1546_v39  ;;  %2124 = vmatmul.f32.gmra.mxu1 %v1577_v4  ;;  %v1586_v4 = vld [vmem:[%s5304_s2 + $0x3f0] sm:$0xff] }
 0x206   :  { %v1832_v6 = vpop.f32.mrf.mxu1 }
 0x207   :  { %3046 = vmatmul.msk.f32.gmra.mxu3 %vm1620_vm0, %v1499_v41  ;;  %v1833_v44 = vadd.f32 %v1832_v6, %v1755_v40  ;;  %2062 = vmatmul.f32.gmra.mxu0 %v1616_v20  ;;  %v1617_v41 = vld [vmem:[%s5304_s2 + $0x4e8] sm:$0xff]  ;;  %v1594_v6 = vld [vmem:[%s5304_s2 + $0x430] sm:$0xff] }
 0x208   :  { %v4674_v0 = vpop.f32.mrf.mxu2 }
 0x209   :  { %v1895_v8 = vadd.f32 %v4674_v0, %v1818_v48 }
 0x20a   :  { %v1953_v57 = vpop.f32.mrf.mxu3 }
 0x20b   :  { %v4683_v34 = vadd.f32 %v1953_v57, %v1877_v23  ;;  %v1547_v57 = vld [vmem:[%s5304_s2 + $0x2b8] sm:$0xff] }
 0x20d   :  { %2192 = vmatmul.f32.gmra.mxu2 %v1554_v26  ;;  %2127 = vmatmul.f32.gmra.mxu1 %v1585_v42  ;;  %v2006_v42 = vpop.f32.mrf.mxu0 }
 0x20f   :  { %3047 = vmatmul.msk.f32.gmra.mxu3 %vm1620_vm0, %v1507_v29  ;;  %v1555_v29 = vld [vmem:[%s5304_s2 + $0x2f8] sm:$0xff] }
 0x210   :  { %v4691_v31 = vpop.f32.mrf.mxu2 }
 0x211   :  { %v1898_v58 = vadd.f32 %v4691_v31, %v1821_v30  ;;  %v1618_v31 = vld [vmem:[%s5304_s2 + $0x4f0] sm:$0xff] }
 0x212   :  { %v1956_v50 = vpop.f32.mrf.mxu3  ;;  %v2083_v63 = vpop.f32.mrf.mxu1 }
 0x213   :  { %v4700_v22 = vadd.f32 %v1956_v50, %v1880_v7  ;;  %v1610_v50 = vld [vmem:[%s5304_s2 + $0x4b0] sm:$0xff] }
 0x215   :  { %2195 = vmatmul.f32.gmra.mxu2 %v1562_v13  ;;  %2130 = vmatmul.f32.gmra.mxu1 %v1593_v21  ;;  %v1563_v21 = vld [vmem:[%s5304_s2 + $0x338] sm:$0xff]  ;;  %v2009_v15 = vpop.f32.mrf.mxu0 }
 0x217   :  { %3048 = vmatmul.msk.f32.gmra.mxu3 %vm1620_vm0, %v1515_v62 }
 0x218   :  { %v1900_v47 = vpop.f32.mrf.mxu2 }
 0x219   :  { %v4710_v10 = vadd.f32 %v1900_v47, %v4608_v45 }
 0x21a   :  { %v1959_v36 = vpop.f32.mrf.mxu3  ;;  %v2086_v37 = vpop.f32.mrf.mxu1 }
 0x21b   :  { %v4718_v12 = vadd.f32 %v1959_v36, %v1883_v3  ;;  %v1571_v3 = vld [vmem:[%s5304_s2 + $0x378] sm:$0xff] }
 0x21d   :  { %2198 = vmatmul.f32.gmra.mxu2 %v1570_v11  ;;  %2133 = vmatmul.f32.gmra.mxu1 %v1601_v24  ;;  %v2012_v36 = vpop.f32.mrf.mxu0 }
 0x21f   :  { %3049 = vmatmul.msk.f32.gmra.mxu3 %vm1620_vm0, %v1523_v17 }
 0x220   :  { %v1903_v45 = vpop.f32.mrf.mxu2 }
 0x221   :  { %v1904_v54 = vadd.f32 %v1903_v45, %v4630_v16  ;;  %v1889_v16 = vadd.f32 %v4632_v9, %v1812_v38  ;;  %v1579_v45 = vld [vmem:[%s5304_s2 + $0x3b8] sm:$0xff] }
 0x222   :  { %v1962_v35 = vpop.f32.mrf.mxu3  ;;  %v2089_v11 = vpop.f32.mrf.mxu1 }
 0x223   :  { %v4734_v61 = vadd.f32 %v1962_v35, %v1886_v18 }
 0x225   :  { %2201 = vmatmul.f32.gmra.mxu2 %v1578_v52  ;;  %2136 = vmatmul.f32.gmra.mxu1 %v1609_v1  ;;  %v1587_v1 = vld [vmem:[%s5304_s2 + $0x3f8] sm:$0xff] }
 0x227   :  { %3050 = vmatmul.msk.f32.gmra.mxu3 %vm1620_vm0, %v1531_v59 }
 0x228   :  { %v1906_v27 = vpop.f32.mrf.mxu2 }
 0x229   :  { %v1907_v46 = vadd.f32 %v1906_v27, %v4652_v43  ;;  %v1892_v43 = vadd.f32 %v4654_v28, %v1815_v5 }
 0x22a   :  { %v1965_v39 = vpop.f32.mrf.mxu3  ;;  %v2092_v52 = vpop.f32.mrf.mxu1 }
 0x22b   :  { %v4750_v20 = vadd.f32 %v1965_v39, %v1889_v16  ;;  %v1595_v16 = vld [vmem:[%s5304_s2 + $0x438] sm:$0xff]  ;;  %v2007_v39 = vadd.f32 %v2006_v42, %v4508_v25 }
 0x22c   :  { %v1611_v42 = vld [vmem:[%s5304_s2 + $0x4b8] sm:$0xff] }
 0x22d   :  { %2204 = vmatmul.f32.gmra.mxu2 %v1586_v4  ;;  %2139 = vmatmul.f32.gmra.mxu1 %v1617_v41  ;;  %v2084_v4 = vadd.f32 %v2083_v63, %v2007_v39 }
 0x22f   :  { %3051 = vmatmul.msk.f32.gmra.mxu3 %vm1620_vm0, %v1539_v60 }
 0x230   :  { %v1909_v9 = vpop.f32.mrf.mxu2 }
 0x231   :  { %v1910_v51 = vadd.f32 %v1909_v9, %v1833_v44  ;;  %v1602_v44 = vld [vmem:[%s5304_s2 + $0x470] sm:$0xff] }
 0x232   :  { %v1968_v40 = vpop.f32.mrf.mxu3 }
 0x233   :  { %v4762_v23 = vadd.f32 %v1968_v40, %v1892_v43  ;;  %v1603_v43 = vld [vmem:[%s5304_s2 + $0x478] sm:$0xff] }
 0x235   :  { %2207 = vmatmul.f32.gmra.mxu2 %v1594_v6 }
 0x237   :  { %3052 = vmatmul.msk.f32.gmra.mxu3 %vm1620_vm0, %v1547_v57 }
 0x238   :  { %v2160_v0 = vpop.f32.mrf.mxu2 }
 0x239   :  { %v2161_v60 = vadd.f32 %v2160_v0, %v2084_v4 }
 0x23a   :  { %v1971_v28 = vpop.f32.mrf.mxu3 }
 0x23b   :  { %v4774_v26 = vadd.f32 %v1971_v28, %v1895_v8 }
 0x23d   :  { %2210 = vmatmul.f32.gmra.mxu2 %v1602_v44 }
 0x23f   :  { %3053 = vmatmul.msk.f32.gmra.mxu3 %vm1620_vm0, %v1555_v29 }
 0x240   :  { %v2163_v62 = vpop.f32.mrf.mxu2 }
 0x242   :  { %v1974_v7 = vpop.f32.mrf.mxu3 }
 0x243   :  { %v4786_v13 = vadd.f32 %v1974_v7, %v1898_v58 }
 0x245   :  { %2213 = vmatmul.f32.gmra.mxu2 %v1610_v50 }
 0x247   :  { %3054 = vmatmul.msk.f32.gmra.mxu3 %vm1620_vm0, %v1563_v21 }
 0x248   :  { %v2166_v56 = vpop.f32.mrf.mxu2 }
 0x24a   :  { %v1977_v19 = vpop.f32.mrf.mxu3 }
 0x24b   :  { %v4796_v47 = vadd.f32 %v1977_v19, %v4710_v10  ;;  %v2015_v10 = vpop.f32.mrf.mxu0 }
 0x24d   :  { %2216 = vmatmul.f32.gmra.mxu2 %v1618_v31 }
 0x24f   :  { %3055 = vmatmul.msk.f32.gmra.mxu3 %vm1620_vm0, %v1571_v3 }
 0x250   :  { %v2169_v59 = vpop.f32.mrf.mxu2 }
 0x252   :  { %v1980_v24 = vpop.f32.mrf.mxu3 }
 0x253   :  { %v4802_v17 = vadd.f32 %v1980_v24, %v1904_v54  ;;  %v2018_v27 = vpop.f32.mrf.mxu0 }
 0x254   :  { %v2019_v24 = vadd.f32 %v2018_v27, %v4597_v32 }
 0x257   :  { %3056 = vmatmul.msk.f32.gmra.mxu3 %vm1620_vm0, %v1579_v45 }
 0x258   :  { %v2172_v41 = vpop.f32.mrf.mxu2 }
 0x25a   :  { %v1983_v18 = vpop.f32.mrf.mxu3 }
 0x25b   :  { %v4808_v35 = vadd.f32 %v1983_v18, %v1907_v46  ;;  %v2095_v46 = vpop.f32.mrf.mxu1  ;;  %v2021_v25 = vpop.f32.mrf.mxu0 }
 0x25f   :  { %3057 = vmatmul.msk.f32.gmra.mxu3 %vm1620_vm0, %v1587_v1 }
 0x260   :  { %v2175_v8 = vpop.f32.mrf.mxu2 }
 0x262   :  { %v1986_v54 = vpop.f32.mrf.mxu3 }
 0x263   :  { %v4814_v38 = vadd.f32 %v1986_v54, %v1910_v51  ;;  %v2010_v51 = vadd.f32 %v2009_v15, %v4529_v55  ;;  %v2098_v57 = vpop.f32.mrf.mxu1  ;;  %v2013_v55 = vadd.f32 %v2012_v36, %v4552_v14  ;;  %v2024_v63 = vpop.f32.mrf.mxu0  ;;  %v1619_v15 = vld [vmem:[%s5304_s2 + $0x4f8] sm:$0xff]  ;;  %v2016_v14 = vadd.f32 %v2015_v10, %v4575_v53 }
 0x264   :  { %v2096_v53 = vadd.f32 %v2095_v46, %v2019_v24  ;;  %v2025_v46 = vadd.f32 %v2024_v63, %v4641_v2 }
 0x265   :  { %v2087_v6 = vadd.f32 %v2086_v37, %v2010_v51  ;;  %v2090_v30 = vadd.f32 %v2089_v11, %v2013_v55 }
 0x266   :  { %v2173_v10 = vadd.f32 %v2172_v41, %v2096_v53 }
 0x267   :  { %3058 = vmatmul.msk.f32.gmra.mxu3 %vm1620_vm0, %v1595_v16  ;;  %v2164_v48 = vadd.f32 %v2163_v62, %v2087_v6  ;;  %v2167_v0 = vadd.f32 %v2166_v56, %v2090_v30  ;;  %v2093_v62 = vadd.f32 %v2092_v52, %v2016_v14 }
 0x268   :  { %v2178_v21 = vpop.f32.mrf.mxu2 }
 0x269   :  { %v2170_v19 = vadd.f32 %v2169_v59, %v2093_v62  ;;  %v2022_v59 = vadd.f32 %v2021_v25, %v4619_v49 }
 0x26a   :  { %v2237_v5 = vpop.f32.mrf.mxu3 }
 0x26b   :  { %v4821_v9 = vadd.f32 %v2237_v5, %v2161_v60  ;;  %v2101_v58 = vpop.f32.mrf.mxu1  ;;  %v2027_v31 = vpop.f32.mrf.mxu0  ;;  %v2099_v39 = vadd.f32 %v2098_v57, %v2022_v59 }
 0x26c   :  { %v2028_v57 = vadd.f32 %v2027_v31, %v4663_v33 }
 0x26d   :  { %v2298_v40 = vsel %vm2297_vm1, %v4821_v9, 0.0  ;;  %v2176_v27 = vadd.f32 %v2175_v8, %v2099_v39 }
 0x26e   :  { %2299 = vadd.xlane.f32.xlu0 %v2298_v40 }
 0x26f   :  { %3059 = vmatmul.msk.f32.gmra.mxu3 %vm1620_vm0, %v1603_v43  ;;  %v2102_v43 = vadd.f32 %v2101_v58, %v2025_v46  ;;  %v4873_v58 = vpop.permute.xlu0 %2900 }
 0x270   :  { %v2181_v45 = vpop.f32.mrf.mxu2 }
 0x271   :  { %v2179_v51 = vadd.f32 %v2178_v21, %v2102_v43 }
 0x272   :  { %v2240_v28 = vpop.f32.mrf.mxu3 }
 0x273   :  { %v4830_v44 = vadd.f32 %v2240_v28, %v2164_v48  ;;  %v2104_v11 = vpop.f32.mrf.mxu1  ;;  %v2030_v52 = vpop.f32.mrf.mxu0 }
 0x274   :  { %v2105_v8 = vadd.f32 %v2104_v11, %v2028_v57  ;;  %v2031_v63 = vadd.f32 %v2030_v52, %v4683_v34 }
 0x275   :  { %v2301_v29 = vsel %vm2297_vm1, %v4830_v44, 0.0 }
 0x276   :  { %2302 = vadd.xlane.f32.xlu1 %v2301_v29  ;;  %v2182_v28 = vadd.f32 %v2181_v45, %v2105_v8 }
 0x277   :  { %3060 = vmatmul.msk.f32.gmra.mxu3 %vm1620_vm0, %v1611_v42 }
 0x278   :  { %v2184_v32 = vpop.f32.mrf.mxu2 }
 0x27a   :  { %v2243_v7 = vpop.f32.mrf.mxu3 }
 0x27b   :  { %v4839_v50 = vadd.f32 %v2243_v7, %v2167_v0  ;;  %v2107_v16 = vpop.f32.mrf.mxu1  ;;  %v2033_v5 = vpop.f32.mrf.mxu0 }
 0x27c   :  { %v2108_v33 = vadd.f32 %v2107_v16, %v2031_v63  ;;  %v2034_v62 = vadd.f32 %v2033_v5, %v4700_v22  ;;  %v4887_v22 = vpop.permute.xlu2 %2905 }
 0x27d   :  { %v2304_v37 = vsel %vm2297_vm1, %v4839_v50, 0.0 }
 0x27e   :  { %2305 = vadd.xlane.f32.xlu2 %v2304_v37  ;;  %v2185_v7 = vadd.f32 %v2184_v32, %v2108_v33 }
 0x27f   :  { %3061 = vmatmul.msk.f32.gmra.mxu3 %vm1620_vm0, %v1619_v15 }
 0x280   :  { %v2187_v40 = vpop.f32.mrf.mxu2 }
 0x282   :  { %v2246_v3 = vpop.f32.mrf.mxu3 }
 0x283   :  { %v4848_v36 = vadd.f32 %v2246_v3, %v2170_v19  ;;  %v2110_v49 = vpop.f32.mrf.mxu1  ;;  %v2036_v2 = vpop.f32.mrf.mxu0 }
 0x284   :  { %v2111_v34 = vadd.f32 %v2110_v49, %v2034_v62  ;;  %v4880_v3 = vpop.permute.xlu0 %2915  ;;  %v2037_v53 = vadd.f32 %v2036_v2, %v4718_v12  ;;  %v4898_v43 = vpop.permute.xlu2 %2920 }
 0x285   :  { %v2307_v56 = vsel %vm2297_vm1, %v4848_v36, 0.0 }
 0x286   :  { %2308 = vadd.xlane.f32.xlu2 %v2307_v56  ;;  %v2188_v11 = vadd.f32 %v2187_v40, %v2111_v34 }
 0x288   :  { %v2190_v30 = vpop.f32.mrf.mxu2 }
 0x28a   :  { %v2249_v18 = vpop.f32.mrf.mxu3 }
 0x28b   :  { %v4853_v1 = vadd.f32 %v2249_v18, %v2173_v10  ;;  %v2113_v42 = vpop.f32.mrf.mxu1  ;;  %v2039_v21 = vpop.f32.mrf.mxu0 }
 0x28c   :  { %v2114_v52 = vadd.f32 %v2113_v42, %v2037_v53  ;;  %v4891_v32 = vpop.permute.xlu0 %2930  ;;  %v4909_v63 = vpop.permute.xlu2 %2935 }
 0x28d   :  { %v2310_v54 = vsel %vm2297_vm1, %v4853_v1, 0.0 }
 0x28e   :  { %2311 = vadd.xlane.f32.xlu0 %v2310_v54  ;;  %v4889_v54 = vpop.permute.xlu1 %2910  ;;  %v2191_v16 = vadd.f32 %v2190_v30, %v2114_v52 }
 0x290   :  { %v2193_v31 = vpop.f32.mrf.mxu2 }
 0x292   :  { %v2252_v4 = vpop.f32.mrf.mxu3 }
 0x293   :  { %v4858_v60 = vadd.f32 %v2252_v4, %v2176_v27  ;;  %v2116_v37 = vpop.f32.mrf.mxu1  ;;  %v2042_v45 = vpop.f32.mrf.mxu0  ;;  %v2040_v4 = vadd.f32 %v2039_v21, %v4734_v61 }
 0x294   :  { %v2043_v61 = vadd.f32 %v2042_v45, %v4750_v20 }
 0x295   :  { %v2313_v41 = vsel %vm2297_vm1, %v4858_v60, 0.0 }
 0x296   :  { %2314 = vadd.xlane.f32.xlu1 %v2313_v41  ;;  %v2117_v41 = vadd.f32 %v2116_v37, %v2040_v4 }
 0x298   :  { %v2196_v59 = vpop.f32.mrf.mxu2  ;;  %v2194_v49 = vadd.f32 %v2193_v31, %v2117_v41 }
 0x29a   :  { %v2255_v25 = vpop.f32.mrf.mxu3 }
 0x29b   :  { %v4863_v6 = vadd.f32 %v2255_v25, %v2179_v51  ;;  %v2119_v18 = vpop.f32.mrf.mxu1  ;;  %v2045_v46 = vpop.f32.mrf.mxu0 }
 0x29c   :  { %v4900_v25 = vpop.permute.xlu1 %2925  ;;  %v2120_v2 = vadd.f32 %v2119_v18, %v2043_v61  ;;  %v2046_v21 = vadd.f32 %v2045_v46, %v4762_v23 }
 0x29d   :  { %v2316_v48 = vsel %vm2297_vm1, %v4863_v6, 0.0 }
 0x29e   :  { %2317 = vadd.xlane.f32.xlu2 %v2316_v48  ;;  %v4904_v48 = vpop.permute.xlu0 %2945  ;;  %v2197_v42 = vadd.f32 %v2196_v59, %v2120_v2 }
 0x2a0   :  { %v2199_v51 = vpop.f32.mrf.mxu2 }
 0x2a2   :  { %v2258_v55 = vpop.f32.mrf.mxu3 }
 0x2a3   :  { %v4868_v29 = vadd.f32 %v2258_v55, %v2182_v28  ;;  %v2122_v5 = vpop.f32.mrf.mxu1  ;;  %v2048_v28 = vpop.f32.mrf.mxu0 }
 0x2a4   :  { %v2123_v37 = vadd.f32 %v2122_v5, %v2046_v21  ;;  %v2049_v45 = vadd.f32 %v2048_v28, %v4774_v26 }
 0x2a5   :  { %v2319_v0 = vsel %vm2297_vm1, %v4868_v29, 0.0 }
 0x2a6   :  { %2320 = vadd.xlane.f32.xlu0 %v2319_v0  ;;  %v2200_v62 = vadd.f32 %v2199_v51, %v2123_v37 }
 0x2a8   :  { %v2202_v33 = vpop.f32.mrf.mxu2 }
 0x2aa   :  { %v2261_v15 = vpop.f32.mrf.mxu3 }
 0x2ab   :  { %v4875_v14 = vadd.f32 %v2261_v15, %v2185_v7  ;;  %v2125_v55 = vpop.f32.mrf.mxu1  ;;  %v4913_v7 = vpop.permute.xlu1 %2940 }
 0x2ac   :  { %v4918_v15 = vpop.permute.xlu0 %2960  ;;  %v2126_v18 = vadd.f32 %v2125_v55, %v2049_v45 }
 0x2ad   :  { %v2322_v19 = vsel %vm2297_vm1, %v4875_v14, 0.0 }
 0x2ae   :  { %2323 = vadd.xlane.f32.xlu1 %v2322_v19  ;;  %v2051_v19 = vpop.f32.mrf.mxu0  ;;  %v2203_v59 = vadd.f32 %v2202_v33, %v2126_v18 }
 0x2b0   :  { %v2205_v53 = vpop.f32.mrf.mxu2 }
 0x2b2   :  { %v2264_v24 = vpop.f32.mrf.mxu3 }
 0x2b3   :  { %v4882_v56 = vadd.f32 %v2264_v24, %v2188_v11  ;;  %v2128_v11 = vpop.f32.mrf.mxu1  ;;  %v4922_v24 = vpop.permute.xlu2 %2950 }
 0x2b4   :  { %v4929_v52 = vpop.permute.xlu0 %2975 }
 0x2b5   :  { %v2325_v10 = vsel %vm2297_vm1, %v4882_v56, 0.0 }
 0x2b6   :  { %2326 = vadd.xlane.f32.xlu2 %v2325_v10  ;;  %v4927_v10 = vpop.permute.xlu1 %2955  ;;  %v2054_v4 = vpop.f32.mrf.mxu0 }
 0x2ba   :  { %v2267_v39 = vpop.f32.mrf.mxu3 }
 0x2bb   :  { %v4893_v27 = vadd.f32 %v2267_v39, %v2191_v16  ;;  %v2131_v46 = vpop.f32.mrf.mxu1  ;;  %v4936_v41 = vpop.permute.xlu2 %2965 }
 0x2bd   :  { %v2328_v12 = vsel %vm2297_vm1, %v4893_v27, 0.0 }
 0x2be   :  { %2329 = vadd.xlane.f32.xlu0 %v2328_v12  ;;  %v2052_v12 = vadd.f32 %v2051_v19, %v4786_v13  ;;  %v4938_v51 = vpop.permute.xlu1 %2970  ;;  %v2055_v13 = vadd.f32 %v2054_v4, %v4796_v47 }
 0x2c0   :  { %v2129_v5 = vadd.f32 %v2128_v11, %v2052_v12  ;;  %v2132_v21 = vadd.f32 %v2131_v46, %v2055_v13 }
 0x2c2   :  { %v2270_v40 = vpop.f32.mrf.mxu3 }
 0x2c3   :  { %v4902_v57 = vadd.f32 %v2270_v40, %v2194_v49  ;;  %v2208_v49 = vpop.f32.mrf.mxu2  ;;  %v2206_v40 = vadd.f32 %v2205_v53, %v2129_v5 }
 0x2c4   :  { %v2209_v19 = vadd.f32 %v2208_v49, %v2132_v21 }
 0x2c5   :  { %v2331_v8 = vsel %vm2297_vm1, %v4902_v57, 0.0 }
 0x2c6   :  { %2332 = vadd.xlane.f32.xlu1 %v2331_v8 }
 0x2ca   :  { %v2273_v30 = vpop.f32.mrf.mxu3 }
 0x2cb   :  { %v4911_v0 = vadd.f32 %v2273_v30, %v2197_v42  ;;  %v2057_v30 = vpop.f32.mrf.mxu0 }
 0x2cc   :  { %v2058_v53 = vadd.f32 %v2057_v30, %v4802_v17 }
 0x2cd   :  { %v2334_v20 = vsel %vm2297_vm1, %v4911_v0, 0.0 }
 0x2ce   :  { %2335 = vadd.xlane.f32.xlu2 %v2334_v20  ;;  %v2134_v20 = vpop.f32.mrf.mxu1 }
 0x2d2   :  { %v2276_v31 = vpop.f32.mrf.mxu3 }
 0x2d3   :  { %v4920_v34 = vadd.f32 %v2276_v31, %v2200_v62  ;;  %v4951_v62 = vpop.permute.xlu2 %2980  ;;  %v2060_v4 = vpop.f32.mrf.mxu0 }
 0x2d5   :  { %v2337_v23 = vsel %vm2297_vm1, %v4920_v34, 0.0 }
 0x2d6   :  { %2338 = vadd.xlane.f32.xlu0 %v2337_v23  ;;  %v2137_v5 = vpop.f32.mrf.mxu1 }
 0x2da   :  { %v2279_v16 = vpop.f32.mrf.mxu3 }
 0x2db   :  { %v4931_v39 = vadd.f32 %v2279_v16, %v2203_v59  ;;  %v2135_v16 = vadd.f32 %v2134_v20, %v2058_v53  ;;  %v2063_v20 = vpop.f32.mrf.mxu0 }
 0x2dd   :  { %v2340_v26 = vsel %vm2297_vm1, %v4931_v39, 0.0 }
 0x2de   :  { %2341 = vadd.xlane.f32.xlu1 %v2340_v26 }
 0x2e1   :  { %v2300_v61 = vpop.xlane.xlu0 %2299 }
 0x2e2   :  { %v2358_v8 = vmul.f32 0.020408163, %v2300_v61  ;;  %v2282_v2 = vpop.f32.mrf.mxu3 }
 0x2e3   :  { %v4940_v28 = vadd.f32 %v2282_v2, %v2206_v40 }
 0x2e4   :  { %v4943_v42 = vsub.f32 %v4821_v9, %v2358_v8  ;;  %v2211_v9 = vpop.f32.mrf.mxu2  ;;  %v2061_v8 = vadd.f32 %v2060_v4, %v4808_v35 }
 0x2e5   :  { %v2343_v55 = vsel %vm2297_vm1, %v4940_v28, 0.0  ;;  %v2212_v26 = vadd.f32 %v2211_v9, %v2135_v16  ;;  %v2064_v9 = vadd.f32 %v2063_v20, %v4814_v38 }
 0x2e6   :  { %2344 = vadd.xlane.f32.xlu2 %v2343_v55  ;;  %v2398_v33 = vmul.f32 %v4943_v42, %v4943_v42  ;;  %v2138_v55 = vadd.f32 %v2137_v5, %v2061_v8 }
 0x2e8   :  { %v2418_v37 = vsel %vm2297_vm1, %v2398_v33, 0.0 }
 0x2e9   :  { %v2303_v31 = vpop.xlane.xlu1 %2302  ;;  %2419 = vadd.xlane.f32.xlu1 %v2418_v37 }
 0x2ea   :  { %v2359_v11 = vmul.f32 0.020408163, %v2303_v31  ;;  %v2285_v47 = vpop.f32.mrf.mxu3  ;;  %v2140_v31 = vpop.f32.mrf.mxu1 }
 0x2eb   :  { %v4953_v45 = vadd.f32 %v2285_v47, %v2209_v19 }
 0x2ec   :  { %v4956_v23 = vsub.f32 %v4830_v44, %v2359_v11  ;;  %v2214_v17 = vpop.f32.mrf.mxu2 }
 0x2ed   :  { %v2346_v18 = vsel %vm2297_vm1, %v4953_v45, 0.0  ;;  %v2215_v33 = vadd.f32 %v2214_v17, %v2138_v55 }
 0x2ee   :  { %2347 = vadd.xlane.f32.xlu0 %v2346_v18  ;;  %v2399_v59 = vmul.f32 %v4956_v23, %v4956_v23  ;;  %v2141_v18 = vadd.f32 %v2140_v31, %v2064_v9 }
 0x2f0   :  { %v2421_v12 = vsel %vm2297_vm1, %v2399_v59, 0.0 }
 0x2f1   :  { %v2306_v46 = vpop.xlane.xlu2 %2305  ;;  %2422 = vadd.xlane.f32.xlu2 %v2421_v12 }
 0x2f2   :  { %v2360_v49 = vmul.f32 0.020408163, %v2306_v46  ;;  %v2288_v44 = vpop.f32.mrf.mxu3 }
 0x2f3   :  { %v4964_v40 = vadd.f32 %v2288_v44, %v2212_v26 }
 0x2f4   :  { %v4967_v61 = vsub.f32 %v4839_v50, %v2360_v49  ;;  %v2217_v47 = vpop.f32.mrf.mxu2 }
 0x2f5   :  { %v2349_v2 = vsel %vm2297_vm1, %v4964_v40, 0.0  ;;  %v2218_v16 = vadd.f32 %v2217_v47, %v2141_v18 }
 0x2f6   :  { %2350 = vadd.xlane.f32.xlu1 %v2349_v2  ;;  %v2400_v13 = vmul.f32 %v4967_v61, %v4967_v61 }
 0x2f8   :  { %v2424_v30 = vsel %vm2297_vm1, %v2400_v13, 0.0 }
 0x2f9   :  { %v2309_v21 = vpop.xlane.xlu2 %2308  ;;  %2425 = vadd.xlane.f32.xlu0 %v2424_v30 }
 0x2fa   :  { %v2361_v37 = vmul.f32 0.020408163, %v2309_v21  ;;  %v2291_v19 = vpop.f32.mrf.mxu3 }
 0x2fb   :  { %v4975_v50 = vadd.f32 %v2291_v19, %v2215_v33 }
 0x2fc   :  { %v4978_v35 = vsub.f32 %v4848_v36, %v2361_v37 }
 0x2fd   :  { %v2352_v11 = vsel %vm2297_vm1, %v4975_v50, 0.0 }
 0x2fe   :  { %2353 = vadd.xlane.f32.xlu2 %v2352_v11  ;;  %v2401_v53 = vmul.f32 %v4978_v35, %v4978_v35 }
 0x300   :  { %v2427_v59 = vsel %vm2297_vm1, %v2401_v53, 0.0 }
 0x301   :  { %2428 = vadd.xlane.f32.xlu1 %v2427_v59  ;;  %v2312_v4 = vpop.xlane.xlu0 %2311 }
 0x302   :  { %v2362_v12 = vmul.f32 0.020408163, %v2312_v4  ;;  %v2294_v26 = vpop.f32.mrf.mxu3 }
 0x303   :  { %v4986_v36 = vadd.f32 %v2294_v26, %v2218_v16 }
 0x304   :  { %v4989_v38 = vsub.f32 %v4853_v1, %v2362_v12 }
 0x305   :  { %v2355_v46 = vsel %vm2297_vm1, %v4986_v36, 0.0 }
 0x306   :  { %2356 = vadd.xlane.f32.xlu0 %v2355_v46  ;;  %v2402_v5 = vmul.f32 %v4989_v38, %v4989_v38 }
 0x308   :  { %v2430_v49 = vsel %vm2297_vm1, %v2402_v5, 0.0 }
 0x309   :  { %v2315_v44 = vpop.xlane.xlu1 %2314  ;;  %2431 = vadd.xlane.f32.xlu2 %v2430_v49 }
 0x30a   :  { %v2363_v17 = vmul.f32 0.020408163, %v2315_v44 }
 0x30c   :  { %v4997_v8 = vsub.f32 %v4858_v60, %v2363_v17 }
 0x30e   :  { %v2403_v2 = vmul.f32 %v4997_v8, %v4997_v8 }
 0x310   :  { %v2433_v1 = vsel %vm2297_vm1, %v2403_v2, 0.0 }
 0x311   :  { %v2318_v13 = vpop.xlane.xlu2 %2317  ;;  %2434 = vadd.xlane.f32.xlu0 %v2433_v1 }
 0x312   :  { %v2364_v55 = vmul.f32 0.020408163, %v2318_v13 }
 0x314   :  { %v5003_v30 = vsub.f32 %v4863_v6, %v2364_v55 }
 0x316   :  { %v2404_v33 = vmul.f32 %v5003_v30, %v5003_v30 }
 0x318   :  { %v2436_v21 = vsel %vm2297_vm1, %v2404_v33, 0.0 }
 0x319   :  { %2437 = vadd.xlane.f32.xlu1 %v2436_v21  ;;  %v2321_v20 = vpop.xlane.xlu0 %2320 }
 0x31a   :  { %v2365_v60 = vmul.f32 0.020408163, %v2321_v20 }
 0x31c   :  { %v5009_v37 = vsub.f32 %v4868_v29, %v2365_v60 }
 0x31e   :  { %v2405_v19 = vmul.f32 %v5009_v37, %v5009_v37 }
 0x320   :  { %v2439_v31 = vsel %vm2297_vm1, %v2405_v19, 0.0 }
 0x321   :  { %v2324_v9 = vpop.xlane.xlu1 %2323  ;;  %2440 = vadd.xlane.f32.xlu2 %v2439_v31 }
 0x322   :  { %v2366_v6 = vmul.f32 0.020408163, %v2324_v9 }
 0x324   :  { %v5015_v11 = vsub.f32 %v4875_v14, %v2366_v6 }
 0x326   :  { %v2406_v47 = vmul.f32 %v5015_v11, %v5015_v11 }
 0x328   :  { %v2442_v53 = vsel %vm2297_vm1, %v2406_v47, 0.0 }
 0x329   :  { %v2327_v18 = vpop.xlane.xlu2 %2326  ;;  %2443 = vadd.xlane.f32.xlu0 %v2442_v53 }
 0x32a   :  { %v2367_v29 = vmul.f32 0.020408163, %v2327_v18 }
 0x32c   :  { %v5021_v59 = vsub.f32 %v4882_v56, %v2367_v29 }
 0x32e   :  { %v2407_v16 = vmul.f32 %v5021_v59, %v5021_v59 }
 0x330   :  { %v2445_v4 = vsel %vm2297_vm1, %v2407_v16, 0.0 }
 0x331   :  { %2446 = vadd.xlane.f32.xlu1 %v2445_v4  ;;  %v2330_v12 = vpop.xlane.xlu0 %2329 }
 0x332   :  { %v2368_v14 = vmul.f32 0.020408163, %v2330_v12 }
 0x334   :  { %v5027_v26 = vsub.f32 %v4893_v27, %v2368_v14 }
 0x336   :  { %v2408_v46 = vmul.f32 %v5027_v26, %v5027_v26 }
 0x338   :  { %v2448_v5 = vsel %vm2297_vm1, %v2408_v46, 0.0 }
 0x339   :  { %v2333_v49 = vpop.xlane.xlu1 %2332  ;;  %2449 = vadd.xlane.f32.xlu2 %v2448_v5 }
 0x33a   :  { %v2369_v56 = vmul.f32 0.020408163, %v2333_v49 }
 0x33c   :  { %v5033_v44 = vsub.f32 %v4902_v57, %v2369_v56 }
 0x33e   :  { %v2409_v17 = vmul.f32 %v5033_v44, %v5033_v44 }
 0x340   :  { %v2451_v2 = vsel %vm2297_vm1, %v2409_v17, 0.0 }
 0x341   :  { %v2336_v1 = vpop.xlane.xlu2 %2335  ;;  %2452 = vadd.xlane.f32.xlu0 %v2451_v2 }
 0x342   :  { %v2370_v27 = vmul.f32 0.020408163, %v2336_v1 }
 0x344   :  { %v5039_v13 = vsub.f32 %v4911_v0, %v2370_v27 }
 0x346   :  { %v2410_v55 = vmul.f32 %v5039_v13, %v5039_v13 }
 0x348   :  { %v2454_v33 = vsel %vm2297_vm1, %v2410_v55, 0.0 }
 0x349   :  { %2455 = vadd.xlane.f32.xlu1 %v2454_v33  ;;  %v2339_v21 = vpop.xlane.xlu0 %2338 }
 0x34a   :  { %v2371_v57 = vmul.f32 0.020408163, %v2339_v21 }
 0x34c   :  { %v5045_v20 = vsub.f32 %v4920_v34, %v2371_v57 }
 0x34e   :  { %v2411_v60 = vmul.f32 %v5045_v20, %v5045_v20 }
 0x350   :  { %v2457_v19 = vsel %vm2297_vm1, %v2411_v60, 0.0 }
 0x351   :  { %v2342_v31 = vpop.xlane.xlu1 %2341  ;;  %2458 = vadd.xlane.f32.xlu2 %v2457_v19 }
 0x352   :  { %v2372_v0 = vmul.f32 0.020408163, %v2342_v31 }
 0x354   :  { %v5051_v9 = vsub.f32 %v4931_v39, %v2372_v0 }
 0x356   :  { %v2412_v6 = vmul.f32 %v5051_v9, %v5051_v9 }
 0x358   :  { %v2460_v47 = vsel %vm2297_vm1, %v2412_v6, 0.0 }
 0x359   :  { %v2345_v53 = vpop.xlane.xlu2 %2344  ;;  %2461 = vadd.xlane.f32.xlu0 %v2460_v47 }
 0x35a   :  { %v2373_v34 = vmul.f32 0.020408163, %v2345_v53 }
 0x35c   :  { %v5057_v18 = vsub.f32 %v4940_v28, %v2373_v34  ;;  %v2420_v29 = vpop.xlane.xlu1 %2419 }
 0x35d   :  { %v2478_v16 = vmul.f32 0.020408163, %v2420_v29 }
 0x35e   :  { %v2413_v4 = vmul.f32 %v5057_v18, %v5057_v18 }
 0x35f   :  { %v2518_v12 = vadd.f32 0.001, %v2478_v16 }
 0x360   :  { %v2463_v39 = vsel %vm2297_vm1, %v2413_v4, 0.0 }
 0x361   :  { %2464 = vadd.xlane.f32.xlu1 %v2463_v39  ;;  %v2348_v14 = vpop.xlane.xlu0 %2347  ;;  %3066 = vrsqrt.f32 %v2518_v12  ;;  %vm2544_vm3 = vweird.f32 %v2518_v12 }
 0x362   :  { %v2374_v46 = vmul.f32 0.020408163, %v2348_v14 }
 0x364   :  { %v5063_v5 = vsub.f32 %v4953_v45, %v2374_v46  ;;  %v2423_v49 = vpop.xlane.xlu2 %2422 }
 0x365   :  { %v2479_v56 = vmul.f32 0.020408163, %v2423_v49 }
 0x366   :  { %v2414_v28 = vmul.f32 %v5063_v5, %v5063_v5 }
 0x367   :  { %v3067_v2 = vpop.eup %3066  ;;  %v5068_v33 = vadd.f32 0.001, %v2479_v56 }
 0x368   :  { %v2466_v17 = vsel %vm2297_vm1, %v2414_v28, 0.0  ;;  %v2539_v55 = vmul.f32 %v3067_v2, %v2518_v12  ;;  %vm2545_vm2 = vweird.f32 %v3067_v2 }
 0x369   :  { %v2351_v1 = vpop.xlane.xlu1 %2350  ;;  %2467 = vadd.xlane.f32.xlu2 %v2466_v17  ;;  %3068 = vrsqrt.f32 %v5068_v33  ;;  %vm2546_vm4 = vmor %vm2544_vm3, %vm2545_vm2  ;;  %vm2554_vm9 = vweird.f32 %v5068_v33 }
 0x36a   :  { %v2375_v27 = vmul.f32 0.020408163, %v2351_v1  ;;  %v2540_v19 = vmul.f32 %v3067_v2, %v2539_v55 }
 0x36c   :  { %v5071_v21 = vsub.f32 %v4964_v40, %v2375_v27  ;;  %v2426_v57 = vpop.xlane.xlu0 %2425  ;;  %v2541_v53 = vmul.f32 0.5, %v2540_v19 }
 0x36d   :  { %v2480_v60 = vmul.f32 0.020408163, %v2426_v57 }
 0x36e   :  { %5309 = vst [vmem:[#allocation2_spill] sm:$0xff] %v5071_v21  ;;  %v2415_v45 = vmul.f32 %v5071_v21, %v5071_v21  ;;  %v2542_v14 = vsub.f32 1.5, %v2541_v53 }
 0x36f   :  { %v5077_v47 = vadd.f32 0.001, %v2480_v60  ;;  %v5082_v16 = vpop.eup %3068 }
 0x370   :  { %v2469_v31 = vsel %vm2297_vm1, %v2415_v45, 0.0  ;;  %v2549_v49 = vmul.f32 %v5082_v16, %v5068_v33  ;;  %v2543_v56 = vmul.f32 %v3067_v2, %v2542_v14  ;;  %vm2555_vm7 = vweird.f32 %v5082_v16 }
 0x371   :  { %v2354_v0 = vpop.xlane.xlu2 %2353  ;;  %2470 = vadd.xlane.f32.xlu0 %v2469_v31  ;;  %3070 = vrsqrt.f32 %v5077_v47  ;;  %vm2556_vm10 = vmor %vm2554_vm9, %vm2555_vm7  ;;  %vm2564_vm13 = vweird.f32 %v5077_v47 }
 0x372   :  { %v2376_v6 = vmul.f32 0.020408163, %v2354_v0  ;;  %v2550_v55 = vmul.f32 %v5082_v16, %v2549_v49  ;;  %v2547_v53 = vsel %vm2546_vm4, %v3067_v2, %v2543_v56  ;;  %v2501_v56 = vld [vmem:[%s5306_s3 + $0x18] sm:$0xff] }
 0x374   :  { %v5080_v34 = vsub.f32 %v4975_v50, %v2376_v6  ;;  %v2429_v40 = vpop.xlane.xlu1 %2428  ;;  %v2498_v6 = vld [vmem:[%s5306_s3] sm:$0xff] }
 0x375   :  { %v2481_v29 = vmul.f32 0.020408163, %v2429_v40  ;;  %v2551_v40 = vmul.f32 0.5, %v2550_v55 }
 0x376   :  { %v2416_v4 = vmul.f32 %v5080_v34, %v5080_v34 }
 0x377   :  { %v2521_v39 = vadd.f32 0.001, %v2481_v29  ;;  %v5093_v27 = vpop.eup %3070  ;;  %v2738_v29 = vmul.f32 %v2547_v53, %v2498_v6  ;;  %v2552_v49 = vsub.f32 1.5, %v2551_v40 }
 0x378   :  { %v2472_v46 = vsel %vm2297_vm1, %v2416_v4, 0.0  ;;  %v2559_v31 = vmul.f32 %v5093_v27, %v5077_v47  ;;  %vm2565_vm11 = vweird.f32 %v5093_v27  ;;  %v2502_v47 = vld [vmem:[%s5306_s3 + $0x20] sm:$0xff] }
 0x379   :  { %3072 = vrsqrt.f32 %v2521_v39  ;;  %2473 = vadd.xlane.f32.xlu1 %v2472_v46  ;;  %v2357_v50 = vpop.xlane.xlu0 %2356  ;;  %vm2574_vm6 = vweird.f32 %v2521_v39  ;;  %v2553_v55 = vmul.f32 %v5082_v16, %v2552_v49  ;;  %vm2566_vm14 = vmor %vm2564_vm13, %vm2565_vm11 }
 0x37a   :  { %v2377_v28 = vmul.f32 0.020408163, %v2357_v50  ;;  %v2560_v4 = vmul.f32 %v5093_v27, %v2559_v31 }
 0x37c   :  { %v5091_v17 = vsub.f32 %v4986_v36, %v2377_v28  ;;  %v2432_v1 = vpop.xlane.xlu2 %2431 }
 0x37d   :  { %v2482_v57 = vmul.f32 0.020408163, %v2432_v1 }
 0x37e   :  { %v2417_v45 = vmul.f32 %v5091_v17, %v5091_v17 }
 0x37f   :  { %v3073_v60 = vpop.eup %3072  ;;  %v2522_v19 = vadd.f32 0.001, %v2482_v57 }
 0x380   :  { %v2569_v0 = vmul.f32 %v3073_v60, %v2521_v39  ;;  %v2475_v36 = vsel %vm2297_vm1, %v2417_v45, 0.0  ;;  %vm2575_vm5 = vweird.f32 %v3073_v60  ;;  %v2561_v45 = vmul.f32 0.5, %v2560_v4 }
 0x381   :  { %3074 = vrsqrt.f32 %v2522_v19  ;;  %2476 = vadd.xlane.f32.xlu2 %v2475_v36  ;;  %vm2576_vm8 = vmor %vm2574_vm6, %vm2575_vm5  ;;  %vm2584_vm15 = vweird.f32 %v2522_v19 }
 0x382   :  { %v2570_v12 = vmul.f32 %v3073_v60, %v2569_v0  ;;  %v2562_v6 = vsub.f32 1.5, %v2561_v45 }
 0x384   :  { %v2571_v14 = vmul.f32 0.5, %v2570_v12  ;;  %v2435_v46 = vpop.xlane.xlu0 %2434  ;;  %v2499_v12 = vld [vmem:[%s5306_s3 + $0x8] sm:$0xff] }
 0x385   :  { %v2483_v50 = vmul.f32 0.020408163, %v2435_v46  ;;  %2760 = vperm.xlu0 %3063, %v2738_v29   ;;  %v2557_v29 = vsel %vm2556_vm10, %v5082_v16, %v2553_v55 }
 0x386   :  { %v2572_v28 = vsub.f32 1.5, %v2571_v14 }
 0x387   :  { %v3075_v1 = vpop.eup %3074  ;;  %v2523_v57 = vadd.f32 0.001, %v2483_v50 }
 0x388   :  { %v2573_v21 = vmul.f32 %v3073_v60, %v2572_v28  ;;  %v2579_v2 = vmul.f32 %v3075_v1, %v2522_v19  ;;  %vm2585_vm12 = vweird.f32 %v3075_v1 }
 0x389   :  { %3076 = vrsqrt.f32 %v2523_v57  ;;  %vm5118_vm0 = vmor %vm2584_vm15, %vm2585_vm12  ;;  %vm2594_vm3 = vweird.f32 %v2523_v57 }
 0x38a   :  { %v2580_v31 = vmul.f32 %v3075_v1, %v2579_v2  ;;  %v2577_v0 = vsel %vm2576_vm8, %v3073_v60, %v2573_v21  ;;  %v2563_v21 = vmul.f32 %v5093_v27, %v2562_v6  ;;  %v2739_v60 = vmul.f32 %v2557_v29, %v2499_v12  ;;  %v2500_v2 = vld [vmem:[%s5306_s3 + $0x10] sm:$0xff] }
 0x38b   :  { %v2741_v36 = vmul.f32 %v2577_v0, %v2501_v56 }
 0x38c   :  { %v2581_v53 = vmul.f32 0.5, %v2580_v31  ;;  %v2438_v39 = vpop.xlane.xlu1 %2437  ;;  %v2567_v56 = vsel %vm2566_vm14, %v5093_v27, %v2563_v21  ;;  %v2503_v27 = vld [vmem:[%s5306_s3 + $0x28] sm:$0xff] }
 0x38d   :  { %v2484_v40 = vmul.f32 0.020408163, %v2438_v39  ;;  %2775 = vperm.xlu0 %3063, %v2741_v36   ;;  %v2740_v6 = vmul.f32 %v2567_v56, %v2500_v2 }
 0x38e   :  { %v2582_v4 = vsub.f32 1.5, %v2581_v53 }
 0x38f   :  { %v3077_v14 = vpop.eup %3076  ;;  %v2524_v46 = vadd.f32 0.001, %v2484_v40 }
 0x390   :  { %v2589_v33 = vmul.f32 %v3077_v14, %v2523_v57  ;;  %v2583_v49 = vmul.f32 %v3075_v1, %v2582_v4  ;;  %vm2595_vm2 = vweird.f32 %v3077_v14 }
 0x391   :  { %3078 = vrsqrt.f32 %v2524_v46  ;;  %vm2596_vm4 = vmor %vm2594_vm3, %vm2595_vm2  ;;  %vm2604_vm6 = vweird.f32 %v2524_v46 }
 0x392   :  { %v2590_v50 = vmul.f32 %v3077_v14, %v2589_v33  ;;  %2765 = vperm.xlu1 %3064, %v2739_v60   ;;  %v2587_v19 = vsel %vm5118_vm0, %v3075_v1, %v2583_v49 }
 0x393   :  { %v2742_v40 = vmul.f32 %v2587_v19, %v2502_v47 }
 0x394   :  { %v2591_v28 = vmul.f32 0.5, %v2590_v50  ;;  %v2441_v45 = vpop.xlane.xlu2 %2440 }
 0x395   :  { %v2485_v55 = vmul.f32 0.020408163, %v2441_v45 }
 0x396   :  { %v2592_v31 = vsub.f32 1.5, %v2591_v28  ;;  %v2504_v28 = vld [vmem:[%s5306_s3 + $0x30] sm:$0xff] }
 0x397   :  { %v3079_v0 = vpop.eup %3078  ;;  %v2525_v36 = vadd.f32 0.001, %v2485_v55 }
 0x398   :  { %v2593_v53 = vmul.f32 %v3077_v14, %v2592_v31  ;;  %v2599_v39 = vmul.f32 %v3079_v0, %v2524_v46  ;;  %vm2605_vm5 = vweird.f32 %v3079_v0 }
 0x399   :  { %3080 = vrsqrt.f32 %v2525_v36  ;;  %2770 = vperm.xlu2 %3065, %v2740_v6   ;;  %vm2606_vm7 = vmor %vm2604_vm6, %vm2605_vm5  ;;  %vm2614_vm9 = vweird.f32 %v2525_v36 }
 0x39a   :  { %v2600_v12 = vmul.f32 %v3079_v0, %v2599_v39  ;;  %2780 = vperm.xlu1 %3064, %v2742_v40   ;;  %v2597_v29 = vsel %vm2596_vm4, %v3077_v14, %v2593_v53  ;;  %v2505_v39 = vld [vmem:[%s5306_s3 + $0x38] sm:$0xff] }
 0x39b   :  { %v2743_v1 = vmul.f32 %v2597_v29, %v2503_v27 }
 0x39c   :  { %v2601_v4 = vmul.f32 0.5, %v2600_v12  ;;  %v2444_v21 = vpop.xlane.xlu0 %2443 }
 0x39d   :  { %v2486_v33 = vmul.f32 0.020408163, %v2444_v21  ;;  %2785 = vperm.xlu0 %3063, %v2743_v1  }
 0x39e   :  { %v2602_v60 = vsub.f32 1.5, %v2601_v4 }
 0x39f   :  { %v3081_v57 = vpop.eup %3080  ;;  %v2526_v49 = vadd.f32 0.001, %v2486_v33 }
 0x3a0   :  { %v2603_v50 = vmul.f32 %v3079_v0, %v2602_v60  ;;  %v2609_v16 = vmul.f32 %v3081_v57, %v2525_v36  ;;  %vm2615_vm8 = vweird.f32 %v3081_v57 }
 0x3a1   :  { %3082 = vrsqrt.f32 %v2526_v49  ;;  %vm2616_vm10 = vmor %vm2614_vm9, %vm2615_vm8  ;;  %vm2624_vm12 = vweird.f32 %v2526_v49 }
 0x3a2   :  { %v2610_v45 = vmul.f32 %v3081_v57, %v2609_v16  ;;  %v2607_v14 = vsel %vm2606_vm7, %v3079_v0, %v2603_v50  ;;  %v2506_v50 = vld [vmem:[%s5306_s3 + $0x40] sm:$0xff] }
 0x3a3   :  { %v2744_v2 = vmul.f32 %v2607_v14, %v2504_v28 }
 0x3a4   :  { %v2611_v56 = vmul.f32 0.5, %v2610_v45  ;;  %v2447_v55 = vpop.xlane.xlu1 %2446 }
 0x3a5   :  { %v2487_v47 = vmul.f32 0.020408163, %v2447_v55  ;;  %2790 = vperm.xlu2 %3065, %v2744_v2  }
 0x3a6   :  { %v2612_v19 = vsub.f32 1.5, %v2611_v56 }
 0x3a7   :  { %v3083_v31 = vpop.eup %3082  ;;  %v2527_v6 = vadd.f32 0.001, %v2487_v47 }
 0x3a8   :  { %v2613_v53 = vmul.f32 %v3081_v57, %v2612_v19  ;;  %v2619_v46 = vmul.f32 %v3083_v31, %v2526_v49  ;;  %vm2625_vm11 = vweird.f32 %v3083_v31 }
 0x3a9   :  { %3084 = vrsqrt.f32 %v2527_v6  ;;  %vm2626_vm13 = vmor %vm2624_vm12, %vm2625_vm11  ;;  %vm2634_vm15 = vweird.f32 %v2527_v6 }
 0x3aa   :  { %v2620_v40 = vmul.f32 %v3083_v31, %v2619_v46  ;;  %v2617_v0 = vsel %vm2616_vm10, %v3081_v57, %v2613_v53  ;;  %v2507_v53 = vld [vmem:[%s5306_s3 + $0x48] sm:$0xff] }
 0x3ab   :  { %v2745_v27 = vmul.f32 %v2617_v0, %v2505_v39 }
 0x3ac   :  { %v2621_v12 = vmul.f32 0.5, %v2620_v40  ;;  %v2450_v29 = vpop.xlane.xlu2 %2449 }
 0x3ad   :  { %v2488_v1 = vmul.f32 0.020408163, %v2450_v29  ;;  %2795 = vperm.xlu1 %3064, %v2745_v27  }
 0x3ae   :  { %v2622_v4 = vsub.f32 1.5, %v2621_v12 }
 0x3af   :  { %v3085_v21 = vpop.eup %3084  ;;  %v2528_v33 = vadd.f32 0.001, %v2488_v1 }
 0x3b0   :  { %v2623_v60 = vmul.f32 %v3083_v31, %v2622_v4  ;;  %v2629_v36 = vmul.f32 %v3085_v21, %v2527_v6  ;;  %vm2635_vm14 = vweird.f32 %v3085_v21 }
 0x3b1   :  { %3086 = vrsqrt.f32 %v2528_v33  ;;  %vm2636_vm0 = vmor %vm2634_vm15, %vm2635_vm14  ;;  %vm2644_vm3 = vweird.f32 %v2528_v33 }
 0x3b2   :  { %v2630_v16 = vmul.f32 %v3085_v21, %v2629_v36  ;;  %v2627_v57 = vsel %vm2626_vm13, %v3083_v31, %v2623_v60  ;;  %v2508_v60 = vld [vmem:[%s5306_s3 + $0x50] sm:$0xff] }
 0x3b3   :  { %v2746_v28 = vmul.f32 %v2627_v57, %v2506_v50 }
 0x3b4   :  { %v2631_v45 = vmul.f32 0.5, %v2630_v16  ;;  %v2453_v14 = vpop.xlane.xlu0 %2452 }
 0x3b5   :  { %v2489_v2 = vmul.f32 0.020408163, %v2453_v14  ;;  %2800 = vperm.xlu0 %3063, %v2746_v28  }
 0x3b6   :  { %v2632_v56 = vsub.f32 1.5, %v2631_v45 }
 0x3b7   :  { %v3087_v55 = vpop.eup %3086  ;;  %v2529_v47 = vadd.f32 0.001, %v2489_v2 }
 0x3b8   :  { %v2633_v19 = vmul.f32 %v3085_v21, %v2632_v56  ;;  %v2639_v49 = vmul.f32 %v3087_v55, %v2528_v33  ;;  %vm2645_vm2 = vweird.f32 %v3087_v55 }
 0x3b9   :  { %3088 = vrsqrt.f32 %v2529_v47  ;;  %vm2646_vm4 = vmor %vm2644_vm3, %vm2645_vm2  ;;  %vm2654_vm6 = vweird.f32 %v2529_v47 }
 0x3ba   :  { %v2640_v46 = vmul.f32 %v3087_v55, %v2639_v49  ;;  %v2637_v31 = vsel %vm2636_vm0, %v3085_v21, %v2633_v19  ;;  %v2509_v19 = vld [vmem:[%s5306_s3 + $0x58] sm:$0xff] }
 0x3bb   :  { %v2747_v39 = vmul.f32 %v2637_v31, %v2507_v53 }
 0x3bc   :  { %v2641_v40 = vmul.f32 0.5, %v2640_v46  ;;  %v2456_v0 = vpop.xlane.xlu1 %2455 }
 0x3bd   :  { %v2490_v27 = vmul.f32 0.020408163, %v2456_v0  ;;  %2805 = vperm.xlu2 %3065, %v2747_v39  }
 0x3be   :  { %v2642_v12 = vsub.f32 1.5, %v2641_v40 }
 0x3bf   :  { %v3089_v29 = vpop.eup %3088  ;;  %v2530_v1 = vadd.f32 0.001, %v2490_v27 }
 0x3c0   :  { %v2643_v4 = vmul.f32 %v3087_v55, %v2642_v12  ;;  %v2649_v6 = vmul.f32 %v3089_v29, %v2529_v47  ;;  %vm2655_vm5 = vweird.f32 %v3089_v29 }
 0x3c1   :  { %3090 = vrsqrt.f32 %v2530_v1  ;;  %vm2656_vm7 = vmor %vm2654_vm6, %vm2655_vm5  ;;  %vm2664_vm9 = vweird.f32 %v2530_v1 }
 0x3c2   :  { %v2650_v36 = vmul.f32 %v3089_v29, %v2649_v6  ;;  %v2647_v21 = vsel %vm2646_vm4, %v3087_v55, %v2643_v4  ;;  %v2510_v4 = vld [vmem:[%s5306_s3 + $0x60] sm:$0xff] }
 0x3c3   :  { %v2748_v50 = vmul.f32 %v2647_v21, %v2508_v60 }
 0x3c4   :  { %v2651_v16 = vmul.f32 0.5, %v2650_v36  ;;  %v2459_v57 = vpop.xlane.xlu2 %2458 }
 0x3c5   :  { %v2491_v28 = vmul.f32 0.020408163, %v2459_v57  ;;  %2810 = vperm.xlu1 %3064, %v2748_v50  }
 0x3c6   :  { %v2652_v45 = vsub.f32 1.5, %v2651_v16 }
 0x3c7   :  { %v3091_v14 = vpop.eup %3090  ;;  %v2531_v2 = vadd.f32 0.001, %v2491_v28 }
 0x3c8   :  { %v2653_v56 = vmul.f32 %v3089_v29, %v2652_v45  ;;  %v2659_v33 = vmul.f32 %v3091_v14, %v2530_v1  ;;  %vm2665_vm8 = vweird.f32 %v3091_v14 }
 0x3c9   :  { %3092 = vrsqrt.f32 %v2531_v2  ;;  %vm2666_vm10 = vmor %vm2664_vm9, %vm2665_vm8  ;;  %vm2674_vm12 = vweird.f32 %v2531_v2 }
 0x3ca   :  { %v2660_v49 = vmul.f32 %v3091_v14, %v2659_v33  ;;  %v2657_v55 = vsel %vm2656_vm7, %v3089_v29, %v2653_v56  ;;  %v2511_v56 = vld [vmem:[%s5306_s3 + $0x68] sm:$0xff] }
 0x3cb   :  { %v2749_v53 = vmul.f32 %v2657_v55, %v2509_v19 }
 0x3cc   :  { %v2661_v46 = vmul.f32 0.5, %v2660_v49  ;;  %v2462_v31 = vpop.xlane.xlu0 %2461 }
 0x3cd   :  { %v2492_v39 = vmul.f32 0.020408163, %v2462_v31  ;;  %2815 = vperm.xlu0 %3063, %v2749_v53  }
 0x3ce   :  { %v2662_v40 = vsub.f32 1.5, %v2661_v46 }
 0x3cf   :  { %v3093_v0 = vpop.eup %3092  ;;  %v2532_v27 = vadd.f32 0.001, %v2492_v39 }
 0x3d0   :  { %v2663_v12 = vmul.f32 %v3091_v14, %v2662_v40  ;;  %v2669_v47 = vmul.f32 %v3093_v0, %v2531_v2  ;;  %vm2675_vm11 = vweird.f32 %v3093_v0 }
 0x3d1   :  { %3094 = vrsqrt.f32 %v2532_v27  ;;  %vm2676_vm13 = vmor %vm2674_vm12, %vm2675_vm11  ;;  %vm2684_vm15 = vweird.f32 %v2532_v27 }
 0x3d2   :  { %v2670_v6 = vmul.f32 %v3093_v0, %v2669_v47  ;;  %v2667_v29 = vsel %vm2666_vm10, %v3091_v14, %v2663_v12  ;;  %v2512_v12 = vld [vmem:[%s5306_s3 + $0x70] sm:$0xff] }
 0x3d3   :  { %v2750_v60 = vmul.f32 %v2667_v29, %v2510_v4 }
 0x3d4   :  { %v2671_v36 = vmul.f32 0.5, %v2670_v6  ;;  %v2465_v21 = vpop.xlane.xlu1 %2464 }
 0x3d5   :  { %v2493_v50 = vmul.f32 0.020408163, %v2465_v21  ;;  %2820 = vperm.xlu2 %3065, %v2750_v60  }
 0x3d6   :  { %v2672_v16 = vsub.f32 1.5, %v2671_v36 }
 0x3d7   :  { %v3095_v57 = vpop.eup %3094  ;;  %v2533_v28 = vadd.f32 0.001, %v2493_v50 }
 0x3d8   :  { %v2673_v45 = vmul.f32 %v3093_v0, %v2672_v16  ;;  %v2679_v1 = vmul.f32 %v3095_v57, %v2532_v27  ;;  %vm2685_vm14 = vweird.f32 %v3095_v57 }
 0x3d9   :  { %3096 = vrsqrt.f32 %v2533_v28  ;;  %vm2686_vm0 = vmor %vm2684_vm15, %vm2685_vm14  ;;  %vm2694_vm3 = vweird.f32 %v2533_v28 }
 0x3da   :  { %v2680_v33 = vmul.f32 %v3095_v57, %v2679_v1  ;;  %v2677_v14 = vsel %vm2676_vm13, %v3093_v0, %v2673_v45  ;;  %v2513_v45 = vld [vmem:[%s5306_s3 + $0x78] sm:$0xff] }
 0x3db   :  { %v2751_v19 = vmul.f32 %v2677_v14, %v2511_v56 }
 0x3dc   :  { %v2681_v49 = vmul.f32 0.5, %v2680_v33  ;;  %v2468_v55 = vpop.xlane.xlu2 %2467 }
 0x3dd   :  { %v2494_v53 = vmul.f32 0.020408163, %v2468_v55  ;;  %2825 = vperm.xlu1 %3064, %v2751_v19  }
 0x3de   :  { %v2682_v46 = vsub.f32 1.5, %v2681_v49 }
 0x3df   :  { %v3097_v31 = vpop.eup %3096  ;;  %v2534_v39 = vadd.f32 0.001, %v2494_v53 }
 0x3e0   :  { %v2683_v40 = vmul.f32 %v3095_v57, %v2682_v46  ;;  %v2689_v2 = vmul.f32 %v3097_v31, %v2533_v28  ;;  %vm2695_vm2 = vweird.f32 %v3097_v31 }
 0x3e1   :  { %3098 = vrsqrt.f32 %v2534_v39  ;;  %vm2696_vm4 = vmor %vm2694_vm3, %vm2695_vm2  ;;  %vm2704_vm6 = vweird.f32 %v2534_v39 }
 0x3e2   :  { %v2690_v47 = vmul.f32 %v3097_v31, %v2689_v2  ;;  %v2687_v0 = vsel %vm2686_vm0, %v3095_v57, %v2683_v40  ;;  %v2514_v40 = vld [vmem:[%s5306_s3 + $0x80] sm:$0xff] }
 0x3e3   :  { %v2752_v4 = vmul.f32 %v2687_v0, %v2512_v12 }
 0x3e4   :  { %v2691_v6 = vmul.f32 0.5, %v2690_v47  ;;  %v2471_v29 = vpop.xlane.xlu0 %2470 }
 0x3e5   :  { %v2495_v60 = vmul.f32 0.020408163, %v2471_v29  ;;  %2830 = vperm.xlu0 %3063, %v2752_v4  }
 0x3e6   :  { %v2692_v36 = vsub.f32 1.5, %v2691_v6 }
 0x3e7   :  { %v3099_v21 = vpop.eup %3098  ;;  %v2535_v50 = vadd.f32 0.001, %v2495_v60 }
 0x3e8   :  { %v2693_v16 = vmul.f32 %v3097_v31, %v2692_v36  ;;  %v2699_v27 = vmul.f32 %v3099_v21, %v2534_v39  ;;  %vm2705_vm5 = vweird.f32 %v3099_v21 }
 0x3e9   :  { %3100 = vrsqrt.f32 %v2535_v50  ;;  %vm2706_vm7 = vmor %vm2704_vm6, %vm2705_vm5  ;;  %vm2714_vm9 = vweird.f32 %v2535_v50 }
 0x3ea   :  { %v2700_v1 = vmul.f32 %v3099_v21, %v2699_v27  ;;  %v2697_v57 = vsel %vm2696_vm4, %v3097_v31, %v2693_v16 }
 0x3eb   :  { %v2753_v56 = vmul.f32 %v2697_v57, %v2513_v45  ;;  %v2515_v45 = vld [vmem:[%s5306_s3 + $0x88] sm:$0xff] }
 0x3ec   :  { %v2701_v33 = vmul.f32 0.5, %v2700_v1  ;;  %v2474_v14 = vpop.xlane.xlu1 %2473 }
 0x3ed   :  { %v2496_v19 = vmul.f32 0.020408163, %v2474_v14  ;;  %2835 = vperm.xlu2 %3065, %v2753_v56  }
 0x3ee   :  { %v2702_v49 = vsub.f32 1.5, %v2701_v33 }
 0x3ef   :  { %v3101_v55 = vpop.eup %3100  ;;  %v2536_v53 = vadd.f32 0.001, %v2496_v19 }
 0x3f0   :  { %v2703_v46 = vmul.f32 %v3099_v21, %v2702_v49  ;;  %v2709_v28 = vmul.f32 %v3101_v55, %v2535_v50  ;;  %vm2715_vm8 = vweird.f32 %v3101_v55 }
 0x3f1   :  { %3102 = vrsqrt.f32 %v2536_v53  ;;  %vm2716_vm10 = vmor %vm2714_vm9, %vm2715_vm8  ;;  %vm2724_vm12 = vweird.f32 %v2536_v53 }
 0x3f2   :  { %v2710_v2 = vmul.f32 %v3101_v55, %v2709_v28  ;;  %v2707_v31 = vsel %vm2706_vm7, %v3099_v21, %v2703_v46 }
 0x3f3   :  { %v2754_v12 = vmul.f32 %v2707_v31, %v2514_v40  ;;  %v2516_v40 = vld [vmem:[%s5306_s3 + $0x90] sm:$0xff] }
 0x3f4   :  { %v2711_v47 = vmul.f32 0.5, %v2710_v2  ;;  %v2477_v0 = vpop.xlane.xlu2 %2476 }
 0x3f5   :  { %v2497_v4 = vmul.f32 0.020408163, %v2477_v0  ;;  %2840 = vperm.xlu1 %3064, %v2754_v12  }
 0x3f6   :  { %v2712_v6 = vsub.f32 1.5, %v2711_v47 }
 0x3f7   :  { %v3103_v29 = vpop.eup %3102  ;;  %v2537_v60 = vadd.f32 0.001, %v2497_v4  ;;  %v2761_v36 = vpop.permute.xlu0 %2760 }
 0x3f8   :  { %v2713_v39 = vmul.f32 %v3101_v55, %v2712_v6  ;;  %v2719_v16 = vmul.f32 %v3103_v29, %v2536_v53  ;;  %v2858_v27 = vmul.f32 %v2761_v36, %v4943_v42  ;;  %vm2725_vm11 = vweird.f32 %v3103_v29  ;;  %v2896_v53 = vld [vmem:[%s5305_s4 + $0x90] sm:$0xff] }
 0x3f9   :  { %3104 = vrsqrt.f32 %v2537_v60  ;;  %vm2726_vm13 = vmor %vm2724_vm12, %vm2725_vm11  ;;  %vm2734_vm15 = vweird.f32 %v2537_v60 }
 0x3fa   :  { %v2720_v21 = vmul.f32 %v3103_v29, %v2719_v16  ;;  %v2998_v1 = vadd.f32 %v4873_v58, %v2858_v27  ;;  %v2717_v57 = vsel %vm2716_vm10, %v3101_v55, %v2713_v39  ;;  %v2517_v39 = vld [vmem:[%s5306_s3 + $0x98] sm:$0xff] }
 0x3fb   :  { %v2755_v56 = vmul.f32 %v2717_v57, %v2515_v45 }
 0x3fc   :  { %v2721_v33 = vmul.f32 0.5, %v2720_v21  ;;  %3018 = vst.msk [vmem:[%s5307_s5] sm:$0xff] %vm2297_vm1, %v2998_v1  ;;  %v2771_v50 = vpop.permute.xlu2 %2770  ;;  %v2895_v1 = vld [vmem:[%s5305_s4 + $0x88] sm:$0xff] }
 0x3fd   :  { %v2860_v42 = vmul.f32 %v2771_v50, %v4967_v61  ;;  %2845 = vperm.xlu0 %3063, %v2755_v56  }
 0x3fe   :  { %v2722_v14 = vsub.f32 1.5, %v2721_v33 }
 0x3ff   :  { %v3105_v19 = vpop.eup %3104  ;;  %v3000_v49 = vadd.f32 %v4889_v54, %v2860_v42  ;;  %v2776_v46 = vpop.permute.xlu0 %2775 }
 0x400   :  { %v2723_v28 = vmul.f32 %v3103_v29, %v2722_v14  ;;  %v2729_v58 = vmul.f32 %v3105_v19, %v2537_v60  ;;  %v2861_v55 = vmul.f32 %v2776_v46, %v4978_v35  ;;  %vm2735_vm14 = vweird.f32 %v3105_v19 }
 0x401   :  { %3020 = vst.msk [vmem:[%s5307_s5 + $0x10] sm:$0xff] %vm2297_vm1, %v3000_v49  ;;  %vm2736_vm0 = vmor %vm2734_vm15, %vm2735_vm14 }
 0x402   :  { %v2730_v61 = vmul.f32 %v3105_v19, %v2729_v58  ;;  %v3001_v2 = vadd.f32 %v4880_v3, %v2861_v55  ;;  %v2727_v54 = vsel %vm2726_vm13, %v3103_v29, %v2723_v28 }
 0x403   :  { %v2756_v31 = vmul.f32 %v2727_v54, %v2516_v40  ;;  %v5312_v54 = vld [vmem:[#allocation2_spill] sm:$0xff] }
 0x404   :  { %v2731_v35 = vmul.f32 0.5, %v2730_v61  ;;  %3021 = vst.msk [vmem:[%s5307_s5 + $0x18] sm:$0xff] %vm2297_vm1, %v3001_v2  ;;  %v2766_v12 = vpop.permute.xlu1 %2765  ;;  %v2791_v47 = vpop.permute.xlu2 %2790 }
 0x405   :  { %v2859_v0 = vmul.f32 %v2766_v12, %v4956_v23  ;;  %v2864_v4 = vmul.f32 %v2791_v47, %v5003_v30  ;;  %2850 = vperm.xlu2 %3065, %v2756_v31   ;;  %2990 = vperm.xlu0 %3063, %v2896_v53  }
 0x406   :  { %v2732_v3 = vsub.f32 1.5, %v2731_v35 }
 0x407   :  { %v2999_v6 = vadd.f32 %v4887_v22, %v2859_v0  ;;  %v3004_v29 = vadd.f32 %v4891_v32, %v2864_v4  ;;  %v2897_v22 = vld [vmem:[%s5305_s4 + $0x98] sm:$0xff] }
 0x408   :  { %v2733_v36 = vmul.f32 %v3105_v19, %v2732_v3 }
 0x409   :  { %3019 = vst.msk [vmem:[%s5307_s5 + $0x8] sm:$0xff] %vm2297_vm1, %v2999_v6 }
 0x40a   :  { %3024 = vst.msk [vmem:[%s5307_s5 + $0x30] sm:$0xff] %vm2297_vm1, %v3004_v29  ;;  %v2737_v32 = vsel %vm2736_vm0, %v3105_v19, %v2733_v36 }
 0x40b   :  { %v2757_v23 = vmul.f32 %v2737_v32, %v2517_v39 }
 0x40c   :  { %v2781_v30 = vpop.permute.xlu1 %2780 }
 0x40d   :  { %v2862_v60 = vmul.f32 %v2781_v30, %v4989_v38  ;;  %2995 = vperm.xlu2 %3065, %v2897_v22   ;;  %2855 = vperm.xlu1 %3064, %v2757_v23  }
 0x40f   :  { %v3002_v16 = vadd.f32 %v4898_v43, %v2862_v60  ;;  %v2786_v27 = vpop.permute.xlu0 %2785 }
 0x410   :  { %v2863_v45 = vmul.f32 %v2786_v27, %v4997_v8 }
 0x411   :  { %3022 = vst.msk [vmem:[%s5307_s5 + $0x20] sm:$0xff] %vm2297_vm1, %v3002_v16 }
 0x412   :  { %v3003_v21 = vadd.f32 %v4900_v25, %v2863_v45 }
 0x414   :  { %3023 = vst.msk [vmem:[%s5307_s5 + $0x28] sm:$0xff] %vm2297_vm1, %v3003_v21 }
 0x415   :  { %2985 = vperm.xlu1 %3064, %v2895_v1  }
 0x417   :  { %v2806_v43 = vpop.permute.xlu2 %2805 }
 0x418   :  { %v2867_v38 = vmul.f32 %v2806_v43, %v5021_v59 }
 0x41a   :  { %v3007_v8 = vadd.f32 %v4904_v48, %v2867_v38 }
 0x41c   :  { %3027 = vst.msk [vmem:[%s5307_s5 + $0x48] sm:$0xff] %vm2297_vm1, %v3007_v8 }
 0x41f   :  { %v2796_v25 = vpop.permute.xlu1 %2795 }
 0x420   :  { %v2865_v57 = vmul.f32 %v2796_v25, %v5009_v37 }
 0x422   :  { %v3005_v56 = vadd.f32 %v4909_v63, %v2865_v57 }
 0x424   :  { %3025 = vst.msk [vmem:[%s5307_s5 + $0x38] sm:$0xff] %vm2297_vm1, %v3005_v56 }
 0x427   :  { %v2801_v33 = vpop.permute.xlu0 %2800 }
 0x428   :  { %v2866_v59 = vmul.f32 %v2801_v33, %v5015_v11 }
 0x42a   :  { %v3006_v48 = vadd.f32 %v4913_v7, %v2866_v59 }
 0x42c   :  { %3026 = vst.msk [vmem:[%s5307_s5 + $0x40] sm:$0xff] %vm2297_vm1, %v3006_v48 }
 0x42f   :  { %v2821_v50 = vpop.permute.xlu2 %2820 }
 0x430   :  { %v2870_v37 = vmul.f32 %v2821_v50, %v5039_v13 }
 0x432   :  { %v3010_v63 = vadd.f32 %v4918_v15, %v2870_v37 }
 0x434   :  { %3030 = vst.msk [vmem:[%s5307_s5 + $0x60] sm:$0xff] %vm2297_vm1, %v3010_v63 }
 0x437   :  { %v2811_v42 = vpop.permute.xlu1 %2810 }
 0x438   :  { %v2868_v11 = vmul.f32 %v2811_v42, %v5027_v26 }
 0x43a   :  { %v3008_v7 = vadd.f32 %v4922_v24, %v2868_v11 }
 0x43c   :  { %3028 = vst.msk [vmem:[%s5307_s5 + $0x50] sm:$0xff] %vm2297_vm1, %v3008_v7 }
 0x43f   :  { %v2816_v14 = vpop.permute.xlu0 %2815 }
 0x440   :  { %v2869_v13 = vmul.f32 %v2816_v14, %v5033_v44 }
 0x442   :  { %v3009_v15 = vadd.f32 %v4927_v10, %v2869_v13 }
 0x444   :  { %3029 = vst.msk [vmem:[%s5307_s5 + $0x58] sm:$0xff] %vm2297_vm1, %v3009_v15 }
 0x447   :  { %v2836_v19 = vpop.permute.xlu2 %2835 }
 0x448   :  { %v2873_v26 = vmul.f32 %v2836_v19, %v5057_v18 }
 0x44a   :  { %v3013_v24 = vadd.f32 %v4929_v52, %v2873_v26 }
 0x44c   :  { %3033 = vst.msk [vmem:[%s5307_s5 + $0x78] sm:$0xff] %vm2297_vm1, %v3013_v24 }
 0x44f   :  { %v2826_v49 = vpop.permute.xlu1 %2825 }
 0x450   :  { %v2871_v44 = vmul.f32 %v2826_v49, %v5045_v20 }
 0x452   :  { %v3011_v10 = vadd.f32 %v4936_v41, %v2871_v44 }
 0x454   :  { %3031 = vst.msk [vmem:[%s5307_s5 + $0x68] sm:$0xff] %vm2297_vm1, %v3011_v10 }
 0x457   :  { %v2831_v46 = vpop.permute.xlu0 %2830 }
 0x458   :  { %v2872_v18 = vmul.f32 %v2831_v46, %v5051_v9 }
 0x45a   :  { %v3012_v52 = vadd.f32 %v4938_v51, %v2872_v18 }
 0x45c   :  { %3032 = vst.msk [vmem:[%s5307_s5 + $0x70] sm:$0xff] %vm2297_vm1, %v3012_v52 }
 0x45f   :  { %v2851_v55 = vpop.permute.xlu2 %2850 }
 0x460   :  { %v2876_v9 = vmul.f32 %v2851_v55, %v5080_v34 }
 0x467   :  { %v2841_v28 = vpop.permute.xlu1 %2840 }
 0x468   :  { %v2874_v20 = vmul.f32 %v2841_v28, %v5063_v5 }
 0x46a   :  { %v3014_v41 = vadd.f32 %v4951_v62, %v2874_v20  ;;  %v2996_v62 = vpop.permute.xlu2 %2995 }
 0x46c   :  { %3034 = vst.msk [vmem:[%s5307_s5 + $0x80] sm:$0xff] %vm2297_vm1, %v3014_v41 }
 0x46f   :  { %v2846_v58 = vpop.permute.xlu0 %2845 }
 0x470   :  { %v2875_v53 = vmul.f32 %v2846_v58, %v5312_v54 }
 0x477   :  { %v2991_v51 = vpop.permute.xlu0 %2990 }
 0x478   :  { %v3016_v40 = vadd.f32 %v2991_v51, %v2876_v9 }
 0x47a   :  { %3036 = vst.msk [vmem:[%s5307_s5 + $0x90] sm:$0xff] %vm2297_vm1, %v3016_v40 }
 0x47f   :  { %v2856_v61 = vpop.permute.xlu1 %2855 }
 0x480   :  { %v2877_v5 = vmul.f32 %v2856_v61, %v5091_v17 }
 0x482   :  { %v3017_v2 = vadd.f32 %v2996_v62, %v2877_v5 }
 0x484   :  { %3037 = vst.msk [vmem:[%s5307_s5 + $0x98] sm:$0xff] %vm2297_vm1, %v3017_v2 }
 0x487   :  { %v2986_v34 = vpop.permute.xlu1 %2985 }
 0x488   :  { %v3015_v31 = vadd.f32 %v2986_v34, %v2875_v53 }
 0x48a   :  { %3035 = vst.msk [vmem:[%s5307_s5 + $0x88] sm:$0xff] %vm2297_vm1, %v3015_v31 }

</bundles_post_ra>
